<compile_context>
chip_gen: v6e
topology: v6e:2x2x1
jax: 0.10.0
libtpu: 0.0.40
codegen_flags: <defaults>
</compile_context>

<pallas_src>
import jax
import jax.numpy as jnp
from jax.experimental import pallas as pl
from jax.experimental.pallas import tpu as pltpu

LATENT_DIM = 4
LATENT_LENGTH = 2
ACTION_LENGTH = 1
NUM_HIDDEN = 9                                # num_layers in the PyTorch module
IN_FEAT = LATENT_LENGTH * LATENT_DIM ** 2     # 2 * 16 = 32
HID = 512
MID = 32
MID_PAD = 128                                 # lane-dense penultimate width
OUT = 7 * ACTION_LENGTH                       # 7
OUT_PAD = 128                                 # lane-dense output width
BN_EPS = 1e-5
MAX_BATCH_TILE = 512                          # rows per grid step (MXU fill)


# --------------------------- Pallas kernel ---------------------------------

def mlp_kernel(x_ref, w_in_ref, b_in_ref, w_hid_ref, b_hid_ref,
               w_mid_ref, b_mid_ref, w_out_ref, b_out_ref, o_ref):
    # Input layer: Linear(32,512) + folded BN + ReLU.  bf16 x bf16 -> f32 on
    # the MXU; bias/ReLU in f32; bf16 recast fused into the epilogue.
    h = jnp.maximum(
        jnp.dot(x_ref[...], w_in_ref[...], preferred_element_type=jnp.float32)
        + b_in_ref[...], 0.0).astype(jnp.bfloat16)

    # 9 hidden layers (statically unrolled): Linear(512,512) + folded BN + ReLU.
    for i in range(NUM_HIDDEN):
        h = jnp.maximum(
            jnp.dot(h, w_hid_ref[i], preferred_element_type=jnp.float32)
            + b_hid_ref[i], 0.0).astype(jnp.bfloat16)

    # Penultimate layer: Linear(512, 32 -> padded 128) + folded BN + ReLU.
    # Padded columns have zero weights/bias -> ReLU(0) = 0, so they contribute
    # nothing downstream; activation stays lane-dense.
    m = jnp.maximum(
        jnp.dot(h, w_mid_ref[...], preferred_element_type=jnp.float32)
        + b_mid_ref[...], 0.0).astype(jnp.bfloat16)

    # Output head: Linear(32 -> 7, padded to 128x128) + Tanh.  Zero rows /
    # columns are inert; tanh(0) = 0; sliced off in the wrapper.  Lane-dense store.
    y = jnp.dot(m, w_out_ref[...], preferred_element_type=jnp.float32) \
        + b_out_ref[...]
    o_ref[...] = jnp.tanh(y)


# --------------------------- tiling helpers ----------------------------------

def _round_up(n, m):
    return ((n + m - 1) // m) * m


def _choose_batch_tile(b):
    """Rows per grid step.

    * Single grid step whenever the batch fits in <=512 rows: full MXU row
      fill on single-TC chips (v5e/v6e) and no duplicated per-core weight DMA
      on v7x in the small-batch, weight-load-bound regime.
    * Larger batches are split evenly into steps of <=512 rows; on v7x the
      "parallel" grid axis then shards the steps across both TensorCores.
    """
    b8 = _round_up(max(b, 1), 8)
    if b8 <= MAX_BATCH_TILE:
        return b8
    n_steps = -(-b8 // MAX_BATCH_TILE)          # ceil division
    return _round_up(-(-b8 // n_steps), 8)      # even split, multiple of 8


# --------------------------- Buffered(1) feature probe -----------------------

def _probe_single_buffer_support():
    """One-time check that pipeline_mode=pl.Buffered(1) lowers/compiles."""
    if not hasattr(pl, "Buffered"):
        return False
    try:
        spec = pl.BlockSpec((8, 128), lambda i: (0, 0),
                            pipeline_mode=pl.Buffered(1))

        def _copy(x_ref, o_ref):
            o_ref[...] = x_ref[...]

        f = pl.pallas_call(
            _copy,
            out_shape=jax.ShapeDtypeStruct((8, 128), jnp.float32),
            grid=(1,),
            in_specs=[spec],
            out_specs=pl.BlockSpec((8, 128), lambda i: (0, 0)),
        )
        jax.jit(f).lower(jnp.zeros((8, 128), jnp.float32)).compile()
        return True
    except Exception:
        return False


_SINGLE_BUFFER_WEIGHTS = _probe_single_buffer_support()


# --------------------------- wrapper ----------------------------------------

def _weight_spec(a):
    """Grid-invariant (resident) weight/bias block."""
    ndim = a.ndim
    if _SINGLE_BUFFER_WEIGHTS:
        return pl.BlockSpec(a.shape, lambda i: (0,) * ndim,
                            pipeline_mode=pl.Buffered(1))
    return pl.BlockSpec(a.shape, lambda i: (0,) * ndim)


def _run_pallas(x_pad, params, bt, Bp):
    (w_in, b_in, w_hid, b_hid, w_mid, b_mid, w_out, b_out) = params

    flops = 2 * Bp * (IN_FEAT * HID + NUM_HIDDEN * HID * HID
                      + HID * MID_PAD + MID_PAD * OUT_PAD)
    bytes_accessed = int(
        x_pad.size * x_pad.dtype.itemsize
        + sum(int(p.size) * p.dtype.itemsize for p in params)
        + Bp * OUT_PAD * 4)
    cost = pl.CostEstimate(flops=flops,
                           transcendentals=Bp * OUT,
                           bytes_accessed=bytes_accessed)

    return pl.pallas_call(
        mlp_kernel,
        out_shape=jax.ShapeDtypeStruct((Bp, OUT_PAD), jnp.float32),
        grid_spec=pltpu.PrefetchScalarGridSpec(
            num_scalar_prefetch=0,
            grid=(Bp // bt,),
            in_specs=[
                pl.BlockSpec((bt, IN_FEAT), lambda i: (i, 0)),   # x tile
                _weight_spec(w_in), _weight_spec(b_in),
                _weight_spec(w_hid), _weight_spec(b_hid),
                _weight_spec(w_mid), _weight_spec(b_mid),
                _weight_spec(w_out), _weight_spec(b_out),
            ],
            out_specs=pl.BlockSpec((bt, OUT_PAD), lambda i: (i, 0)),
        ),
        compiler_params=pltpu.CompilerParams(
            # Harmless on single-TC v5e/v6e; shards multi-step grids across
            # both TensorCores on v7x.
            dimension_semantics=("parallel",),
            # bf16 weights ~4.9 MiB resident (<=9.8 MiB if double-buffered)
            # + <2 MiB activations / IO tiles; 32 MiB leaves headroom and
            # stays well under v7x's 64 MiB VMEM per TensorCore.
            vmem_limit_bytes=32 << 20,
        ),
        cost_estimate=cost,
    )(x_pad, w_in, b_in, w_hid, b_hid, w_mid, b_mid, w_out, b_out)


@jax.jit
def action_mlp_forward(x, params):
    """x: (B, latent_length, latent_dim, latent_dim) -> (B, 7) float32."""
    B = x.shape[0]
    x2 = x.reshape(B, -1).astype(jnp.bfloat16)          # Flatten (glue)
    assert x2.shape[1] == IN_FEAT

    bt = _choose_batch_tile(B)
    Bp = _round_up(B, bt)
    x_pad = jnp.pad(x2, ((0, Bp - B), (0, 0)))

    out_pad = _run_pallas(x_pad, params, bt, Bp)
    return out_pad[:B, :OUT]


# --------------------------- parameter setup --------------------------------

def _linear_init(key, fan_in, fan_out):
    kw, kb = jax.random.split(key)
    bound = 1.0 / jnp.sqrt(jnp.float32(fan_in))
    w = jax.random.uniform(kw, (fan_in, fan_out), jnp.float32, -bound, bound)
    b = jax.random.uniform(kb, (fan_out,), jnp.float32, -bound, bound)
    return w, b


def _bn_init(key, n):
    k1, k2, k3, k4 = jax.random.split(key, 4)
    gamma = jax.random.uniform(k1, (n,), jnp.float32, 0.5, 1.5)
    beta = 0.1 * jax.random.normal(k2, (n,), jnp.float32)
    mean = 0.1 * jax.random.normal(k3, (n,), jnp.float32)
    var = jax.random.uniform(k4, (n,), jnp.float32, 0.5, 1.5)
    return gamma, beta, mean, var


def _fold_bn(w, b, bn):
    gamma, beta, mean, var = bn
    scale = gamma / jnp.sqrt(var + BN_EPS)
    return w * scale[None, :], (b - mean) * scale + beta


def init_params(key):
    keys = jax.random.split(key, 2 * (NUM_HIDDEN + 2) + 1)
    ki = iter(range(len(keys)))

    # Linear(32, 512) + BN(512): fold BN in f32, store W in bf16.
    w_in, b_in = _linear_init(keys[next(ki)], IN_FEAT, HID)
    w_in, b_in = _fold_bn(w_in, b_in, _bn_init(keys[next(ki)], HID))

    # 9 x [Linear(512, 512) + BN(512)]
    w_hid, b_hid = [], []
    for _ in range(NUM_HIDDEN):
        w, b = _linear_init(keys[next(ki)], HID, HID)
        w, b = _fold_bn(w, b, _bn_init(keys[next(ki)], HID))
        w_hid.append(w)
        b_hid.append(b)
    w_hid = jnp.stack(w_hid)                         # (9, 512, 512)
    b_hid = jnp.stack(b_hid)[:, None, :]             # (9, 1, 512)

    # Linear(512, 32) + BN(32), padded to 128 lanes (zero cols 32..127).
    w_mid, b_mid = _linear_init(keys[next(ki)], HID, MID)
    w_mid, b_mid = _fold_bn(w_mid, b_mid, _bn_init(keys[next(ki)], MID))
    w_mid = jnp.pad(w_mid, ((0, 0), (0, MID_PAD - MID)))
    b_mid = jnp.pad(b_mid, (0, MID_PAD - MID))

    # Linear(32, 7), no BN — padded to 128x128 (zero rows 32.., zero cols 7..).
    w_out, b_out = _linear_init(keys[next(ki)], MID, OUT)
    w_out = jnp.pad(w_out, ((0, MID_PAD - MID), (0, OUT_PAD - OUT)))
    b_out = jnp.pad(b_out, (0, OUT_PAD - OUT))

    return (w_in.astype(jnp.bfloat16), b_in[None, :].astype(jnp.float32),
            w_hid.astype(jnp.bfloat16), b_hid.astype(jnp.float32),
            w_mid.astype(jnp.bfloat16), b_mid[None, :].astype(jnp.float32),
            w_out.astype(jnp.bfloat16), b_out[None, :].astype(jnp.float32))


# --------------------------- reference (plain JAX) ---------------------------

def ref_forward(x, params):
    (w_in, b_in, w_hid, b_hid, w_mid, b_mid, w_out, b_out) = params
    h = x.reshape(x.shape[0], -1).astype(jnp.bfloat16)
    h = jnp.maximum(
        jnp.dot(h, w_in, preferred_element_type=jnp.float32) + b_in,
        0.0).astype(jnp.bfloat16)
    for i in range(NUM_HIDDEN):
        h = jnp.maximum(
            jnp.dot(h, w_hid[i], preferred_element_type=jnp.float32) + b_hid[i],
            0.0).astype(jnp.bfloat16)
    m = jnp.maximum(
        jnp.dot(h, w_mid, preferred_element_type=jnp.float32) + b_mid,
        0.0).astype(jnp.bfloat16)
    y = jnp.dot(m, w_out, preferred_element_type=jnp.float32) + b_out
    return jnp.tanh(y)[:, :OUT]


# --------------------------- main --------------------------------------------

if __name__ == "__main__":
    key = jax.random.PRNGKey(0)
    kx, kx2, kp = jax.random.split(key, 3)
    params = init_params(kp)

    # (batch, latent_length, latent_dim, latent_dim) = (2, 2, 4, 4)
    x = jax.random.normal(kx, (2, LATENT_LENGTH, LATENT_DIM, LATENT_DIM),
                          jnp.float32)
    out = jax.block_until_ready(action_mlp_forward(x, params))
    expected = ref_forward(x, params)
    assert out.shape == (2, OUT), out.shape
    assert jnp.allclose(out, expected, atol=2e-2, rtol=2e-2), (
        jnp.max(jnp.abs(out - expected)))

    # Exercise the batch-padding path (single full-size tile, no 2-way split).
    xb = jax.random.normal(kx2, (37, LATENT_LENGTH, LATENT_DIM, LATENT_DIM),
                           jnp.float32)
    outb = jax.block_until_ready(action_mlp_forward(xb, params))
    expectedb = ref_forward(xb, params)
    assert outb.shape == (37, OUT), outb.shape
    assert jnp.allclose(outb, expectedb, atol=2e-2, rtol=2e-2), (
        jnp.max(jnp.abs(outb - expectedb)))

    print("KERNEL_OK")
</pallas_src>

<mosaic_0001>
module attributes {stable_mosaic.version = 11 : i64} {
  func.func @mlp_kernel(%arg0: i32, %arg1: memref<8x32xbf16, #tpu.memory_space<vmem>>, %arg2: memref<32x512xbf16, #tpu.memory_space<vmem>>, %arg3: memref<1x512xf32, #tpu.memory_space<vmem>>, %arg4: memref<9x512x512xbf16, #tpu.memory_space<vmem>>, %arg5: memref<9x1x512xf32, #tpu.memory_space<vmem>>, %arg6: memref<512x128xbf16, #tpu.memory_space<vmem>>, %arg7: memref<1x128xf32, #tpu.memory_space<vmem>>, %arg8: memref<128x128xbf16, #tpu.memory_space<vmem>>, %arg9: memref<1x128xf32, #tpu.memory_space<vmem>>, %arg10: memref<8x128xf32, #tpu.memory_space<vmem>>) attributes {dimension_semantics = [#tpu.dimension_semantics<parallel>], iteration_bounds = array<i64: 1>, scalar_prefetch = 0 : i64, scratch_operands = 0 : i64, tpu.core_type = #tpu.core_type<tc>, window_params = [{transform_indices = @transform_0, window_bounds = array<i64: 8, 32>}, {pipeline_mode = #tpu.pipeline_mode<synchronous>, transform_indices = @transform_1, window_bounds = array<i64: 32, 512>}, {pipeline_mode = #tpu.pipeline_mode<synchronous>, transform_indices = @transform_2, window_bounds = array<i64: 1, 512>}, {pipeline_mode = #tpu.pipeline_mode<synchronous>, transform_indices = @transform_3, window_bounds = array<i64: 9, 512, 512>}, {pipeline_mode = #tpu.pipeline_mode<synchronous>, transform_indices = @transform_4, window_bounds = array<i64: 9, 1, 512>}, {pipeline_mode = #tpu.pipeline_mode<synchronous>, transform_indices = @transform_5, window_bounds = array<i64: 512, 128>}, {pipeline_mode = #tpu.pipeline_mode<synchronous>, transform_indices = @transform_6, window_bounds = array<i64: 1, 128>}, {pipeline_mode = #tpu.pipeline_mode<synchronous>, transform_indices = @transform_7, window_bounds = array<i64: 128, 128>}, {pipeline_mode = #tpu.pipeline_mode<synchronous>, transform_indices = @transform_8, window_bounds = array<i64: 1, 128>}, {transform_indices = @transform_9, window_bounds = array<i64: 8, 128>}]} {
    %c0 = arith.constant 0 : index
    %c0_0 = arith.constant 0 : index
    %0 = vector.load %arg1[%c0, %c0_0] : memref<8x32xbf16, #tpu.memory_space<vmem>>, vector<8x32xbf16>
    %c0_1 = arith.constant 0 : index
    %c0_2 = arith.constant 0 : index
    %1 = vector.load %arg2[%c0_1, %c0_2] : memref<32x512xbf16, #tpu.memory_space<vmem>>, vector<32x512xbf16>
    %cst = arith.constant dense<0.000000e+00> : vector<8x512xf32>
    %2 = tpu.matmul %0, %1, %cst {dimension_numbers = #tpu.dot_dimension_numbers<[1], [0], [0], [1], [0, 0, 1, 1], [], []>} : vector<8x32xbf16>, vector<32x512xbf16>, vector<8x512xf32> -> vector<8x512xf32>
    %c0_3 = arith.constant 0 : index
    %c0_4 = arith.constant 0 : index
    %3 = vector.load %arg3[%c0_3, %c0_4] : memref<1x512xf32, #tpu.memory_space<vmem>>, vector<1x512xf32>
    %4 = vector.broadcast %3 : vector<1x512xf32> to vector<8x512xf32>
    %5 = arith.addf %2, %4 : vector<8x512xf32>
    %cst_5 = arith.constant 0.000000e+00 : f32
    %6 = vector.broadcast %cst_5 : f32 to vector<8x512xf32>
    %7 = arith.maximumf %5, %6 : vector<8x512xf32>
    %8 = arith.truncf %7 : vector<8x512xf32> to vector<8x512xbf16>
    %c0_6 = arith.constant 0 : index
    %c0_7 = arith.constant 0 : index
    %c0_8 = arith.constant 0 : index
    %9 = vector.load %arg4[%c0_6, %c0_7, %c0_8] : memref<9x512x512xbf16, #tpu.memory_space<vmem>>, vector<1x512x512xbf16>
    %10 = vector.shape_cast %9 : vector<1x512x512xbf16> to vector<512x512xbf16>
    %cst_9 = arith.constant dense<0.000000e+00> : vector<8x512xf32>
    %11 = tpu.matmul %8, %10, %cst_9 {dimension_numbers = #tpu.dot_dimension_numbers<[1], [0], [0], [1], [0, 0, 1, 1], [], []>} : vector<8x512xbf16>, vector<512x512xbf16>, vector<8x512xf32> -> vector<8x512xf32>
    %c0_10 = arith.constant 0 : index
    %c0_11 = arith.constant 0 : index
    %c0_12 = arith.constant 0 : index
    %12 = vector.load %arg5[%c0_10, %c0_11, %c0_12] : memref<9x1x512xf32, #tpu.memory_space<vmem>>, vector<1x1x512xf32>
    %13 = vector.shape_cast %12 : vector<1x1x512xf32> to vector<1x512xf32>
    %14 = vector.broadcast %13 : vector<1x512xf32> to vector<8x512xf32>
    %15 = arith.addf %11, %14 : vector<8x512xf32>
    %cst_13 = arith.constant 0.000000e+00 : f32
    %16 = vector.broadcast %cst_13 : f32 to vector<8x512xf32>
    %17 = arith.maximumf %15, %16 : vector<8x512xf32>
    %18 = arith.truncf %17 : vector<8x512xf32> to vector<8x512xbf16>
    %c1 = arith.constant 1 : index
    %c0_14 = arith.constant 0 : index
    %c0_15 = arith.constant 0 : index
    %19 = vector.load %arg4[%c1, %c0_14, %c0_15] : memref<9x512x512xbf16, #tpu.memory_space<vmem>>, vector<1x512x512xbf16>
    %20 = vector.shape_cast %19 : vector<1x512x512xbf16> to vector<512x512xbf16>
    %cst_16 = arith.constant dense<0.000000e+00> : vector<8x512xf32>
    %21 = tpu.matmul %18, %20, %cst_16 {dimension_numbers = #tpu.dot_dimension_numbers<[1], [0], [0], [1], [0, 0, 1, 1], [], []>} : vector<8x512xbf16>, vector<512x512xbf16>, vector<8x512xf32> -> vector<8x512xf32>
    %c1_17 = arith.constant 1 : index
    %c0_18 = arith.constant 0 : index
    %c0_19 = arith.constant 0 : index
    %22 = vector.load %arg5[%c1_17, %c0_18, %c0_19] : memref<9x1x512xf32, #tpu.memory_space<vmem>>, vector<1x1x512xf32>
    %23 = vector.shape_cast %22 : vector<1x1x512xf32> to vector<1x512xf32>
    %24 = vector.broadcast %23 : vector<1x512xf32> to vector<8x512xf32>
    %25 = arith.addf %21, %24 : vector<8x512xf32>
    %cst_20 = arith.constant 0.000000e+00 : f32
    %26 = vector.broadcast %cst_20 : f32 to vector<8x512xf32>
    %27 = arith.maximumf %25, %26 : vector<8x512xf32>
    %28 = arith.truncf %27 : vector<8x512xf32> to vector<8x512xbf16>
    %c2 = arith.constant 2 : index
    %c0_21 = arith.constant 0 : index
    %c0_22 = arith.constant 0 : index
    %29 = vector.load %arg4[%c2, %c0_21, %c0_22] : memref<9x512x512xbf16, #tpu.memory_space<vmem>>, vector<1x512x512xbf16>
    %30 = vector.shape_cast %29 : vector<1x512x512xbf16> to vector<512x512xbf16>
    %cst_23 = arith.constant dense<0.000000e+00> : vector<8x512xf32>
    %31 = tpu.matmul %28, %30, %cst_23 {dimension_numbers = #tpu.dot_dimension_numbers<[1], [0], [0], [1], [0, 0, 1, 1], [], []>} : vector<8x512xbf16>, vector<512x512xbf16>, vector<8x512xf32> -> vector<8x512xf32>
    %c2_24 = arith.constant 2 : index
    %c0_25 = arith.constant 0 : index
    %c0_26 = arith.constant 0 : index
    %32 = vector.load %arg5[%c2_24, %c0_25, %c0_26] : memref<9x1x512xf32, #tpu.memory_space<vmem>>, vector<1x1x512xf32>
    %33 = vector.shape_cast %32 : vector<1x1x512xf32> to vector<1x512xf32>
    %34 = vector.broadcast %33 : vector<1x512xf32> to vector<8x512xf32>
    %35 = arith.addf %31, %34 : vector<8x512xf32>
    %cst_27 = arith.constant 0.000000e+00 : f32
    %36 = vector.broadcast %cst_27 : f32 to vector<8x512xf32>
    %37 = arith.maximumf %35, %36 : vector<8x512xf32>
    %38 = arith.truncf %37 : vector<8x512xf32> to vector<8x512xbf16>
    %c3 = arith.constant 3 : index
    %c0_28 = arith.constant 0 : index
    %c0_29 = arith.constant 0 : index
    %39 = vector.load %arg4[%c3, %c0_28, %c0_29] : memref<9x512x512xbf16, #tpu.memory_space<vmem>>, vector<1x512x512xbf16>
    %40 = vector.shape_cast %39 : vector<1x512x512xbf16> to vector<512x512xbf16>
    %cst_30 = arith.constant dense<0.000000e+00> : vector<8x512xf32>
    %41 = tpu.matmul %38, %40, %cst_30 {dimension_numbers = #tpu.dot_dimension_numbers<[1], [0], [0], [1], [0, 0, 1, 1], [], []>} : vector<8x512xbf16>, vector<512x512xbf16>, vector<8x512xf32> -> vector<8x512xf32>
    %c3_31 = arith.constant 3 : index
    %c0_32 = arith.constant 0 : index
    %c0_33 = arith.constant 0 : index
    %42 = vector.load %arg5[%c3_31, %c0_32, %c0_33] : memref<9x1x512xf32, #tpu.memory_space<vmem>>, vector<1x1x512xf32>
    %43 = vector.shape_cast %42 : vector<1x1x512xf32> to vector<1x512xf32>
    %44 = vector.broadcast %43 : vector<1x512xf32> to vector<8x512xf32>
    %45 = arith.addf %41, %44 : vector<8x512xf32>
    %cst_34 = arith.constant 0.000000e+00 : f32
    %46 = vector.broadcast %cst_34 : f32 to vector<8x512xf32>
    %47 = arith.maximumf %45, %46 : vector<8x512xf32>
    %48 = arith.truncf %47 : vector<8x512xf32> to vector<8x512xbf16>
    %c4 = arith.constant 4 : index
    %c0_35 = arith.constant 0 : index
    %c0_36 = arith.constant 0 : index
    %49 = vector.load %arg4[%c4, %c0_35, %c0_36] : memref<9x512x512xbf16, #tpu.memory_space<vmem>>, vector<1x512x512xbf16>
    %50 = vector.shape_cast %49 : vector<1x512x512xbf16> to vector<512x512xbf16>
    %cst_37 = arith.constant dense<0.000000e+00> : vector<8x512xf32>
    %51 = tpu.matmul %48, %50, %cst_37 {dimension_numbers = #tpu.dot_dimension_numbers<[1], [0], [0], [1], [0, 0, 1, 1], [], []>} : vector<8x512xbf16>, vector<512x512xbf16>, vector<8x512xf32> -> vector<8x512xf32>
    %c4_38 = arith.constant 4 : index
    %c0_39 = arith.constant 0 : index
    %c0_40 = arith.constant 0 : index
    %52 = vector.load %arg5[%c4_38, %c0_39, %c0_40] : memref<9x1x512xf32, #tpu.memory_space<vmem>>, vector<1x1x512xf32>
    %53 = vector.shape_cast %52 : vector<1x1x512xf32> to vector<1x512xf32>
    %54 = vector.broadcast %53 : vector<1x512xf32> to vector<8x512xf32>
    %55 = arith.addf %51, %54 : vector<8x512xf32>
    %cst_41 = arith.constant 0.000000e+00 : f32
    %56 = vector.broadcast %cst_41 : f32 to vector<8x512xf32>
    %57 = arith.maximumf %55, %56 : vector<8x512xf32>
    %58 = arith.truncf %57 : vector<8x512xf32> to vector<8x512xbf16>
    %c5 = arith.constant 5 : index
    %c0_42 = arith.constant 0 : index
    %c0_43 = arith.constant 0 : index
    %59 = vector.load %arg4[%c5, %c0_42, %c0_43] : memref<9x512x512xbf16, #tpu.memory_space<vmem>>, vector<1x512x512xbf16>
    %60 = vector.shape_cast %59 : vector<1x512x512xbf16> to vector<512x512xbf16>
    %cst_44 = arith.constant dense<0.000000e+00> : vector<8x512xf32>
    %61 = tpu.matmul %58, %60, %cst_44 {dimension_numbers = #tpu.dot_dimension_numbers<[1], [0], [0], [1], [0, 0, 1, 1], [], []>} : vector<8x512xbf16>, vector<512x512xbf16>, vector<8x512xf32> -> vector<8x512xf32>
    %c5_45 = arith.constant 5 : index
    %c0_46 = arith.constant 0 : index
    %c0_47 = arith.constant 0 : index
    %62 = vector.load %arg5[%c5_45, %c0_46, %c0_47] : memref<9x1x512xf32, #tpu.memory_space<vmem>>, vector<1x1x512xf32>
    %63 = vector.shape_cast %62 : vector<1x1x512xf32> to vector<1x512xf32>
    %64 = vector.broadcast %63 : vector<1x512xf32> to vector<8x512xf32>
    %65 = arith.addf %61, %64 : vector<8x512xf32>
    %cst_48 = arith.constant 0.000000e+00 : f32
    %66 = vector.broadcast %cst_48 : f32 to vector<8x512xf32>
    %67 = arith.maximumf %65, %66 : vector<8x512xf32>
    %68 = arith.truncf %67 : vector<8x512xf32> to vector<8x512xbf16>
    %c6 = arith.constant 6 : index
    %c0_49 = arith.constant 0 : index
    %c0_50 = arith.constant 0 : index
    %69 = vector.load %arg4[%c6, %c0_49, %c0_50] : memref<9x512x512xbf16, #tpu.memory_space<vmem>>, vector<1x512x512xbf16>
    %70 = vector.shape_cast %69 : vector<1x512x512xbf16> to vector<512x512xbf16>
    %cst_51 = arith.constant dense<0.000000e+00> : vector<8x512xf32>
    %71 = tpu.matmul %68, %70, %cst_51 {dimension_numbers = #tpu.dot_dimension_numbers<[1], [0], [0], [1], [0, 0, 1, 1], [], []>} : vector<8x512xbf16>, vector<512x512xbf16>, vector<8x512xf32> -> vector<8x512xf32>
    %c6_52 = arith.constant 6 : index
    %c0_53 = arith.constant 0 : index
    %c0_54 = arith.constant 0 : index
    %72 = vector.load %arg5[%c6_52, %c0_53, %c0_54] : memref<9x1x512xf32, #tpu.memory_space<vmem>>, vector<1x1x512xf32>
    %73 = vector.shape_cast %72 : vector<1x1x512xf32> to vector<1x512xf32>
    %74 = vector.broadcast %73 : vector<1x512xf32> to vector<8x512xf32>
    %75 = arith.addf %71, %74 : vector<8x512xf32>
    %cst_55 = arith.constant 0.000000e+00 : f32
    %76 = vector.broadcast %cst_55 : f32 to vector<8x512xf32>
    %77 = arith.maximumf %75, %76 : vector<8x512xf32>
    %78 = arith.truncf %77 : vector<8x512xf32> to vector<8x512xbf16>
    %c7 = arith.constant 7 : index
    %c0_56 = arith.constant 0 : index
    %c0_57 = arith.constant 0 : index
    %79 = vector.load %arg4[%c7, %c0_56, %c0_57] : memref<9x512x512xbf16, #tpu.memory_space<vmem>>, vector<1x512x512xbf16>
    %80 = vector.shape_cast %79 : vector<1x512x512xbf16> to vector<512x512xbf16>
    %cst_58 = arith.constant dense<0.000000e+00> : vector<8x512xf32>
    %81 = tpu.matmul %78, %80, %cst_58 {dimension_numbers = #tpu.dot_dimension_numbers<[1], [0], [0], [1], [0, 0, 1, 1], [], []>} : vector<8x512xbf16>, vector<512x512xbf16>, vector<8x512xf32> -> vector<8x512xf32>
    %c7_59 = arith.constant 7 : index
    %c0_60 = arith.constant 0 : index
    %c0_61 = arith.constant 0 : index
    %82 = vector.load %arg5[%c7_59, %c0_60, %c0_61] : memref<9x1x512xf32, #tpu.memory_space<vmem>>, vector<1x1x512xf32>
    %83 = vector.shape_cast %82 : vector<1x1x512xf32> to vector<1x512xf32>
    %84 = vector.broadcast %83 : vector<1x512xf32> to vector<8x512xf32>
    %85 = arith.addf %81, %84 : vector<8x512xf32>
    %cst_62 = arith.constant 0.000000e+00 : f32
    %86 = vector.broadcast %cst_62 : f32 to vector<8x512xf32>
    %87 = arith.maximumf %85, %86 : vector<8x512xf32>
    %88 = arith.truncf %87 : vector<8x512xf32> to vector<8x512xbf16>
    %c8 = arith.constant 8 : index
    %c0_63 = arith.constant 0 : index
    %c0_64 = arith.constant 0 : index
    %89 = vector.load %arg4[%c8, %c0_63, %c0_64] : memref<9x512x512xbf16, #tpu.memory_space<vmem>>, vector<1x512x512xbf16>
    %90 = vector.shape_cast %89 : vector<1x512x512xbf16> to vector<512x512xbf16>
    %cst_65 = arith.constant dense<0.000000e+00> : vector<8x512xf32>
    %91 = tpu.matmul %88, %90, %cst_65 {dimension_numbers = #tpu.dot_dimension_numbers<[1], [0], [0], [1], [0, 0, 1, 1], [], []>} : vector<8x512xbf16>, vector<512x512xbf16>, vector<8x512xf32> -> vector<8x512xf32>
    %c8_66 = arith.constant 8 : index
    %c0_67 = arith.constant 0 : index
    %c0_68 = arith.constant 0 : index
    %92 = vector.load %arg5[%c8_66, %c0_67, %c0_68] : memref<9x1x512xf32, #tpu.memory_space<vmem>>, vector<1x1x512xf32>
    %93 = vector.shape_cast %92 : vector<1x1x512xf32> to vector<1x512xf32>
    %94 = vector.broadcast %93 : vector<1x512xf32> to vector<8x512xf32>
    %95 = arith.addf %91, %94 : vector<8x512xf32>
    %cst_69 = arith.constant 0.000000e+00 : f32
    %96 = vector.broadcast %cst_69 : f32 to vector<8x512xf32>
    %97 = arith.maximumf %95, %96 : vector<8x512xf32>
    %98 = arith.truncf %97 : vector<8x512xf32> to vector<8x512xbf16>
    %c0_70 = arith.constant 0 : index
    %c0_71 = arith.constant 0 : index
    %99 = vector.load %arg6[%c0_70, %c0_71] : memref<512x128xbf16, #tpu.memory_space<vmem>>, vector<512x128xbf16>
    %cst_72 = arith.constant dense<0.000000e+00> : vector<8x128xf32>
    %100 = tpu.matmul %98, %99, %cst_72 {dimension_numbers = #tpu.dot_dimension_numbers<[1], [0], [0], [1], [0, 0, 1, 1], [], []>} : vector<8x512xbf16>, vector<512x128xbf16>, vector<8x128xf32> -> vector<8x128xf32>
    %c0_73 = arith.constant 0 : index
    %c0_74 = arith.constant 0 : index
    %101 = vector.load %arg7[%c0_73, %c0_74] : memref<1x128xf32, #tpu.memory_space<vmem>>, vector<1x128xf32>
    %102 = vector.broadcast %101 : vector<1x128xf32> to vector<8x128xf32>
    %103 = arith.addf %100, %102 : vector<8x128xf32>
    %cst_75 = arith.constant 0.000000e+00 : f32
    %104 = vector.broadcast %cst_75 : f32 to vector<8x128xf32>
    %105 = arith.maximumf %103, %104 : vector<8x128xf32>
    %106 = arith.truncf %105 : vector<8x128xf32> to vector<8x128xbf16>
    %c0_76 = arith.constant 0 : index
    %c0_77 = arith.constant 0 : index
    %107 = vector.load %arg8[%c0_76, %c0_77] : memref<128x128xbf16, #tpu.memory_space<vmem>>, vector<128x128xbf16>
    %cst_78 = arith.constant dense<0.000000e+00> : vector<8x128xf32>
    %108 = tpu.matmul %106, %107, %cst_78 {dimension_numbers = #tpu.dot_dimension_numbers<[1], [0], [0], [1], [0, 0, 1, 1], [], []>} : vector<8x128xbf16>, vector<128x128xbf16>, vector<8x128xf32> -> vector<8x128xf32>
    %c0_79 = arith.constant 0 : index
    %c0_80 = arith.constant 0 : index
    %109 = vector.load %arg9[%c0_79, %c0_80] : memref<1x128xf32, #tpu.memory_space<vmem>>, vector<1x128xf32>
    %110 = vector.broadcast %109 : vector<1x128xf32> to vector<8x128xf32>
    %111 = arith.addf %108, %110 : vector<8x128xf32>
    %112 = math.tanh %111 : vector<8x128xf32>
    %c0_81 = arith.constant 0 : index
    %c0_82 = arith.constant 0 : index
    %113 = vector.load %arg10[%c0_81, %c0_82] : memref<8x128xf32, #tpu.memory_space<vmem>>, vector<8x128xf32>
    tpu.vector_store %arg10[%c0_81, %c0_82], %112 {strides = array<i32>} : memref<8x128xf32, #tpu.memory_space<vmem>>, vector<8x128xf32>,
    return
  }
  func.func @transform_0(%arg0: i32) -> (i32, i32) {
    %c0_i32 = arith.constant 0 : i32
    %c0_i32_0 = arith.constant 0 : i32
    return %arg0, %c0_i32 : i32, i32
  }
  func.func @transform_1(%arg0: i32) -> (i32, i32) {
    %c0_i32 = arith.constant 0 : i32
    %c0_i32_0 = arith.constant 0 : i32
    %c0_i32_1 = arith.constant 0 : i32
    return %c0_i32, %c0_i32_0 : i32, i32
  }
  func.func @transform_2(%arg0: i32) -> (i32, i32) {
    %c0_i32 = arith.constant 0 : i32
    %c0_i32_0 = arith.constant 0 : i32
    %c0_i32_1 = arith.constant 0 : i32
    return %c0_i32, %c0_i32_0 : i32, i32
  }
  func.func @transform_3(%arg0: i32) -> (i32, i32, i32) {
    %c0_i32 = arith.constant 0 : i32
    %c0_i32_0 = arith.constant 0 : i32
    %c0_i32_1 = arith.constant 0 : i32
    %c0_i32_2 = arith.constant 0 : i32
    return %c0_i32, %c0_i32_0, %c0_i32_1 : i32, i32, i32
  }
  func.func @transform_4(%arg0: i32) -> (i32, i32, i32) {
    %c0_i32 = arith.constant 0 : i32
    %c0_i32_0 = arith.constant 0 : i32
    %c0_i32_1 = arith.constant 0 : i32
    %c0_i32_2 = arith.constant 0 : i32
    return %c0_i32, %c0_i32_0, %c0_i32_1 : i32, i32, i32
  }
  func.func @transform_5(%arg0: i32) -> (i32, i32) {
    %c0_i32 = arith.constant 0 : i32
    %c0_i32_0 = arith.constant 0 : i32
    %c0_i32_1 = arith.constant 0 : i32
    return %c0_i32, %c0_i32_0 : i32, i32
  }
  func.func @transform_6(%arg0: i32) -> (i32, i32) {
    %c0_i32 = arith.constant 0 : i32
    %c0_i32_0 = arith.constant 0 : i32
    %c0_i32_1 = arith.constant 0 : i32
    return %c0_i32, %c0_i32_0 : i32, i32
  }
  func.func @transform_7(%arg0: i32) -> (i32, i32) {
    %c0_i32 = arith.constant 0 : i32
    %c0_i32_0 = arith.constant 0 : i32
    %c0_i32_1 = arith.constant 0 : i32
    return %c0_i32, %c0_i32_0 : i32, i32
  }
  func.func @transform_8(%arg0: i32) -> (i32, i32) {
    %c0_i32 = arith.constant 0 : i32
    %c0_i32_0 = arith.constant 0 : i32
    %c0_i32_1 = arith.constant 0 : i32
    return %c0_i32, %c0_i32_0 : i32, i32
  }
  func.func @transform_9(%arg0: i32) -> (i32, i32) {
    %c0_i32 = arith.constant 0 : i32
    %c0_i32_0 = arith.constant 0 : i32
    return %arg0, %c0_i32 : i32, i32
  }
}

</mosaic_0001>

<bundles_post_ra>
// kernel: action_mlp_forward.1
= control target key start
LH: loop header
LB: loop body
LE: loop exit
PB: predicated region body
PF: predicated region fallthrough
CT: control target
= control target key end

     0   :  { %14 = vsyncpa [#allocation3], 0  ;;  %s13002_s0 = inlined_call_operand.vmem [shape: bf16[8,32], index: 0, kind: input, shape index: {}]   ;;  %s13003_s1 = inlined_call_operand.hbm [shape: bf16[32,512], index: 1, kind: input, shape index: {}]   ;;  %s13004_s2 = inlined_call_operand.hbm [shape: f32[1,512], index: 2, kind: input, shape index: {}]   ;;  %s13005_s3 = inlined_call_operand.hbm [shape: bf16[9,512,512], index: 3, kind: input, shape index: {}]   ;;  %s13006_s4 = inlined_call_operand.hbm [shape: f32[9,1,512], index: 4, kind: input, shape index: {}]   ;;  %s13007_s5 = inlined_call_operand.hbm [shape: bf16[512,128], index: 5, kind: input, shape index: {}]   ;;  %s13008_s6 = inlined_call_operand.hbm [shape: f32[1,128], index: 6, kind: input, shape index: {}]   ;;  %s13009_s7 = inlined_call_operand.hbm [shape: bf16[128,128], index: 7, kind: input, shape index: {}]   ;;  %s13010_s8 = inlined_call_operand.hbm [shape: f32[1,128], index: 8, kind: input, shape index: {}]   ;;  %s13011_s9 = inlined_call_operand.vmem [shape: f32[8,128], index: 9, kind: output, shape index: {}]  }
   0x1   :  { %15 = vsyncpa [#allocation5], 0 }
   0x2   :  { %16 = vsyncpa [#allocation8], 0 }
   0x3   :  { %17 = vsyncpa [#allocation11], 0 }
   0x4   :  { %18 = vsyncpa [#allocation14], 0  ;;  %s12686_s30 = smov [#allocation4]   ;;  %s12687_s11 = smov [#allocation7]  }
   0x5   :  { %s39_s10 = sshll.u32 %s12686_s30, 4  ;;  %s60_s12 = sshll.u32 %s12687_s11, 4  ;;  %s40_s10 = int_to_ptr.vmem [resolvable:$true] %s39_s10  ;;  %s61_s12 = int_to_ptr.vmem [resolvable:$true] %s60_s12 }
   0x6   :  { %s12524_s13 = scalar_lea.vmem %s40_s10, 64  ;;  %p12529_p1 = scmp.lt.s32.totalorder %s40_s10, %s40_s10 }
   0x7   :  { %p12525_p0 = scmp.ne.s32.totalorder %s40_s10, %s12524_s13  ;;  %p12530_p2 = scmp.lt.s32.totalorder %s12524_s13, %s12524_s13 }
   0x9   :  { %p12531_p3 = por %p12530_p2, %p12529_p1 }
   0xb   :  { %p12532_p4 = pnand %p12531_p3, %p12525_p0 }
   0xd   :  { %12535 = shalt.err (!%p12532_p4)
}
   0xe   :  { %42 = dma.hbm_to_vmem [thread:$0]  %s13004_s2, 64, %s40_s10, [#allocation5]  }
   0xf   :  { %s12544_s16 = scalar_lea.vmem %s61_s12, 576  ;;  %p12549_p6 = scmp.lt.s32.totalorder %s61_s12, %s61_s12 }
  0x10   :  { %p12545_p5 = scmp.ne.s32.totalorder %s61_s12, %s12544_s16  ;;  %p12550_p7 = scmp.lt.s32.totalorder %s12544_s16, %s12544_s16 }
  0x12   :  { %p12551_p8 = por %p12550_p7, %p12549_p6 }
  0x14   :  { %p12552_p9 = pnand %p12551_p8, %p12545_p5 }
  0x16   :  { %12555 = shalt.err (!%p12552_p9)
}
  0x17   :  { %s12688_s17 = smov 64   ;;  %s12689_s18 = smov 4  }
  0x18   :  { %66 = dma.hbm_to_vmem [thread:$0]  %s13006_s4, 576, %s61_s12, [#allocation8], %s12688_s17, %s12688_s17, %s12689_s18  }
  0x19   :  { %s12690_s21 = smov [#allocation10]   ;;  %s12691_s23 = smov [#allocation2]  }
  0x1a   :  { %s85_s22 = sshll.u32 %s12690_s21, 4  ;;  %s26_s2 = sshll.u32 %s12691_s23, 4  ;;  %s86_s22 = int_to_ptr.vmem [resolvable:$true] %s85_s22  ;;  %s27_s2 = int_to_ptr.vmem [resolvable:$true] %s26_s2 }
  0x1b   :  { %s12564_s24 = scalar_lea.vmem %s86_s22, 16  ;;  %s12568_s25 = scalar_lea.vmem %s86_s22, 32 }
  0x1c   :  { %p12565_p10 = scmp.ne.s32.totalorder %s86_s22, %s12564_s24  ;;  %p12569_p11 = scmp.lt.s32.totalorder %s86_s22, %s86_s22 }
  0x1d   :  { %p12570_p12 = scmp.lt.s32.totalorder %s12568_s25, %s12564_s24 }
  0x1f   :  { %p12571_p13 = por %p12570_p12, %p12569_p11 }
  0x21   :  { %p12572_p0 = pnand %p12571_p13, %p12565_p10 }
  0x23   :  { %12575 = shalt.err (!%p12572_p0)
}
  0x24   :  { %88 = dma.hbm_to_vmem [thread:$0]  %s13008_s6, 16, %s86_s22, [#allocation11]  }
  0x25   :  { %s12584_s28 = scalar_lea.vmem %s27_s2, 1024  ;;  %p12589_p2 = scmp.lt.s32.totalorder %s27_s2, %s27_s2 }
  0x26   :  { %p12585_p1 = scmp.ne.s32.totalorder %s27_s2, %s12584_s28  ;;  %p12590_p3 = scmp.lt.s32.totalorder %s12584_s28, %s12584_s28 }
  0x28   :  { %p12591_p4 = por %p12590_p3, %p12589_p2 }
  0x2a   :  { %p12592_p5 = pnand %p12591_p4, %p12585_p1 }
  0x2c   :  { %12595 = shalt.err (!%p12592_p5)
}
  0x2d   :  { %s12692_s4 = smov 256   ;;  %s12693_s29 = smov 16  }
  0x2e   :  { %32 = dma.hbm_to_vmem [thread:$0]  %s13003_s1, 1024, %s27_s2, [#allocation3], %s12692_s4, %s12692_s4, %s12693_s29  }
  0x2f   :  { %s12694_s11 = smov [#allocation6]   ;;  %s12695_s13 = smov [#allocation9]  }
  0x30   :  { %s48_s12 = sshll.u32 %s12694_s11, 4  ;;  %s72_s14 = sshll.u32 %s12695_s13, 4  ;;  %s49_s12 = int_to_ptr.vmem [resolvable:$true] %s48_s12  ;;  %s73_s14 = int_to_ptr.vmem [resolvable:$true] %s72_s14 }
  0x31   :  { %s12604_s6 = scalar_lea.vmem %s49_s12, 147456  ;;  %p12609_p7 = scmp.lt.s32.totalorder %s49_s12, %s49_s12 }
  0x32   :  { %p12605_p6 = scmp.ne.s32.totalorder %s49_s12, %s12604_s6  ;;  %p12610_p8 = scmp.lt.s32.totalorder %s12604_s6, %s12604_s6 }
  0x34   :  { %p12611_p9 = por %p12610_p8, %p12609_p7 }
  0x36   :  { %p12612_p10 = pnand %p12611_p9, %p12605_p6 }
  0x38   :  { %12615 = shalt.err (!%p12612_p10)
}
  0x39   :  { %54 = dma.hbm_to_vmem [thread:$0]  %s13005_s3, 147456, %s49_s12, [#allocation5], %s12692_s4, %s12692_s4, %s12693_s29  }
  0x3a   :  { %s12624_s19 = scalar_lea.vmem %s73_s14, 4096  ;;  %p12629_p12 = scmp.lt.s32.totalorder %s73_s14, %s73_s14 }
  0x3b   :  { %p12625_p11 = scmp.ne.s32.totalorder %s73_s14, %s12624_s19  ;;  %p12630_p13 = scmp.lt.s32.totalorder %s12624_s19, %s12624_s19 }
  0x3d   :  { %p12631_p0 = por %p12630_p13, %p12629_p12 }
  0x3f   :  { %p12632_p1 = pnand %p12631_p0, %p12625_p11 }
  0x41   :  { %12635 = shalt.err (!%p12632_p1)
}
  0x42   :  { %78 = dma.hbm_to_vmem [thread:$0]  %s13007_s5, 4096, %s73_s14, [#allocation8], %s12688_s17, %s12688_s17, %s12689_s18  }
  0x43   :  { %s12696_s21 = smov [#allocation12]   ;;  %s12697_s23 = smov [#allocation13]  }
  0x44   :  { %s94_s22 = sshll.u32 %s12696_s21, 4  ;;  %s107_s2 = sshll.u32 %s12697_s23, 4  ;;  %s95_s22 = int_to_ptr.vmem [resolvable:$true] %s94_s22  ;;  %s108_s2 = int_to_ptr.vmem [resolvable:$true] %s107_s2 }
  0x45   :  { %s12644_s3 = scalar_lea.vmem %s95_s22, 1024  ;;  %p12649_p3 = scmp.lt.s32.totalorder %s95_s22, %s95_s22 }
  0x46   :  { %p12645_p2 = scmp.ne.s32.totalorder %s95_s22, %s12644_s3  ;;  %p12650_p4 = scmp.lt.s32.totalorder %s12644_s3, %s12644_s3 }
  0x48   :  { %p12651_p5 = por %p12650_p4, %p12649_p3 }
  0x4a   :  { %p12652_p6 = pnand %p12651_p5, %p12645_p2 }
  0x4c   :  { %12655 = shalt.err (!%p12652_p6)
}
  0x4d   :  { %100 = dma.hbm_to_vmem [thread:$0]  %s13009_s7, 1024, %s95_s22, [#allocation11], %s12688_s17, %s12688_s17, %s12689_s18  }
  0x4e   :  { %s12664_s5 = scalar_lea.vmem %s108_s2, 16  ;;  %s12668_s26 = scalar_lea.vmem %s108_s2, 32 }
  0x4f   :  { %p12665_p7 = scmp.ne.s32.totalorder %s108_s2, %s12664_s5  ;;  %p12669_p8 = scmp.lt.s32.totalorder %s108_s2, %s108_s2 }
  0x50   :  { %p12670_p9 = scmp.lt.s32.totalorder %s12668_s26, %s12664_s5 }
  0x52   :  { %p12671_p10 = por %p12670_p9, %p12669_p8 }
  0x54   :  { %p12672_p11 = pnand %p12671_p10, %p12665_p7 }
  0x56   :  { %12675 = shalt.err (!%p12672_p11)
}
  0x57   :  { %110 = dma.hbm_to_vmem [thread:$0]  %s13010_s8, 16, %s108_s2, [#allocation14]  }
  0x58   :  { %12676 = dma.done.wait [#allocation3], 1024  }
  0x59   :  { %12677 = vsyncadd [#allocation3], 4294966272 }
  0x5a   :  { %12678 = dma.done.wait [#allocation5], 147520  }
  0x5b   :  { %12679 = vsyncadd [#allocation5], 4294819776 }
  0x5c   :  { %12680 = dma.done.wait [#allocation8], 4672  }
  0x5d   :  { %12681 = vsyncadd [#allocation8], 4294962624 }
  0x5e   :  { %12682 = dma.done.wait [#allocation11], 1040  }
  0x5f   :  { %12683 = vsyncadd [#allocation11], 4294966256 }
  0x60   :  { %12684 = dma.done.wait [#allocation14], 16  }
  0x61   :  { %12685 = vsyncadd [#allocation14], 4294967280  ;;  %v12698_v0 = vmov 0   ;;  %v10734_v1 = vld [vmem:[#allocation2 + $0x24] ss:$16 sps:$4 sm:$0xff]   ;;  %vm207_vm0 = vcmask 261120  }
  0x62   :  { %243 = vmatprep.mubr.bf16.mxu1 %v12698_v0  ;;  %v10736_v2 = vld [vmem:[#allocation2 + $0x20] ss:$16 sps:$4 sm:$0xff]   ;;  %223 = vmatprep.subr.bf16.mxu1 %v10734_v1  ;;  %v10737_v3 = vld [vmem:[#allocation2 + $0x4] ss:$16 sps:$4 sm:$0xff]   ;;  %v10742_v5 = vld [vmem:[#allocation2 + $0x2c] ss:$16 sps:$4 sm:$0xff]  }
  0x63   :  { %224 = vmatpush1.bf16.msra.mxu1 %v10736_v2  ;;  %v10739_v4 = vld [vmem:[#allocation2] ss:$16 sps:$4 sm:$0xff]   ;;  %v10740_v7 = vld [vmem:[#allocation2 + $0x28] ss:$16 sps:$4 sm:$0xff]   ;;  %v10748_v9 = vld [vmem:[#allocation6 + $0xe0] ss:$16 sps:$4 sm:$0xff]  }
  0x64   :  { %225 = vmatprep.subr.bf16.mxu1 %v10737_v3  ;;  %v136_v6 = vld [vmem:[%s13002_s0] sm:$0xf]  ;;  %v10746_v8 = vld [vmem:[#allocation6 + $0xe4] ss:$16 sps:$4 sm:$0xff]   ;;  %v10745_v11 = vld [vmem:[#allocation2 + $0xc] ss:$16 sps:$4 sm:$0xff]  }
  0x65   :  { %v10749_v10 = vld [vmem:[#allocation6 + $0xc4] ss:$16 sps:$4 sm:$0xff]   ;;  %1091 = vmatprep.subr.bf16.mxu0 %v10746_v8  ;;  %v10751_v12 = vld [vmem:[#allocation6 + $0xc0] ss:$16 sps:$4 sm:$0xff]   ;;  %vm12700_vm1 = vmmov 0  }
  0x66   :  { %1092 = vmatpush1.bf16.msra.mxu0 %v10748_v9  ;;  %v10752_v13 = vld [vmem:[#allocation6 + $0xa4] ss:$16 sps:$4 sm:$0xff]   ;;  %v10757_v16 = vld [vmem:[#allocation6 + $0xa0] ss:$16 sps:$4 sm:$0xff]  }
  0x67   :  { %226 = vmatpush1.bf16.msra.mxu1 %v10739_v4  ;;  %1093 = vmatprep.subr.bf16.mxu0 %v10749_v10  ;;  %v10743_v14 = vld [vmem:[#allocation2 + $0x8] ss:$16 sps:$4 sm:$0xff]   ;;  %v10754_v18 = vld [vmem:[#allocation6 + $0x2e0] ss:$16 sps:$4 sm:$0xff]  }
  0x68   :  { %264 = vmatprep.subr.bf16.mxu1 %v10742_v5  ;;  %v10756_v15 = vld [vmem:[#allocation6 + $0x2e4] ss:$16 sps:$4 sm:$0xff]   ;;  %v10763_v20 = vld [vmem:[#allocation6 + $0x80] ss:$16 sps:$4 sm:$0xff]  }
  0x69   :  { %v10758_v17 = vld [vmem:[#allocation6 + $0x84] ss:$16 sps:$4 sm:$0xff]   ;;  %v10760_v22 = vld [vmem:[#allocation6 + $0x2c0] ss:$16 sps:$4 sm:$0xff]  }
  0x6a   :  { %9450 = vmatmul.mubr.msk.bf16.vlgmr.msra.gmra.mxu1 %vm207_vm0, %v136_v6  ;;  %1094 = vmatpush1.bf16.msra.mxu0 %v10751_v12  ;;  %v10762_v19 = vld [vmem:[#allocation6 + $0x2c4] ss:$16 sps:$4 sm:$0xff]   ;;  %v10769_v24 = vld [vmem:[#allocation6 + $0x60] ss:$16 sps:$4 sm:$0xff]   ;;  %v147_v12 = vlaneseq }
  0x6b   :  { %265 = vmatpush1.bf16.msra.mxu1 %v10740_v7  ;;  %284 = vmatprep.mubr.bf16.mxu1 %v12698_v0  ;;  %v10764_v21 = vld [vmem:[#allocation6 + $0x64] ss:$16 sps:$4 sm:$0xff]   ;;  %v10766_v26 = vld [vmem:[#allocation6 + $0x2a0] ss:$16 sps:$4 sm:$0xff]   ;;  %v10841_v7 = vld [vmem:[#allocation6 + $0xec] ss:$16 sps:$4 sm:$0xff]  }
  0x6c   :  { %266 = vmatprep.subr.bf16.mxu1 %v10745_v11  ;;  %1095 = vmatprep.subr.bf16.mxu0 %v10752_v13  ;;  %v10768_v23 = vld [vmem:[#allocation6 + $0x2a4] ss:$16 sps:$4 sm:$0xff]   ;;  %v10775_v28 = vld [vmem:[#allocation6 + $0x40] ss:$16 sps:$4 sm:$0xff]   ;;  %v10853_v11 = vld [vmem:[#allocation6 + $0x2ec] ss:$16 sps:$4 sm:$0xff]  }
  0x6d   :  { %v10770_v25 = vld [vmem:[#allocation6 + $0x44] ss:$16 sps:$4 sm:$0xff]   ;;  %v10772_v30 = vld [vmem:[#allocation6 + $0x280] ss:$16 sps:$4 sm:$0xff]   ;;  %v148_v13 = vshrl.u32 %v147_v12, 7 }
  0x6e   :  { %1096 = vmatpush1.bf16.msra.mxu0 %v10757_v16  ;;  %v10774_v27 = vld [vmem:[#allocation6 + $0x284] ss:$16 sps:$4 sm:$0xff]   ;;  %v10781_v32 = vld [vmem:[#allocation6 + $0x20] ss:$16 sps:$4 sm:$0xff]   ;;  %v10893_v12 = vld [vmem:[#allocation6 + $0x208] ss:$16 sps:$4 sm:$0xff]  }
  0x6f   :  { %267 = vmatpush1.bf16.msra.mxu1 %v10743_v14  ;;  %1097 = vmatprep.subr.bf16.mxu0 %v10758_v17  ;;  %v10776_v29 = vld [vmem:[#allocation6 + $0x24] ss:$16 sps:$4 sm:$0xff]   ;;  %v10778_v34 = vld [vmem:[#allocation6 + $0x260] ss:$16 sps:$4 sm:$0xff]   ;;  %v145_v14 = vld [vmem:[#allocation4] sm:$0xf] }
  0x70   :  { %1132 = vmatprep.subr.bf16.mxu1 %v10756_v15  ;;  %v10780_v31 = vld [vmem:[#allocation6 + $0x264] ss:$16 sps:$4 sm:$0xff]   ;;  %v10787_v36 = vld [vmem:[#allocation6] ss:$16 sps:$4 sm:$0xff]   ;;  %v12789_v15 = vsub.s32 0, %v148_v13  ;;  %v12791_v16 = vsub.s32 1, %v148_v13 }
  0x71   :  { %v10782_v33 = vld [vmem:[#allocation6 + $0x4] ss:$16 sps:$4 sm:$0xff]   ;;  %v10784_v38 = vld [vmem:[#allocation6 + $0x240] ss:$16 sps:$4 sm:$0xff]  }
  0x72   :  { %9451 = vmatmul.mubr.msk.bf16.vlgmr.msra.gmra.mxu1 %vm207_vm0, %v136_v6  ;;  %1098 = vmatpush1.bf16.msra.mxu0 %v10763_v20  ;;  %v10786_v35 = vld [vmem:[#allocation6 + $0x244] ss:$16 sps:$4 sm:$0xff]   ;;  %v10793_v40 = vld [vmem:[#allocation6 + $0x1e0] ss:$16 sps:$4 sm:$0xff]   ;;  %v150_v17 = vrot.slane %v145_v14, %v12789_v15 }
  0x73   :  { %1133 = vmatpush1.bf16.msra.mxu1 %v10754_v18  ;;  %1099 = vmatprep.subr.bf16.mxu0 %v10764_v21  ;;  %v10788_v37 = vld [vmem:[#allocation6 + $0x1e4] ss:$16 sps:$4 sm:$0xff]   ;;  %v10790_v42 = vld [vmem:[#allocation6 + $0x220] ss:$16 sps:$4 sm:$0xff]   ;;  %v154_v18 = vrot.slane %v145_v14, %v12791_v16  ;;  %v12795_v21 = vsub.s32 2, %v148_v13 }
  0x74   :  { %1134 = vmatprep.subr.bf16.mxu1 %v10762_v19  ;;  %v10792_v39 = vld [vmem:[#allocation6 + $0x224] ss:$16 sps:$4 sm:$0xff]   ;;  %v10799_v44 = vld [vmem:[#allocation6 + $0x1c0] ss:$16 sps:$4 sm:$0xff]  }
  0x75   :  { %v10794_v41 = vld [vmem:[#allocation6 + $0x1c4] ss:$16 sps:$4 sm:$0xff]   ;;  %v10796_v46 = vld [vmem:[#allocation6 + $0x200] ss:$16 sps:$4 sm:$0xff]  }
  0x76   :  { %1100 = vmatpush1.bf16.msra.mxu0 %v10769_v24  ;;  %v10798_v43 = vld [vmem:[#allocation6 + $0x204] ss:$16 sps:$4 sm:$0xff]   ;;  %v10805_v48 = vld [vmem:[#allocation6 + $0x1a0] ss:$16 sps:$4 sm:$0xff]   ;;  %v12797_v24 = vsub.s32 3, %v148_v13 }
  0x77   :  { %1135 = vmatpush1.bf16.msra.mxu1 %v10760_v22  ;;  %1101 = vmatprep.subr.bf16.mxu0 %v10770_v25  ;;  %v10800_v45 = vld [vmem:[#allocation6 + $0x1a4] ss:$16 sps:$4 sm:$0xff]   ;;  %v10802_v50 = vld [vmem:[#allocation6 + $0x3e0] ss:$16 sps:$4 sm:$0xff]   ;;  %v10898_v13 = vld [vmem:[#allocation6 + $0x1ac] ss:$16 sps:$4 sm:$0xff]  }
  0x78   :  { %1136 = vmatprep.subr.bf16.mxu1 %v10768_v23  ;;  %v10804_v47 = vld [vmem:[#allocation6 + $0x3e4] ss:$16 sps:$4 sm:$0xff]   ;;  %v10811_v52 = vld [vmem:[#allocation6 + $0x180] ss:$16 sps:$4 sm:$0xff]  }
  0x79   :  { %v10806_v49 = vld [vmem:[#allocation6 + $0x184] ss:$16 sps:$4 sm:$0xff]   ;;  %v10808_v54 = vld [vmem:[#allocation6 + $0x3c0] ss:$16 sps:$4 sm:$0xff]  }
  0x7a   :  { %1102 = vmatpush1.bf16.msra.mxu0 %v10775_v28  ;;  %v10810_v51 = vld [vmem:[#allocation6 + $0x3c4] ss:$16 sps:$4 sm:$0xff]   ;;  %v10817_v56 = vld [vmem:[#allocation6 + $0x160] ss:$16 sps:$4 sm:$0xff]   ;;  %v158_v28 = vrot.slane %v145_v14, %v12795_v21 }
  0x7b   :  { %1137 = vmatpush1.bf16.msra.mxu1 %v10766_v26  ;;  %1103 = vmatprep.subr.bf16.mxu0 %v10776_v29  ;;  %v10812_v53 = vld [vmem:[#allocation6 + $0x164] ss:$16 sps:$4 sm:$0xff]   ;;  %v10814_v58 = vld [vmem:[#allocation6 + $0x3a0] ss:$16 sps:$4 sm:$0xff]   ;;  %v10839_v29 = vld [vmem:[#allocation6 + $0xe8] ss:$16 sps:$4 sm:$0xff]  }
  0x7c   :  { %1138 = vmatprep.subr.bf16.mxu1 %v10774_v27  ;;  %v10816_v55 = vld [vmem:[#allocation6 + $0x3a4] ss:$16 sps:$4 sm:$0xff]   ;;  %v10823_v60 = vld [vmem:[#allocation6 + $0x140] ss:$16 sps:$4 sm:$0xff]  }
  0x7d   :  { %v10818_v57 = vld [vmem:[#allocation6 + $0x144] ss:$16 sps:$4 sm:$0xff]   ;;  %v10820_v61 = vld [vmem:[#allocation6 + $0x380] ss:$16 sps:$4 sm:$0xff]  }
  0x7e   :  { %1104 = vmatpush1.bf16.msra.mxu0 %v10781_v32  ;;  %v10822_v59 = vld [vmem:[#allocation6 + $0x384] ss:$16 sps:$4 sm:$0xff]   ;;  %v10826_v0 = vld [vmem:[#allocation6 + $0x360] ss:$16 sps:$4 sm:$0xff]  }
  0x7f   :  { %1139 = vmatpush1.bf16.msra.mxu1 %v10772_v30  ;;  %1105 = vmatprep.subr.bf16.mxu0 %v10782_v33  ;;  %v10824_v62 = vld [vmem:[#allocation6 + $0x124] ss:$16 sps:$4 sm:$0xff]   ;;  %v10829_v1 = vld [vmem:[#allocation6 + $0x120] ss:$16 sps:$4 sm:$0xff]   ;;  %v162_v33 = vrot.slane %v145_v14, %v12797_v24  ;;  %v10901_v14 = vld [vmem:[#allocation6 + $0x3ec] ss:$16 sps:$4 sm:$0xff]  }
  0x80   :  { %1140 = vmatprep.subr.bf16.mxu1 %v10780_v31  ;;  %v10828_v63 = vld [vmem:[#allocation6 + $0x364] ss:$16 sps:$4 sm:$0xff]   ;;  %v10832_v4 = vld [vmem:[#allocation6 + $0x340] ss:$16 sps:$4 sm:$0xff]   ;;  %v10847_v31 = vld [vmem:[#allocation6 + $0xcc] ss:$16 sps:$4 sm:$0xff]  }
  0x81   :  { %v10830_v2 = vld [vmem:[#allocation6 + $0x104] ss:$16 sps:$4 sm:$0xff]   ;;  %v10835_v5 = vld [vmem:[#allocation6 + $0x100] ss:$16 sps:$4 sm:$0xff]  }
  0x82   :  { %1106 = vmatpush1.bf16.msra.mxu0 %v10787_v36  ;;  %v10834_v3 = vld [vmem:[#allocation6 + $0x344] ss:$16 sps:$4 sm:$0xff]   ;;  %v10836_v8 = vld [vmem:[#allocation6 + $0x320] ss:$16 sps:$4 sm:$0xff]  }
  0x83   :  { %1141 = vmatpush1.bf16.msra.mxu1 %v10778_v34  ;;  %1107 = vmatprep.subr.bf16.mxu0 %v10788_v37  ;;  %v10838_v6 = vld [vmem:[#allocation6 + $0x324] ss:$16 sps:$4 sm:$0xff]   ;;  %v10842_v10 = vld [vmem:[#allocation6 + $0x300] ss:$16 sps:$4 sm:$0xff]   ;;  %v10845_v37 = vld [vmem:[#allocation6 + $0xc8] ss:$16 sps:$4 sm:$0xff]  }
  0x84   :  { %1142 = vmatprep.subr.bf16.mxu1 %v10786_v35  ;;  %v10844_v9 = vld [vmem:[#allocation6 + $0x304] ss:$16 sps:$4 sm:$0xff]  }
  0x86   :  { %1108 = vmatpush2.bf16.msra.mxu0 %v10793_v40 }
  0x87   :  { %1143 = vmatpush1.bf16.msra.mxu1 %v10784_v38  ;;  %1109 = vmatprep.subr.bf16.mxu0 %v10794_v41 }
  0x88   :  { %1144 = vmatprep.subr.bf16.mxu1 %v10792_v39  ;;  %v10850_v39 = vld [vmem:[#allocation6 + $0xac] ss:$16 sps:$4 sm:$0xff]  }
  0x8a   :  { %1110 = vmatpush2.bf16.msra.mxu0 %v10799_v44  ;;  %v10848_v44 = vld [vmem:[#allocation6 + $0xa8] ss:$16 sps:$4 sm:$0xff]  }
  0x8b   :  { %1145 = vmatpush1.bf16.msra.mxu1 %v10790_v42  ;;  %1111 = vmatprep.subr.bf16.mxu0 %v10800_v45  ;;  %v10851_v45 = vld [vmem:[#allocation6 + $0x2e8] ss:$16 sps:$4 sm:$0xff]  }
  0x8c   :  { %1146 = vmatprep.subr.bf16.mxu1 %v10798_v43 }
  0x8e   :  { %1112 = vmatpush2.bf16.msra.mxu0 %v10805_v48 }
  0x8f   :  { %1147 = vmatpush1.bf16.msra.mxu1 %v10796_v46  ;;  %1113 = vmatprep.subr.bf16.mxu0 %v10806_v49  ;;  %v10859_v49 = vld [vmem:[#allocation6 + $0x2cc] ss:$16 sps:$4 sm:$0xff]  }
  0x90   :  { %1148 = vmatprep.subr.bf16.mxu1 %v10804_v47  ;;  %v10856_v47 = vld [vmem:[#allocation6 + $0x8c] ss:$16 sps:$4 sm:$0xff]  }
  0x92   :  { %1114 = vmatpush2.bf16.msra.mxu0 %v10811_v52  ;;  %v10857_v52 = vld [vmem:[#allocation6 + $0x2c8] ss:$16 sps:$4 sm:$0xff]  }
  0x93   :  { %1149 = vmatpush2.bf16.msra.mxu1 %v10802_v50  ;;  %1115 = vmatprep.subr.bf16.mxu0 %v10812_v53  ;;  %v10862_v53 = vld [vmem:[#allocation6 + $0x6c] ss:$16 sps:$4 sm:$0xff]  }
  0x94   :  { %1150 = vmatprep.subr.bf16.mxu1 %v10810_v51  ;;  %v10854_v51 = vld [vmem:[#allocation6 + $0x88] ss:$16 sps:$4 sm:$0xff]  }
  0x96   :  { %1116 = vmatpush2.bf16.msra.mxu0 %v10817_v56  ;;  %v10863_v56 = vld [vmem:[#allocation6 + $0x2a8] ss:$16 sps:$4 sm:$0xff]  }
  0x97   :  { %1151 = vmatpush2.bf16.msra.mxu1 %v10808_v54  ;;  %1117 = vmatprep.subr.bf16.mxu0 %v10818_v57  ;;  %v10865_v54 = vld [vmem:[#allocation6 + $0x2ac] ss:$16 sps:$4 sm:$0xff]  }
  0x98   :  { %1152 = vmatprep.subr.bf16.mxu1 %v10816_v55  ;;  %v10860_v55 = vld [vmem:[#allocation6 + $0x68] ss:$16 sps:$4 sm:$0xff]   ;;  %v10868_v57 = vld [vmem:[#allocation6 + $0x4c] ss:$16 sps:$4 sm:$0xff]  }
  0x9a   :  { %1118 = vmatpush2.bf16.msra.mxu0 %v10823_v60  ;;  %v10869_v60 = vld [vmem:[#allocation6 + $0x288] ss:$16 sps:$4 sm:$0xff]  }
  0x9b   :  { %1153 = vmatpush2.bf16.msra.mxu1 %v10814_v58  ;;  %1119 = vmatprep.subr.bf16.mxu0 %v10824_v62  ;;  %v10871_v58 = vld [vmem:[#allocation6 + $0x28c] ss:$16 sps:$4 sm:$0xff]  }
  0x9c   :  { %1154 = vmatprep.subr.bf16.mxu1 %v10822_v59  ;;  %v10866_v59 = vld [vmem:[#allocation6 + $0x48] ss:$16 sps:$4 sm:$0xff]   ;;  %v10877_v62 = vld [vmem:[#allocation6 + $0x26c] ss:$16 sps:$4 sm:$0xff]  }
  0x9e   :  { %1120 = vmatpush2.bf16.msra.mxu0 %v10829_v1  ;;  %v10880_v1 = vld [vmem:[#allocation6 + $0xc] ss:$16 sps:$4 sm:$0xff]  }
  0x9f   :  { %1155 = vmatpush2.bf16.msra.mxu1 %v10820_v61  ;;  %1121 = vmatprep.subr.bf16.mxu0 %v10830_v2  ;;  %v10874_v61 = vld [vmem:[#allocation6 + $0x2c] ss:$16 sps:$4 sm:$0xff]  }
  0xa0   :  { %1156 = vmatprep.subr.bf16.mxu1 %v10828_v63  ;;  %v10872_v63 = vld [vmem:[#allocation6 + $0x28] ss:$16 sps:$4 sm:$0xff]   ;;  %v10883_v2 = vld [vmem:[#allocation6 + $0x24c] ss:$16 sps:$4 sm:$0xff]  }
  0xa2   :  { %1122 = vmatpush2.bf16.msra.mxu0 %v10835_v5  ;;  %v10886_v5 = vld [vmem:[#allocation6 + $0x1ec] ss:$16 sps:$4 sm:$0xff]  }
  0xa3   :  { %1157 = vmatpush2.bf16.msra.mxu1 %v10826_v0  ;;  %1173 = vmatprep.subr.bf16.mxu0 %v10841_v7  ;;  %v10875_v0 = vld [vmem:[#allocation6 + $0x268] ss:$16 sps:$4 sm:$0xff]  }
  0xa4   :  { %1158 = vmatprep.subr.bf16.mxu1 %v10834_v3  ;;  %v10878_v3 = vld [vmem:[#allocation6 + $0x8] ss:$16 sps:$4 sm:$0xff]  }
  0xa5   :  { %v10884_v7 = vld [vmem:[#allocation6 + $0x1e8] ss:$16 sps:$4 sm:$0xff]  }
  0xa7   :  { %1159 = vmatpush2.bf16.msra.mxu1 %v10832_v4  ;;  %v10881_v4 = vld [vmem:[#allocation6 + $0x248] ss:$16 sps:$4 sm:$0xff]  }
  0xa8   :  { %1160 = vmatprep.subr.bf16.mxu1 %v10838_v6  ;;  %v10889_v6 = vld [vmem:[#allocation6 + $0x22c] ss:$16 sps:$4 sm:$0xff]  }
  0xab   :  { %1161 = vmatpush2.bf16.msra.mxu1 %v10836_v8  ;;  %v10887_v8 = vld [vmem:[#allocation6 + $0x228] ss:$16 sps:$4 sm:$0xff]  }
  0xac   :  { %1162 = vmatprep.subr.bf16.mxu1 %v10844_v9  ;;  %v10892_v9 = vld [vmem:[#allocation6 + $0x1cc] ss:$16 sps:$4 sm:$0xff]  }
  0xaf   :  { %1163 = vmatpush2.bf16.msra.mxu1 %v10842_v10  ;;  %v10895_v10 = vld [vmem:[#allocation6 + $0x20c] ss:$16 sps:$4 sm:$0xff]  }
  0xb0   :  { %1214 = vmatprep.subr.bf16.mxu1 %v10853_v11  ;;  %v10890_v11 = vld [vmem:[#allocation6 + $0x1c8] ss:$16 sps:$4 sm:$0xff]  }
 0x12a   :  { %v245_v19 = vpop.f32.mrf.mxu1 }
 0x12b   :  { %v246_v20 = vadd.f32 %v245_v19, %v150_v17  ;;  %v10896_v17 = vld [vmem:[#allocation6 + $0x1a8] ss:$16 sps:$4 sm:$0xff]   ;;  %v10904_v19 = vld [vmem:[#allocation6 + $0x18c] ss:$16 sps:$4 sm:$0xff]  }
 0x12c   :  { %v247_v22 = vpop.f32.mrf.mxu1 }
 0x12d   :  { %v248_v23 = vadd.f32 %v247_v22, %v154_v18  ;;  %v293_v25 = vmax.f32 %v246_v20, 0.0  ;;  %v10899_v18 = vld [vmem:[#allocation6 + $0x3e8] ss:$16 sps:$4 sm:$0xff]   ;;  %v10907_v20 = vld [vmem:[#allocation6 + $0x3cc] ss:$16 sps:$4 sm:$0xff]  }
 0x12e   :  { %v249_v26 = vpop.f32.mrf.mxu1  ;;  %v10902_v22 = vld [vmem:[#allocation6 + $0x188] ss:$16 sps:$4 sm:$0xff]  }
 0x12f   :  { %v294_v27 = vmax.f32 %v248_v23, 0.0  ;;  %v12801_v34 = vpack.c.bf16 %v293_v25, %v293_v25  ;;  %v10905_v23 = vld [vmem:[#allocation6 + $0x3c8] ss:$16 sps:$4 sm:$0xff]   ;;  %v10910_v25 = vld [vmem:[#allocation6 + $0x16c] ss:$16 sps:$4 sm:$0xff]  }
 0x130   :  { %v250_v30 = vpop.f32.mrf.mxu1  ;;  %v10913_v26 = vld [vmem:[#allocation6 + $0x3ac] ss:$16 sps:$4 sm:$0xff]  }
 0x131   :  { %v298_v32 = vpack.c.bf16 %v294_v27, %v294_v27  ;;  %v10908_v27 = vld [vmem:[#allocation6 + $0x168] ss:$16 sps:$4 sm:$0xff]   ;;  %v10919_v30 = vld [vmem:[#allocation6 + $0x38c] ss:$16 sps:$4 sm:$0xff]  }
 0x132   :  { %v286_v35 = vpop.f32.mrf.mxu1 }
 0x133   :  { %v287_v36 = vadd.f32 %v286_v35, %v158_v28  ;;  %1123 = vmatprep.mubr.bf16.mxu0 %v298_v32  ;;  %v10911_v28 = vld [vmem:[#allocation6 + $0x3a8] ss:$16 sps:$4 sm:$0xff]   ;;  %v10925_v35 = vld [vmem:[#allocation6 + $0x36c] ss:$16 sps:$4 sm:$0xff]  }
 0x134   :  { %v288_v38 = vpop.f32.mrf.mxu1  ;;  %1124 = vmatmul.mubr.bf16.vlgmr.msra.gmra.mxu0 %v12801_v34 }
 0x135   :  { %v289_v40 = vadd.f32 %v288_v38, %v162_v33  ;;  %1174 = vmatpush1.bf16.msra.mxu0 %v10839_v29  ;;  %1205 = vmatprep.mubr.bf16.mxu0 %v298_v32  ;;  %v295_v41 = vmax.f32 %v287_v36, 0.0  ;;  %v10916_v29 = vld [vmem:[#allocation6 + $0x14c] ss:$16 sps:$4 sm:$0xff]   ;;  %v10917_v32 = vld [vmem:[#allocation6 + $0x388] ss:$16 sps:$4 sm:$0xff]  }
 0x136   :  { %v290_v42 = vpop.f32.mrf.mxu1  ;;  %1175 = vmatprep.subr.bf16.mxu0 %v10847_v31  ;;  %v10914_v31 = vld [vmem:[#allocation6 + $0x148] ss:$16 sps:$4 sm:$0xff]   ;;  %v10922_v33 = vld [vmem:[#allocation6 + $0x12c] ss:$16 sps:$4 sm:$0xff]  }
 0x137   :  { %v296_v43 = vmax.f32 %v289_v40, 0.0  ;;  %v12804_v50 = vpack.c.bf16 %v295_v41, %v295_v41  ;;  %v10920_v36 = vld [vmem:[#allocation6 + $0x128] ss:$16 sps:$4 sm:$0xff]   ;;  %v10928_v38 = vld [vmem:[#allocation6 + $0x10c] ss:$16 sps:$4 sm:$0xff]  }
 0x138   :  { %v291_v46 = vpop.f32.mrf.mxu1  ;;  %v10926_v40 = vld [vmem:[#allocation6 + $0x108] ss:$16 sps:$4 sm:$0xff]   ;;  %v10934_v42 = vld [vmem:[#allocation6 + $0x32c] ss:$16 sps:$4 sm:$0xff]  }
 0x139   :  { %v300_v48 = vpack.c.bf16 %v296_v43, %v296_v43  ;;  %1176 = vmatpush1.bf16.msra.mxu0 %v10845_v37  ;;  %v10923_v37 = vld [vmem:[#allocation6 + $0x368] ss:$16 sps:$4 sm:$0xff]   ;;  %v10940_v43 = vld [vmem:[#allocation6 + $0x4e4] ss:$16 sps:$4 sm:$0xff]   ;;  %v10937_v46 = vld [vmem:[#allocation6 + $0x30c] ss:$16 sps:$4 sm:$0xff]  }
 0x13a   :  { %1177 = vmatprep.subr.bf16.mxu0 %v10850_v39  ;;  %v10931_v39 = vld [vmem:[#allocation6 + $0x34c] ss:$16 sps:$4 sm:$0xff]   ;;  %v10929_v41 = vld [vmem:[#allocation6 + $0x348] ss:$16 sps:$4 sm:$0xff]  }
 0x13b   :  { %1164 = vmatprep.mubr.bf16.mxu1 %v300_v48 }
 0x13c   :  { %1165 = vmatmul.mubr.bf16.vlgmr.msra.gmra.mxu1 %v12804_v50 }
 0x13d   :  { %1178 = vmatpush1.bf16.msra.mxu0 %v10848_v44  ;;  %1215 = vmatpush1.bf16.msra.mxu1 %v10851_v45  ;;  %v10932_v44 = vld [vmem:[#allocation6 + $0x328] ss:$16 sps:$4 sm:$0xff]   ;;  %v10938_v45 = vld [vmem:[#allocation6 + $0x4e0] ss:$16 sps:$4 sm:$0xff]  }
 0x13e   :  { %1246 = vmatprep.mubr.bf16.mxu1 %v300_v48  ;;  %1179 = vmatprep.subr.bf16.mxu0 %v10856_v47  ;;  %v10943_v47 = vld [vmem:[#allocation6 + $0x4c4] ss:$16 sps:$4 sm:$0xff]   ;;  %v10935_v48 = vld [vmem:[#allocation6 + $0x308] ss:$16 sps:$4 sm:$0xff]  }
 0x13f   :  { %1216 = vmatprep.subr.bf16.mxu1 %v10859_v49  ;;  %v10941_v49 = vld [vmem:[#allocation6 + $0x4c0] ss:$16 sps:$4 sm:$0xff]  }
 0x141   :  { %1180 = vmatpush1.bf16.msra.mxu0 %v10854_v51  ;;  %1217 = vmatpush1.bf16.msra.mxu1 %v10857_v52  ;;  %v10946_v51 = vld [vmem:[#allocation6 + $0x4a4] ss:$16 sps:$4 sm:$0xff]   ;;  %v10944_v52 = vld [vmem:[#allocation6 + $0x4a0] ss:$16 sps:$4 sm:$0xff]  }
 0x142   :  { %1181 = vmatprep.subr.bf16.mxu0 %v10862_v53  ;;  %1218 = vmatprep.subr.bf16.mxu1 %v10865_v54  ;;  %v10949_v53 = vld [vmem:[#allocation6 + $0x484] ss:$16 sps:$4 sm:$0xff]   ;;  %v10947_v54 = vld [vmem:[#allocation6 + $0x480] ss:$16 sps:$4 sm:$0xff]  }
 0x145   :  { %1182 = vmatpush1.bf16.msra.mxu0 %v10860_v55  ;;  %1219 = vmatpush1.bf16.msra.mxu1 %v10863_v56  ;;  %v10952_v55 = vld [vmem:[#allocation6 + $0x464] ss:$16 sps:$4 sm:$0xff]   ;;  %v10950_v56 = vld [vmem:[#allocation6 + $0x460] ss:$16 sps:$4 sm:$0xff]  }
 0x146   :  { %1183 = vmatprep.subr.bf16.mxu0 %v10868_v57  ;;  %1220 = vmatprep.subr.bf16.mxu1 %v10871_v58  ;;  %v10986_v57 = vld [vmem:[#allocation6 + $0x6e0] ss:$16 sps:$4 sm:$0xff]   ;;  %v10988_v58 = vld [vmem:[#allocation6 + $0x6e4] ss:$16 sps:$4 sm:$0xff]  }
 0x149   :  { %1184 = vmatpush1.bf16.msra.mxu0 %v10866_v59  ;;  %1221 = vmatpush1.bf16.msra.mxu1 %v10869_v60  ;;  %v10953_v59 = vld [vmem:[#allocation6 + $0x440] ss:$16 sps:$4 sm:$0xff]   ;;  %v10958_v60 = vld [vmem:[#allocation6 + $0x424] ss:$16 sps:$4 sm:$0xff]  }
 0x14a   :  { %1185 = vmatprep.subr.bf16.mxu0 %v10874_v61  ;;  %1222 = vmatprep.subr.bf16.mxu1 %v10877_v62  ;;  %v10956_v61 = vld [vmem:[#allocation6 + $0x420] ss:$16 sps:$4 sm:$0xff]  }
 0x14b   :  { %v10992_v62 = vld [vmem:[#allocation6 + $0x6c0] ss:$16 sps:$4 sm:$0xff]  }
 0x14d   :  { %1186 = vmatpush1.bf16.msra.mxu0 %v10872_v63  ;;  %1223 = vmatpush1.bf16.msra.mxu1 %v10875_v0  ;;  %v10994_v63 = vld [vmem:[#allocation6 + $0x6c4] ss:$16 sps:$4 sm:$0xff]   ;;  %v10959_v0 = vld [vmem:[#allocation6 + $0x400] ss:$16 sps:$4 sm:$0xff]  }
 0x14e   :  { %1187 = vmatprep.subr.bf16.mxu0 %v10880_v1  ;;  %1224 = vmatprep.subr.bf16.mxu1 %v10883_v2  ;;  %v10998_v1 = vld [vmem:[#allocation6 + $0x6a0] ss:$16 sps:$4 sm:$0xff]   ;;  %v11000_v2 = vld [vmem:[#allocation6 + $0x6a4] ss:$16 sps:$4 sm:$0xff]  }
 0x151   :  { %1188 = vmatpush1.bf16.msra.mxu0 %v10878_v3  ;;  %1225 = vmatpush1.bf16.msra.mxu1 %v10881_v4  ;;  %v10964_v3 = vld [vmem:[#allocation6 + $0x5e4] ss:$16 sps:$4 sm:$0xff]   ;;  %v10962_v4 = vld [vmem:[#allocation6 + $0x5e0] ss:$16 sps:$4 sm:$0xff]  }
 0x152   :  { %1189 = vmatprep.subr.bf16.mxu0 %v10886_v5  ;;  %1226 = vmatprep.subr.bf16.mxu1 %v10889_v6  ;;  %v11004_v5 = vld [vmem:[#allocation6 + $0x680] ss:$16 sps:$4 sm:$0xff]   ;;  %v11006_v6 = vld [vmem:[#allocation6 + $0x684] ss:$16 sps:$4 sm:$0xff]  }
 0x155   :  { %1190 = vmatpush2.bf16.msra.mxu0 %v10884_v7  ;;  %1227 = vmatpush1.bf16.msra.mxu1 %v10887_v8  ;;  %v10967_v7 = vld [vmem:[#allocation6 + $0x5c4] ss:$16 sps:$4 sm:$0xff]   ;;  %v10965_v8 = vld [vmem:[#allocation6 + $0x5c0] ss:$16 sps:$4 sm:$0xff]  }
 0x156   :  { %1191 = vmatprep.subr.bf16.mxu0 %v10892_v9  ;;  %1228 = vmatprep.subr.bf16.mxu1 %v10895_v10  ;;  %v11010_v9 = vld [vmem:[#allocation6 + $0x660] ss:$16 sps:$4 sm:$0xff]   ;;  %v11012_v10 = vld [vmem:[#allocation6 + $0x664] ss:$16 sps:$4 sm:$0xff]  }
 0x159   :  { %1192 = vmatpush2.bf16.msra.mxu0 %v10890_v11  ;;  %1229 = vmatpush1.bf16.msra.mxu1 %v10893_v12  ;;  %v10970_v11 = vld [vmem:[#allocation6 + $0x5a4] ss:$16 sps:$4 sm:$0xff]   ;;  %v10968_v12 = vld [vmem:[#allocation6 + $0x5a0] ss:$16 sps:$4 sm:$0xff]  }
 0x15a   :  { %1193 = vmatprep.subr.bf16.mxu0 %v10898_v13  ;;  %1230 = vmatprep.subr.bf16.mxu1 %v10901_v14  ;;  %v11016_v13 = vld [vmem:[#allocation6 + $0x640] ss:$16 sps:$4 sm:$0xff]   ;;  %v11018_v14 = vld [vmem:[#allocation6 + $0x644] ss:$16 sps:$4 sm:$0xff]  }
 0x15d   :  { %1194 = vmatpush2.bf16.msra.mxu0 %v10896_v17  ;;  %1231 = vmatpush2.bf16.msra.mxu1 %v10899_v18  ;;  %v10973_v17 = vld [vmem:[#allocation6 + $0x584] ss:$16 sps:$4 sm:$0xff]   ;;  %v10971_v18 = vld [vmem:[#allocation6 + $0x580] ss:$16 sps:$4 sm:$0xff]  }
 0x15e   :  { %1195 = vmatprep.subr.bf16.mxu0 %v10904_v19  ;;  %1232 = vmatprep.subr.bf16.mxu1 %v10907_v20  ;;  %v11022_v19 = vld [vmem:[#allocation6 + $0x620] ss:$16 sps:$4 sm:$0xff]   ;;  %v11024_v20 = vld [vmem:[#allocation6 + $0x624] ss:$16 sps:$4 sm:$0xff]  }
 0x161   :  { %1196 = vmatpush2.bf16.msra.mxu0 %v10902_v22  ;;  %1233 = vmatpush2.bf16.msra.mxu1 %v10905_v23  ;;  %v10976_v22 = vld [vmem:[#allocation6 + $0x564] ss:$16 sps:$4 sm:$0xff]   ;;  %v10974_v23 = vld [vmem:[#allocation6 + $0x560] ss:$16 sps:$4 sm:$0xff]  }
 0x162   :  { %1197 = vmatprep.subr.bf16.mxu0 %v10910_v25  ;;  %1234 = vmatprep.subr.bf16.mxu1 %v10913_v26  ;;  %v11028_v25 = vld [vmem:[#allocation6 + $0x600] ss:$16 sps:$4 sm:$0xff]   ;;  %v11030_v26 = vld [vmem:[#allocation6 + $0x604] ss:$16 sps:$4 sm:$0xff]  }
 0x165   :  { %1198 = vmatpush2.bf16.msra.mxu0 %v10908_v27  ;;  %1235 = vmatpush2.bf16.msra.mxu1 %v10911_v28  ;;  %v10979_v27 = vld [vmem:[#allocation6 + $0x544] ss:$16 sps:$4 sm:$0xff]   ;;  %v10977_v28 = vld [vmem:[#allocation6 + $0x540] ss:$16 sps:$4 sm:$0xff]  }
 0x166   :  { %1199 = vmatprep.subr.bf16.mxu0 %v10916_v29  ;;  %1236 = vmatprep.subr.bf16.mxu1 %v10919_v30  ;;  %v11034_v29 = vld [vmem:[#allocation6 + $0x7e0] ss:$16 sps:$4 sm:$0xff]   ;;  %v11036_v30 = vld [vmem:[#allocation6 + $0x7e4] ss:$16 sps:$4 sm:$0xff]  }
 0x169   :  { %1200 = vmatpush2.bf16.msra.mxu0 %v10914_v31  ;;  %1237 = vmatpush2.bf16.msra.mxu1 %v10917_v32  ;;  %v10982_v31 = vld [vmem:[#allocation6 + $0x524] ss:$16 sps:$4 sm:$0xff]   ;;  %v10980_v32 = vld [vmem:[#allocation6 + $0x520] ss:$16 sps:$4 sm:$0xff]  }
 0x16a   :  { %1201 = vmatprep.subr.bf16.mxu0 %v10922_v33  ;;  %1238 = vmatprep.subr.bf16.mxu1 %v10925_v35  ;;  %v11040_v33 = vld [vmem:[#allocation6 + $0x7c0] ss:$16 sps:$4 sm:$0xff]   ;;  %v11042_v35 = vld [vmem:[#allocation6 + $0x7c4] ss:$16 sps:$4 sm:$0xff]  }
 0x16d   :  { %1202 = vmatpush2.bf16.msra.mxu0 %v10920_v36  ;;  %1239 = vmatpush2.bf16.msra.mxu1 %v10923_v37  ;;  %v10985_v36 = vld [vmem:[#allocation6 + $0x504] ss:$16 sps:$4 sm:$0xff]   ;;  %v10983_v37 = vld [vmem:[#allocation6 + $0x500] ss:$16 sps:$4 sm:$0xff]  }
 0x16e   :  { %1203 = vmatprep.subr.bf16.mxu0 %v10928_v38  ;;  %1240 = vmatprep.subr.bf16.mxu1 %v10931_v39  ;;  %v11046_v38 = vld [vmem:[#allocation6 + $0x7a0] ss:$16 sps:$4 sm:$0xff]   ;;  %v11048_v39 = vld [vmem:[#allocation6 + $0x7a4] ss:$16 sps:$4 sm:$0xff]  }
 0x171   :  { %1204 = vmatpush2.bf16.msra.mxu0 %v10926_v40  ;;  %1241 = vmatpush2.bf16.msra.mxu1 %v10929_v41  ;;  %v10991_v40 = vld [vmem:[#allocation6 + $0x4ec] ss:$16 sps:$4 sm:$0xff]   ;;  %v11052_v41 = vld [vmem:[#allocation6 + $0x780] ss:$16 sps:$4 sm:$0xff]  }
 0x172   :  { %1242 = vmatprep.subr.bf16.mxu1 %v10934_v42  ;;  %2055 = vmatprep.subr.bf16.mxu0 %v10940_v43  ;;  %v11054_v42 = vld [vmem:[#allocation6 + $0x784] ss:$16 sps:$4 sm:$0xff]  }
 0x173   :  { %v11060_v43 = vld [vmem:[#allocation6 + $0x764] ss:$16 sps:$4 sm:$0xff]  }
 0x174   :  { %1206 = vmatmul.mubr.bf16.vlgmr.msra.gmra.mxu0 %v12801_v34  ;;  %v10955_v34 = vld [vmem:[#allocation6 + $0x444] ss:$16 sps:$4 sm:$0xff]  }
 0x175   :  { %1243 = vmatpush2.bf16.msra.mxu1 %v10932_v44  ;;  %2056 = vmatpush1.bf16.msra.mxu0 %v10938_v45  ;;  %v11058_v44 = vld [vmem:[#allocation6 + $0x760] ss:$16 sps:$4 sm:$0xff]   ;;  %v11066_v45 = vld [vmem:[#allocation6 + $0x744] ss:$16 sps:$4 sm:$0xff]  }
 0x176   :  { %1244 = vmatprep.subr.bf16.mxu1 %v10937_v46  ;;  %2057 = vmatprep.subr.bf16.mxu0 %v10943_v47  ;;  %v11064_v46 = vld [vmem:[#allocation6 + $0x740] ss:$16 sps:$4 sm:$0xff]   ;;  %v11072_v47 = vld [vmem:[#allocation6 + $0x724] ss:$16 sps:$4 sm:$0xff]  }
 0x179   :  { %1245 = vmatpush2.bf16.msra.mxu1 %v10935_v48  ;;  %2058 = vmatpush1.bf16.msra.mxu0 %v10941_v49  ;;  %v11070_v48 = vld [vmem:[#allocation6 + $0x720] ss:$16 sps:$4 sm:$0xff]   ;;  %v11078_v49 = vld [vmem:[#allocation6 + $0x704] ss:$16 sps:$4 sm:$0xff]  }
 0x17a   :  { %2059 = vmatprep.subr.bf16.mxu0 %v10946_v51  ;;  %2096 = vmatprep.subr.bf16.mxu1 %v10988_v58  ;;  %v11076_v51 = vld [vmem:[#allocation6 + $0x700] ss:$16 sps:$4 sm:$0xff]  }
 0x17c   :  { %1247 = vmatmul.mubr.bf16.vlgmr.msra.gmra.mxu1 %v12804_v50  ;;  %v10961_v50 = vld [vmem:[#allocation6 + $0x404] ss:$16 sps:$4 sm:$0xff]  }
 0x17d   :  { %2060 = vmatpush1.bf16.msra.mxu0 %v10944_v52  ;;  %2097 = vmatpush1.bf16.msra.mxu1 %v10986_v57  ;;  %v11084_v52 = vld [vmem:[#allocation6 + $0x6ec] ss:$16 sps:$4 sm:$0xff]  }
 0x17e   :  { %2061 = vmatprep.subr.bf16.mxu0 %v10949_v53  ;;  %2098 = vmatprep.subr.bf16.mxu1 %v10994_v63  ;;  %v12809_v53 = vld [vmem:[#allocation7] sm:$0xf] }
 0x17f   :  { %v438_v57 = vrot.slane %v12809_v53, %v12791_v16 }
 0x181   :  { %2062 = vmatpush1.bf16.msra.mxu0 %v10947_v54  ;;  %2099 = vmatpush1.bf16.msra.mxu1 %v10992_v62 }
 0x182   :  { %2063 = vmatprep.subr.bf16.mxu0 %v10952_v55  ;;  %2100 = vmatprep.subr.bf16.mxu1 %v11000_v2 }
 0x185   :  { %2064 = vmatpush1.bf16.msra.mxu0 %v10950_v56  ;;  %2101 = vmatpush1.bf16.msra.mxu1 %v10998_v1  ;;  %v434_v56 = vrot.slane %v12809_v53, %v12789_v15 }
 0x186   :  { %2065 = vmatprep.subr.bf16.mxu0 %v10955_v34  ;;  %2102 = vmatprep.subr.bf16.mxu1 %v11006_v6 }
 0x189   :  { %2066 = vmatpush1.bf16.msra.mxu0 %v10953_v59  ;;  %2103 = vmatpush1.bf16.msra.mxu1 %v11004_v5  ;;  %v10997_v5 = vld [vmem:[#allocation6 + $0x4cc] ss:$16 sps:$4 sm:$0xff]  }
 0x18a   :  { %2067 = vmatprep.subr.bf16.mxu0 %v10958_v60  ;;  %2104 = vmatprep.subr.bf16.mxu1 %v11012_v10  ;;  %v11001_v10 = vld [vmem:[#allocation6 + $0x4a8] ss:$16 sps:$4 sm:$0xff]  }
 0x18d   :  { %2068 = vmatpush1.bf16.msra.mxu0 %v10956_v61  ;;  %2105 = vmatpush1.bf16.msra.mxu1 %v11010_v9  ;;  %v11003_v9 = vld [vmem:[#allocation6 + $0x4ac] ss:$16 sps:$4 sm:$0xff]  }
 0x18e   :  { %2069 = vmatprep.subr.bf16.mxu0 %v10961_v50  ;;  %2106 = vmatprep.subr.bf16.mxu1 %v11018_v14  ;;  %v11013_v14 = vld [vmem:[#allocation6 + $0x468] ss:$16 sps:$4 sm:$0xff]  }
 0x191   :  { %2070 = vmatpush1.bf16.msra.mxu0 %v10959_v0  ;;  %2107 = vmatpush1.bf16.msra.mxu1 %v11016_v13  ;;  %v11015_v13 = vld [vmem:[#allocation6 + $0x46c] ss:$16 sps:$4 sm:$0xff]  }
 0x192   :  { %2071 = vmatprep.subr.bf16.mxu0 %v10964_v3  ;;  %2108 = vmatprep.subr.bf16.mxu1 %v11024_v20  ;;  %v10989_v3 = vld [vmem:[#allocation6 + $0x4e8] ss:$16 sps:$4 sm:$0xff]  }
 0x193   :  { %v11025_v20 = vld [vmem:[#allocation6 + $0x428] ss:$16 sps:$4 sm:$0xff]  }
 0x195   :  { %2072 = vmatpush2.bf16.msra.mxu0 %v10962_v4  ;;  %2109 = vmatpush1.bf16.msra.mxu1 %v11022_v19  ;;  %v11027_v19 = vld [vmem:[#allocation6 + $0x42c] ss:$16 sps:$4 sm:$0xff]  }
 0x196   :  { %2073 = vmatprep.subr.bf16.mxu0 %v10967_v7  ;;  %2110 = vmatprep.subr.bf16.mxu1 %v11030_v26  ;;  %v11037_v26 = vld [vmem:[#allocation6 + $0x5e8] ss:$16 sps:$4 sm:$0xff]  }
 0x199   :  { %2074 = vmatpush2.bf16.msra.mxu0 %v10965_v8  ;;  %2111 = vmatpush1.bf16.msra.mxu1 %v11028_v25  ;;  %v10995_v8 = vld [vmem:[#allocation6 + $0x4c8] ss:$16 sps:$4 sm:$0xff]   ;;  %v11039_v25 = vld [vmem:[#allocation6 + $0x5ec] ss:$16 sps:$4 sm:$0xff]  }
 0x19a   :  { %2075 = vmatprep.subr.bf16.mxu0 %v10970_v11  ;;  %2112 = vmatprep.subr.bf16.mxu1 %v11036_v30  ;;  %v11009_v11 = vld [vmem:[#allocation6 + $0x48c] ss:$16 sps:$4 sm:$0xff]   ;;  %v11049_v30 = vld [vmem:[#allocation6 + $0x5a8] ss:$16 sps:$4 sm:$0xff]  }
 0x19d   :  { %2076 = vmatpush2.bf16.msra.mxu0 %v10968_v12  ;;  %2113 = vmatpush2.bf16.msra.mxu1 %v11034_v29  ;;  %v11007_v12 = vld [vmem:[#allocation6 + $0x488] ss:$16 sps:$4 sm:$0xff]   ;;  %v11051_v29 = vld [vmem:[#allocation6 + $0x5ac] ss:$16 sps:$4 sm:$0xff]  }
 0x19e   :  { %2077 = vmatprep.subr.bf16.mxu0 %v10973_v17  ;;  %2114 = vmatprep.subr.bf16.mxu1 %v11042_v35  ;;  %v11021_v17 = vld [vmem:[#allocation6 + $0x44c] ss:$16 sps:$4 sm:$0xff]   ;;  %v11061_v35 = vld [vmem:[#allocation6 + $0x568] ss:$16 sps:$4 sm:$0xff]  }
 0x1a1   :  { %2078 = vmatpush2.bf16.msra.mxu0 %v10971_v18  ;;  %2115 = vmatpush2.bf16.msra.mxu1 %v11040_v33  ;;  %v11019_v18 = vld [vmem:[#allocation6 + $0x448] ss:$16 sps:$4 sm:$0xff]   ;;  %v11063_v33 = vld [vmem:[#allocation6 + $0x56c] ss:$16 sps:$4 sm:$0xff]  }
 0x1a2   :  { %2079 = vmatprep.subr.bf16.mxu0 %v10976_v22  ;;  %2116 = vmatprep.subr.bf16.mxu1 %v11048_v39  ;;  %v11033_v22 = vld [vmem:[#allocation6 + $0x40c] ss:$16 sps:$4 sm:$0xff]  }
 0x1a5   :  { %2080 = vmatpush2.bf16.msra.mxu0 %v10974_v23  ;;  %2117 = vmatpush2.bf16.msra.mxu1 %v11046_v38  ;;  %v11031_v23 = vld [vmem:[#allocation6 + $0x408] ss:$16 sps:$4 sm:$0xff]  }
 0x1a6   :  { %2081 = vmatprep.subr.bf16.mxu0 %v10979_v27  ;;  %2118 = vmatprep.subr.bf16.mxu1 %v11054_v42  ;;  %v11045_v27 = vld [vmem:[#allocation6 + $0x5cc] ss:$16 sps:$4 sm:$0xff]   ;;  %v11067_v38 = vld [vmem:[#allocation6 + $0x548] ss:$16 sps:$4 sm:$0xff]  }
 0x1a9   :  { %2082 = vmatpush2.bf16.msra.mxu0 %v10977_v28  ;;  %2119 = vmatpush2.bf16.msra.mxu1 %v11052_v41  ;;  %v11043_v28 = vld [vmem:[#allocation6 + $0x5c8] ss:$16 sps:$4 sm:$0xff]   ;;  %v442_v41 = vrot.slane %v12809_v53, %v12795_v21 }
 0x1aa   :  { %2083 = vmatprep.subr.bf16.mxu0 %v10982_v31  ;;  %2120 = vmatprep.subr.bf16.mxu1 %v11060_v43  ;;  %v11057_v31 = vld [vmem:[#allocation6 + $0x58c] ss:$16 sps:$4 sm:$0xff]   ;;  %v446_v43 = vrot.slane %v12809_v53, %v12797_v24 }
 0x1ab   :  { %v11087_v53 = vld [vmem:[#allocation6 + $0x6cc] ss:$16 sps:$4 sm:$0xff]  }
 0x1ad   :  { %2084 = vmatpush2.bf16.msra.mxu0 %v10980_v32  ;;  %2121 = vmatpush2.bf16.msra.mxu1 %v11058_v44  ;;  %v11055_v32 = vld [vmem:[#allocation6 + $0x588] ss:$16 sps:$4 sm:$0xff]  }
 0x1ae   :  { %2085 = vmatprep.subr.bf16.mxu0 %v10985_v36  ;;  %2122 = vmatprep.subr.bf16.mxu1 %v11066_v45  ;;  %v11069_v36 = vld [vmem:[#allocation6 + $0x54c] ss:$16 sps:$4 sm:$0xff]   ;;  %v11073_v44 = vld [vmem:[#allocation6 + $0x528] ss:$16 sps:$4 sm:$0xff]  }
 0x1b1   :  { %2086 = vmatpush2.bf16.msra.mxu0 %v10983_v37  ;;  %2123 = vmatpush2.bf16.msra.mxu1 %v11064_v46  ;;  %v11081_v46 = vld [vmem:[#allocation6 + $0x50c] ss:$16 sps:$4 sm:$0xff]  }
 0x1b2   :  { %2137 = vmatprep.subr.bf16.mxu0 %v10991_v40  ;;  %2124 = vmatprep.subr.bf16.mxu1 %v11072_v47  ;;  %v11075_v40 = vld [vmem:[#allocation6 + $0x52c] ss:$16 sps:$4 sm:$0xff]  }
 0x1b5   :  { %2125 = vmatpush2.bf16.msra.mxu1 %v11070_v48 }
 0x1b6   :  { %2126 = vmatprep.subr.bf16.mxu1 %v11078_v49 }
 0x1b9   :  { %2127 = vmatpush2.bf16.msra.mxu1 %v11076_v51 }
 0x1ba   :  { %2178 = vmatprep.subr.bf16.mxu1 %v11084_v52  ;;  %v11079_v52 = vld [vmem:[#allocation6 + $0x508] ss:$16 sps:$4 sm:$0xff]  }
 0x1f4   :  { %v1125_v54 = vpop.f32.mrf.mxu0 }
 0x1f5   :  { %v1126_v59 = vadd.f32 %v1125_v54, %v434_v56 }
 0x1f6   :  { %v1127_v55 = vpop.f32.mrf.mxu0 }
 0x1f7   :  { %v1128_v61 = vadd.f32 %v1127_v55, %v438_v57 }
 0x1f8   :  { %v1129_v34 = vpop.f32.mrf.mxu0 }
 0x1fa   :  { %v1130_v58 = vpop.f32.mrf.mxu0 }
 0x1fb   :  { %v11082_v58 = vld [vmem:[#allocation6 + $0x6e8] ss:$16 sps:$4 sm:$0xff]  }
 0x1fc   :  { %v1166_v60 = vpop.f32.mrf.mxu1 }
 0x1fd   :  { %v1167_v62 = vadd.f32 %v1166_v60, %v1126_v59 }
 0x1fe   :  { %v1168_v63 = vpop.f32.mrf.mxu1 }
 0x1ff   :  { %v1169_v50 = vadd.f32 %v1168_v63, %v1128_v61  ;;  %v1255_v0 = vmax.f32 %v1167_v62, 0.0  ;;  %v11085_v62 = vld [vmem:[#allocation6 + $0x6c8] ss:$16 sps:$4 sm:$0xff]   ;;  %v11090_v63 = vld [vmem:[#allocation6 + $0x6ac] ss:$16 sps:$4 sm:$0xff]  }
 0x200   :  { %v1170_v1 = vpop.f32.mrf.mxu1 }
 0x201   :  { %v1256_v2 = vmax.f32 %v1169_v50, 0.0  ;;  %v12815_v7 = vpack.c.bf16 %v1255_v0, %v1255_v0  ;;  %v11088_v50 = vld [vmem:[#allocation6 + $0x6a8] ss:$16 sps:$4 sm:$0xff]   ;;  %v11093_v0 = vld [vmem:[#allocation6 + $0x68c] ss:$16 sps:$4 sm:$0xff]  }
 0x202   :  { %v1171_v4 = vpop.f32.mrf.mxu1  ;;  %v11130_v1 = vld [vmem:[#allocation6 + $0x8e0] ss:$16 sps:$4 sm:$0xff]  }
 0x203   :  { %v1260_v6 = vpack.c.bf16 %v1256_v2, %v1256_v2  ;;  %v11132_v2 = vld [vmem:[#allocation6 + $0x8e4] ss:$16 sps:$4 sm:$0xff]   ;;  %v11091_v4 = vld [vmem:[#allocation6 + $0x688] ss:$16 sps:$4 sm:$0xff]  }
 0x205   :  { %2087 = vmatprep.mubr.bf16.mxu0 %v1260_v6 }
 0x206   :  { %2088 = vmatmul.mubr.bf16.vlgmr.msra.gmra.mxu0 %v12815_v7 }
 0x207   :  { %2138 = vmatpush1.bf16.msra.mxu0 %v10989_v3  ;;  %2169 = vmatprep.mubr.bf16.mxu0 %v1260_v6  ;;  %v11135_v3 = vld [vmem:[#allocation6 + $0x8c4] ss:$16 sps:$4 sm:$0xff]   ;;  %v11096_v6 = vld [vmem:[#allocation6 + $0x66c] ss:$16 sps:$4 sm:$0xff]  }
 0x208   :  { %2139 = vmatprep.subr.bf16.mxu0 %v10997_v5  ;;  %v11133_v5 = vld [vmem:[#allocation6 + $0x8c0] ss:$16 sps:$4 sm:$0xff]  }
 0x20b   :  { %2140 = vmatpush1.bf16.msra.mxu0 %v10995_v8  ;;  %v11094_v8 = vld [vmem:[#allocation6 + $0x668] ss:$16 sps:$4 sm:$0xff]  }
 0x20c   :  { %2141 = vmatprep.subr.bf16.mxu0 %v11003_v9  ;;  %v11136_v9 = vld [vmem:[#allocation6 + $0x8a0] ss:$16 sps:$4 sm:$0xff]  }
 0x20f   :  { %2142 = vmatpush1.bf16.msra.mxu0 %v11001_v10  ;;  %v11099_v10 = vld [vmem:[#allocation6 + $0x64c] ss:$16 sps:$4 sm:$0xff]  }
 0x210   :  { %2143 = vmatprep.subr.bf16.mxu0 %v11009_v11  ;;  %v11141_v11 = vld [vmem:[#allocation6 + $0x884] ss:$16 sps:$4 sm:$0xff]  }
 0x213   :  { %2144 = vmatpush1.bf16.msra.mxu0 %v11007_v12  ;;  %v11097_v12 = vld [vmem:[#allocation6 + $0x648] ss:$16 sps:$4 sm:$0xff]  }
 0x214   :  { %2145 = vmatprep.subr.bf16.mxu0 %v11015_v13  ;;  %v11139_v13 = vld [vmem:[#allocation6 + $0x880] ss:$16 sps:$4 sm:$0xff]  }
 0x217   :  { %2146 = vmatpush1.bf16.msra.mxu0 %v11013_v14  ;;  %v11102_v14 = vld [vmem:[#allocation6 + $0x62c] ss:$16 sps:$4 sm:$0xff]  }
 0x218   :  { %2147 = vmatprep.subr.bf16.mxu0 %v11021_v17  ;;  %v11144_v17 = vld [vmem:[#allocation6 + $0x864] ss:$16 sps:$4 sm:$0xff]  }
 0x21b   :  { %2148 = vmatpush1.bf16.msra.mxu0 %v11019_v18  ;;  %v11100_v18 = vld [vmem:[#allocation6 + $0x628] ss:$16 sps:$4 sm:$0xff]  }
 0x21c   :  { %2149 = vmatprep.subr.bf16.mxu0 %v11027_v19  ;;  %v11142_v19 = vld [vmem:[#allocation6 + $0x860] ss:$16 sps:$4 sm:$0xff]  }
 0x21f   :  { %2150 = vmatpush1.bf16.msra.mxu0 %v11025_v20  ;;  %v11105_v20 = vld [vmem:[#allocation6 + $0x60c] ss:$16 sps:$4 sm:$0xff]  }
 0x220   :  { %2151 = vmatprep.subr.bf16.mxu0 %v11033_v22  ;;  %v11147_v22 = vld [vmem:[#allocation6 + $0x844] ss:$16 sps:$4 sm:$0xff]  }
 0x223   :  { %2152 = vmatpush1.bf16.msra.mxu0 %v11031_v23  ;;  %v11103_v23 = vld [vmem:[#allocation6 + $0x608] ss:$16 sps:$4 sm:$0xff]  }
 0x224   :  { %2153 = vmatprep.subr.bf16.mxu0 %v11039_v25  ;;  %v11145_v25 = vld [vmem:[#allocation6 + $0x840] ss:$16 sps:$4 sm:$0xff]  }
 0x227   :  { %2154 = vmatpush2.bf16.msra.mxu0 %v11037_v26  ;;  %v11108_v26 = vld [vmem:[#allocation6 + $0x7ec] ss:$16 sps:$4 sm:$0xff]  }
 0x228   :  { %2155 = vmatprep.subr.bf16.mxu0 %v11045_v27  ;;  %v11150_v27 = vld [vmem:[#allocation6 + $0x824] ss:$16 sps:$4 sm:$0xff]  }
 0x22b   :  { %2156 = vmatpush2.bf16.msra.mxu0 %v11043_v28  ;;  %v11106_v28 = vld [vmem:[#allocation6 + $0x7e8] ss:$16 sps:$4 sm:$0xff]  }
 0x22c   :  { %2157 = vmatprep.subr.bf16.mxu0 %v11051_v29  ;;  %v11148_v29 = vld [vmem:[#allocation6 + $0x820] ss:$16 sps:$4 sm:$0xff]  }
 0x22f   :  { %2158 = vmatpush2.bf16.msra.mxu0 %v11049_v30  ;;  %v11111_v30 = vld [vmem:[#allocation6 + $0x7cc] ss:$16 sps:$4 sm:$0xff]  }
 0x230   :  { %2159 = vmatprep.subr.bf16.mxu0 %v11057_v31  ;;  %v11153_v31 = vld [vmem:[#allocation6 + $0x804] ss:$16 sps:$4 sm:$0xff]  }
 0x233   :  { %2160 = vmatpush2.bf16.msra.mxu0 %v11055_v32  ;;  %v11109_v32 = vld [vmem:[#allocation6 + $0x7c8] ss:$16 sps:$4 sm:$0xff]  }
 0x234   :  { %v1207_v37 = vpop.f32.mrf.mxu0  ;;  %2161 = vmatprep.subr.bf16.mxu0 %v11063_v33  ;;  %v11151_v33 = vld [vmem:[#allocation6 + $0x800] ss:$16 sps:$4 sm:$0xff]  }
 0x235   :  { %v1208_v47 = vadd.f32 %v1207_v37, %v442_v41  ;;  %v11112_v37 = vld [vmem:[#allocation6 + $0x7a8] ss:$16 sps:$4 sm:$0xff]  }
 0x236   :  { %v1209_v39 = vpop.f32.mrf.mxu0  ;;  %v11115_v41 = vld [vmem:[#allocation6 + $0x788] ss:$16 sps:$4 sm:$0xff]  }
 0x237   :  { %2162 = vmatpush2.bf16.msra.mxu0 %v11061_v35  ;;  %v1210_v49 = vadd.f32 %v1209_v39, %v446_v43  ;;  %v11114_v35 = vld [vmem:[#allocation6 + $0x7ac] ss:$16 sps:$4 sm:$0xff]  }
 0x238   :  { %v1211_v42 = vpop.f32.mrf.mxu0  ;;  %2163 = vmatprep.subr.bf16.mxu0 %v11069_v36  ;;  %v11156_v36 = vld [vmem:[#allocation6 + $0x9e4] ss:$16 sps:$4 sm:$0xff]   ;;  %v11117_v39 = vld [vmem:[#allocation6 + $0x78c] ss:$16 sps:$4 sm:$0xff]  }
 0x239   :  { %v11157_v42 = vld [vmem:[#allocation6 + $0x9c0] ss:$16 sps:$4 sm:$0xff]   ;;  %v11120_v43 = vld [vmem:[#allocation6 + $0x76c] ss:$16 sps:$4 sm:$0xff]  }
 0x23a   :  { %v1212_v45 = vpop.f32.mrf.mxu0 }
 0x23b   :  { %2164 = vmatpush2.bf16.msra.mxu0 %v11067_v38  ;;  %v11154_v38 = vld [vmem:[#allocation6 + $0x9e0] ss:$16 sps:$4 sm:$0xff]   ;;  %v11118_v45 = vld [vmem:[#allocation6 + $0x768] ss:$16 sps:$4 sm:$0xff]  }
 0x23c   :  { %v1248_v48 = vpop.f32.mrf.mxu1  ;;  %2165 = vmatprep.subr.bf16.mxu0 %v11075_v40  ;;  %v11159_v40 = vld [vmem:[#allocation6 + $0x9c4] ss:$16 sps:$4 sm:$0xff]  }
 0x23d   :  { %v1249_v51 = vadd.f32 %v1248_v48, %v1208_v47  ;;  %v11123_v47 = vld [vmem:[#allocation6 + $0x74c] ss:$16 sps:$4 sm:$0xff]   ;;  %v11165_v48 = vld [vmem:[#allocation6 + $0x984] ss:$16 sps:$4 sm:$0xff]  }
 0x23e   :  { %v1250_v54 = vpop.f32.mrf.mxu1 }
 0x23f   :  { %v1257_v55 = vmax.f32 %v1249_v51, 0.0  ;;  %v1251_v56 = vadd.f32 %v1250_v54, %v1210_v49  ;;  %2166 = vmatpush2.bf16.msra.mxu0 %v11073_v44  ;;  %v11162_v44 = vld [vmem:[#allocation6 + $0x9a4] ss:$16 sps:$4 sm:$0xff]   ;;  %v11121_v49 = vld [vmem:[#allocation6 + $0x748] ss:$16 sps:$4 sm:$0xff]  }
 0x240   :  { %v1252_v34 = vpop.f32.mrf.mxu1  ;;  %2167 = vmatprep.subr.bf16.mxu0 %v11081_v46  ;;  %v11160_v46 = vld [vmem:[#allocation6 + $0x9a0] ss:$16 sps:$4 sm:$0xff]   ;;  %v11168_v54 = vld [vmem:[#allocation6 + $0x964] ss:$16 sps:$4 sm:$0xff]  }
 0x241   :  { %v1258_v57 = vmax.f32 %v1251_v56, 0.0  ;;  %v12822_v61 = vpack.c.bf16 %v1257_v55, %v1257_v55  ;;  %v11163_v51 = vld [vmem:[#allocation6 + $0x980] ss:$16 sps:$4 sm:$0xff]   ;;  %v11124_v55 = vld [vmem:[#allocation6 + $0x728] ss:$16 sps:$4 sm:$0xff]  }
 0x242   :  { %v1253_v59 = vpop.f32.mrf.mxu1  ;;  %v11166_v56 = vld [vmem:[#allocation6 + $0x960] ss:$16 sps:$4 sm:$0xff]   ;;  %v11129_v34 = vld [vmem:[#allocation6 + $0x70c] ss:$16 sps:$4 sm:$0xff]  }
 0x243   :  { %v1262_v60 = vpack.c.bf16 %v1258_v57, %v1258_v57  ;;  %2168 = vmatpush2.bf16.msra.mxu0 %v11079_v52  ;;  %v11126_v52 = vld [vmem:[#allocation6 + $0x72c] ss:$16 sps:$4 sm:$0xff]   ;;  %v11171_v57 = vld [vmem:[#allocation6 + $0x944] ss:$16 sps:$4 sm:$0xff]   ;;  %v11169_v59 = vld [vmem:[#allocation6 + $0x940] ss:$16 sps:$4 sm:$0xff]  }
 0x244   :  { %3019 = vmatprep.subr.bf16.mxu0 %v11132_v2  ;;  %v11184_v2 = vld [vmem:[#allocation6 + $0xac0] ss:$16 sps:$4 sm:$0xff]  }
 0x245   :  { %2128 = vmatprep.mubr.bf16.mxu1 %v1262_v60 }
 0x246   :  { %2129 = vmatmul.mubr.bf16.vlgmr.msra.gmra.mxu1 %v12822_v61  ;;  %2170 = vmatmul.mubr.bf16.vlgmr.msra.gmra.mxu0 %v12815_v7  ;;  %v11138_v7 = vld [vmem:[#allocation6 + $0x8a4] ss:$16 sps:$4 sm:$0xff]  }
 0x247   :  { %2179 = vmatpush1.bf16.msra.mxu1 %v11082_v58  ;;  %2210 = vmatprep.mubr.bf16.mxu1 %v1262_v60  ;;  %v11127_v58 = vld [vmem:[#allocation6 + $0x708] ss:$16 sps:$4 sm:$0xff]   ;;  %v11172_v60 = vld [vmem:[#allocation6 + $0x920] ss:$16 sps:$4 sm:$0xff]  }
 0x248   :  { %2180 = vmatprep.subr.bf16.mxu1 %v11087_v53  ;;  %3020 = vmatpush1.bf16.msra.mxu0 %v11130_v1  ;;  %v11174_v53 = vld [vmem:[#allocation6 + $0x924] ss:$16 sps:$4 sm:$0xff]   ;;  %v11183_v1 = vld [vmem:[#allocation6 + $0x8ec] ss:$16 sps:$4 sm:$0xff]  }
 0x249   :  { %3021 = vmatprep.subr.bf16.mxu0 %v11135_v3  ;;  %v11186_v3 = vld [vmem:[#allocation6 + $0xac4] ss:$16 sps:$4 sm:$0xff]  }
 0x24b   :  { %2181 = vmatpush1.bf16.msra.mxu1 %v11085_v62  ;;  %v11177_v62 = vld [vmem:[#allocation6 + $0x904] ss:$16 sps:$4 sm:$0xff]  }
 0x24c   :  { %2182 = vmatprep.subr.bf16.mxu1 %v11090_v63  ;;  %3022 = vmatpush1.bf16.msra.mxu0 %v11133_v5  ;;  %v11175_v63 = vld [vmem:[#allocation6 + $0x900] ss:$16 sps:$4 sm:$0xff]  }
 0x24d   :  { %3023 = vmatprep.subr.bf16.mxu0 %v11138_v7  ;;  %v11196_v5 = vld [vmem:[#allocation6 + $0xa80] ss:$16 sps:$4 sm:$0xff]  }
 0x24e   :  { %v11202_v7 = vld [vmem:[#allocation6 + $0xa60] ss:$16 sps:$4 sm:$0xff]  }
 0x24f   :  { %2183 = vmatpush1.bf16.msra.mxu1 %v11088_v50  ;;  %v11178_v50 = vld [vmem:[#allocation6 + $0xae0] ss:$16 sps:$4 sm:$0xff]  }
 0x250   :  { %2184 = vmatprep.subr.bf16.mxu1 %v11093_v0  ;;  %3024 = vmatpush1.bf16.msra.mxu0 %v11136_v9  ;;  %v11180_v0 = vld [vmem:[#allocation6 + $0xae4] ss:$16 sps:$4 sm:$0xff]   ;;  %v11208_v9 = vld [vmem:[#allocation6 + $0xa40] ss:$16 sps:$4 sm:$0xff]  }
 0x251   :  { %3025 = vmatprep.subr.bf16.mxu0 %v11141_v11  ;;  %v11214_v11 = vld [vmem:[#allocation6 + $0xa20] ss:$16 sps:$4 sm:$0xff]  }
 0x253   :  { %2185 = vmatpush1.bf16.msra.mxu1 %v11091_v4  ;;  %v11190_v4 = vld [vmem:[#allocation6 + $0xaa0] ss:$16 sps:$4 sm:$0xff]  }
 0x254   :  { %2186 = vmatprep.subr.bf16.mxu1 %v11096_v6  ;;  %3026 = vmatpush1.bf16.msra.mxu0 %v11139_v13  ;;  %v11198_v6 = vld [vmem:[#allocation6 + $0xa84] ss:$16 sps:$4 sm:$0xff]   ;;  %v11220_v13 = vld [vmem:[#allocation6 + $0xa00] ss:$16 sps:$4 sm:$0xff]  }
 0x255   :  { %3027 = vmatprep.subr.bf16.mxu0 %v11144_v17  ;;  %v11226_v17 = vld [vmem:[#allocation6 + $0xbe0] ss:$16 sps:$4 sm:$0xff]  }
 0x257   :  { %2187 = vmatpush1.bf16.msra.mxu1 %v11094_v8  ;;  %v11204_v8 = vld [vmem:[#allocation6 + $0xa64] ss:$16 sps:$4 sm:$0xff]  }
 0x258   :  { %2188 = vmatprep.subr.bf16.mxu1 %v11099_v10  ;;  %3028 = vmatpush1.bf16.msra.mxu0 %v11142_v19  ;;  %v11210_v10 = vld [vmem:[#allocation6 + $0xa44] ss:$16 sps:$4 sm:$0xff]   ;;  %v11232_v19 = vld [vmem:[#allocation6 + $0xbc0] ss:$16 sps:$4 sm:$0xff]  }
 0x259   :  { %3029 = vmatprep.subr.bf16.mxu0 %v11147_v22  ;;  %v11238_v22 = vld [vmem:[#allocation6 + $0xba0] ss:$16 sps:$4 sm:$0xff]  }
 0x25b   :  { %2189 = vmatpush1.bf16.msra.mxu1 %v11097_v12  ;;  %v11216_v12 = vld [vmem:[#allocation6 + $0xa24] ss:$16 sps:$4 sm:$0xff]  }
 0x25c   :  { %2190 = vmatprep.subr.bf16.mxu1 %v11102_v14  ;;  %3030 = vmatpush1.bf16.msra.mxu0 %v11145_v25  ;;  %v11222_v14 = vld [vmem:[#allocation6 + $0xa04] ss:$16 sps:$4 sm:$0xff]   ;;  %v11244_v25 = vld [vmem:[#allocation6 + $0xb80] ss:$16 sps:$4 sm:$0xff]  }
 0x25d   :  { %3031 = vmatprep.subr.bf16.mxu0 %v11150_v27  ;;  %v11250_v27 = vld [vmem:[#allocation6 + $0xb60] ss:$16 sps:$4 sm:$0xff]  }
 0x25f   :  { %2191 = vmatpush1.bf16.msra.mxu1 %v11100_v18  ;;  %v11228_v18 = vld [vmem:[#allocation6 + $0xbe4] ss:$16 sps:$4 sm:$0xff]  }
 0x260   :  { %2192 = vmatprep.subr.bf16.mxu1 %v11105_v20  ;;  %3032 = vmatpush1.bf16.msra.mxu0 %v11148_v29  ;;  %v11234_v20 = vld [vmem:[#allocation6 + $0xbc4] ss:$16 sps:$4 sm:$0xff]   ;;  %v11256_v29 = vld [vmem:[#allocation6 + $0xb40] ss:$16 sps:$4 sm:$0xff]  }
 0x261   :  { %3033 = vmatprep.subr.bf16.mxu0 %v11153_v31  ;;  %v11264_v31 = vld [vmem:[#allocation6 + $0xb24] ss:$16 sps:$4 sm:$0xff]  }
 0x263   :  { %2193 = vmatpush1.bf16.msra.mxu1 %v11103_v23  ;;  %v11240_v23 = vld [vmem:[#allocation6 + $0xba4] ss:$16 sps:$4 sm:$0xff]  }
 0x264   :  { %2194 = vmatprep.subr.bf16.mxu1 %v11108_v26  ;;  %3034 = vmatpush1.bf16.msra.mxu0 %v11151_v33  ;;  %v11246_v26 = vld [vmem:[#allocation6 + $0xb84] ss:$16 sps:$4 sm:$0xff]   ;;  %v11262_v33 = vld [vmem:[#allocation6 + $0xb20] ss:$16 sps:$4 sm:$0xff]  }
 0x265   :  { %3035 = vmatprep.subr.bf16.mxu0 %v11156_v36  ;;  %v11270_v36 = vld [vmem:[#allocation6 + $0xb04] ss:$16 sps:$4 sm:$0xff]  }
 0x267   :  { %2195 = vmatpush2.bf16.msra.mxu1 %v11106_v28  ;;  %v11252_v28 = vld [vmem:[#allocation6 + $0xb64] ss:$16 sps:$4 sm:$0xff]  }
 0x268   :  { %2196 = vmatprep.subr.bf16.mxu1 %v11111_v30  ;;  %3036 = vmatpush2.bf16.msra.mxu0 %v11154_v38  ;;  %v11258_v30 = vld [vmem:[#allocation6 + $0xb44] ss:$16 sps:$4 sm:$0xff]   ;;  %v11268_v38 = vld [vmem:[#allocation6 + $0xb00] ss:$16 sps:$4 sm:$0xff]  }
 0x269   :  { %3037 = vmatprep.subr.bf16.mxu0 %v11159_v40  ;;  %v11276_v40 = vld [vmem:[#allocation6 + $0xaec] ss:$16 sps:$4 sm:$0xff]  }
 0x26b   :  { %2197 = vmatpush2.bf16.msra.mxu1 %v11109_v32 }
 0x26c   :  { %2198 = vmatprep.subr.bf16.mxu1 %v11114_v35  ;;  %3038 = vmatpush2.bf16.msra.mxu0 %v11157_v42 }
 0x26d   :  { %3039 = vmatprep.subr.bf16.mxu0 %v11162_v44 }
 0x26f   :  { %2199 = vmatpush2.bf16.msra.mxu1 %v11112_v37 }
 0x270   :  { %2200 = vmatprep.subr.bf16.mxu1 %v11117_v39  ;;  %3040 = vmatpush2.bf16.msra.mxu0 %v11160_v46 }
 0x271   :  { %3041 = vmatprep.subr.bf16.mxu0 %v11165_v48 }
 0x273   :  { %2201 = vmatpush2.bf16.msra.mxu1 %v11115_v41  ;;  %v12827_v41 = vld [vmem:[#allocation7 + $0x4] sm:$0xf] }
 0x274   :  { %2202 = vmatprep.subr.bf16.mxu1 %v11120_v43  ;;  %3042 = vmatpush2.bf16.msra.mxu0 %v11163_v51  ;;  %v1398_v42 = vrot.slane %v12827_v41, %v12789_v15  ;;  %v1402_v43 = vrot.slane %v12827_v41, %v12791_v16 }
 0x275   :  { %3043 = vmatprep.subr.bf16.mxu0 %v11168_v54 }
 0x277   :  { %2203 = vmatpush2.bf16.msra.mxu1 %v11118_v45 }
 0x278   :  { %2204 = vmatprep.subr.bf16.mxu1 %v11123_v47  ;;  %3044 = vmatpush2.bf16.msra.mxu0 %v11166_v56 }
 0x279   :  { %3045 = vmatprep.subr.bf16.mxu0 %v11171_v57 }
 0x27b   :  { %2205 = vmatpush2.bf16.msra.mxu1 %v11121_v49 }
 0x27c   :  { %2206 = vmatprep.subr.bf16.mxu1 %v11126_v52  ;;  %3046 = vmatpush2.bf16.msra.mxu0 %v11169_v59 }
 0x27d   :  { %3047 = vmatprep.subr.bf16.mxu0 %v11174_v53  ;;  %v11181_v53 = vld [vmem:[#allocation6 + $0x8e8] ss:$16 sps:$4 sm:$0xff]  }
 0x27f   :  { %2207 = vmatpush2.bf16.msra.mxu1 %v11124_v55 }
 0x280   :  { %2208 = vmatprep.subr.bf16.mxu1 %v11129_v34  ;;  %3048 = vmatpush2.bf16.msra.mxu0 %v11172_v60 }
 0x281   :  { %3049 = vmatprep.subr.bf16.mxu0 %v11177_v62  ;;  %v11189_v62 = vld [vmem:[#allocation6 + $0x8cc] ss:$16 sps:$4 sm:$0xff]  }
 0x283   :  { %2209 = vmatpush2.bf16.msra.mxu1 %v11127_v58 }
 0x284   :  { %3050 = vmatpush2.bf16.msra.mxu0 %v11175_v63  ;;  %3060 = vmatprep.subr.bf16.mxu1 %v11180_v0  ;;  %v11187_v63 = vld [vmem:[#allocation6 + $0x8c8] ss:$16 sps:$4 sm:$0xff]  }
 0x285   :  { %3101 = vmatprep.subr.bf16.mxu0 %v11183_v1  ;;  %v11193_v0 = vld [vmem:[#allocation6 + $0x8a8] ss:$16 sps:$4 sm:$0xff]   ;;  %v11201_v1 = vld [vmem:[#allocation6 + $0x88c] ss:$16 sps:$4 sm:$0xff]  }
 0x286   :  { %2211 = vmatmul.mubr.bf16.vlgmr.msra.gmra.mxu1 %v12822_v61  ;;  %v11192_v61 = vld [vmem:[#allocation6 + $0xaa4] ss:$16 sps:$4 sm:$0xff]  }
 0x287   :  { %3061 = vmatpush1.bf16.msra.mxu1 %v11178_v50  ;;  %v11195_v50 = vld [vmem:[#allocation6 + $0x8ac] ss:$16 sps:$4 sm:$0xff]  }
 0x288   :  { %3062 = vmatprep.subr.bf16.mxu1 %v11186_v3  ;;  %v11207_v3 = vld [vmem:[#allocation6 + $0x86c] ss:$16 sps:$4 sm:$0xff]  }
 0x28b   :  { %3063 = vmatpush1.bf16.msra.mxu1 %v11184_v2  ;;  %v11199_v2 = vld [vmem:[#allocation6 + $0x888] ss:$16 sps:$4 sm:$0xff]  }
 0x28c   :  { %3064 = vmatprep.subr.bf16.mxu1 %v11192_v61  ;;  %v11213_v61 = vld [vmem:[#allocation6 + $0x84c] ss:$16 sps:$4 sm:$0xff]  }
 0x28f   :  { %3065 = vmatpush1.bf16.msra.mxu1 %v11190_v4  ;;  %v11205_v4 = vld [vmem:[#allocation6 + $0x868] ss:$16 sps:$4 sm:$0xff]  }
 0x290   :  { %3066 = vmatprep.subr.bf16.mxu1 %v11198_v6  ;;  %v11219_v6 = vld [vmem:[#allocation6 + $0x82c] ss:$16 sps:$4 sm:$0xff]  }
 0x293   :  { %3067 = vmatpush1.bf16.msra.mxu1 %v11196_v5  ;;  %v11211_v5 = vld [vmem:[#allocation6 + $0x848] ss:$16 sps:$4 sm:$0xff]  }
 0x294   :  { %3068 = vmatprep.subr.bf16.mxu1 %v11204_v8  ;;  %v11225_v8 = vld [vmem:[#allocation6 + $0x80c] ss:$16 sps:$4 sm:$0xff]  }
 0x297   :  { %3069 = vmatpush1.bf16.msra.mxu1 %v11202_v7  ;;  %v11217_v7 = vld [vmem:[#allocation6 + $0x828] ss:$16 sps:$4 sm:$0xff]  }
 0x298   :  { %3070 = vmatprep.subr.bf16.mxu1 %v11210_v10  ;;  %v11231_v10 = vld [vmem:[#allocation6 + $0x9ec] ss:$16 sps:$4 sm:$0xff]  }
 0x29b   :  { %3071 = vmatpush1.bf16.msra.mxu1 %v11208_v9  ;;  %v11223_v9 = vld [vmem:[#allocation6 + $0x808] ss:$16 sps:$4 sm:$0xff]  }
 0x29c   :  { %3072 = vmatprep.subr.bf16.mxu1 %v11216_v12  ;;  %v11237_v12 = vld [vmem:[#allocation6 + $0x9cc] ss:$16 sps:$4 sm:$0xff]  }
 0x29f   :  { %3073 = vmatpush1.bf16.msra.mxu1 %v11214_v11  ;;  %v11229_v11 = vld [vmem:[#allocation6 + $0x9e8] ss:$16 sps:$4 sm:$0xff]  }
 0x2a0   :  { %3074 = vmatprep.subr.bf16.mxu1 %v11222_v14  ;;  %v11243_v14 = vld [vmem:[#allocation6 + $0x9ac] ss:$16 sps:$4 sm:$0xff]  }
 0x2a3   :  { %3075 = vmatpush1.bf16.msra.mxu1 %v11220_v13  ;;  %v11235_v13 = vld [vmem:[#allocation6 + $0x9c8] ss:$16 sps:$4 sm:$0xff]  }
 0x2a4   :  { %3076 = vmatprep.subr.bf16.mxu1 %v11228_v18  ;;  %v11249_v18 = vld [vmem:[#allocation6 + $0x98c] ss:$16 sps:$4 sm:$0xff]  }
 0x2a7   :  { %3077 = vmatpush2.bf16.msra.mxu1 %v11226_v17  ;;  %v11241_v17 = vld [vmem:[#allocation6 + $0x9a8] ss:$16 sps:$4 sm:$0xff]  }
 0x2a8   :  { %3078 = vmatprep.subr.bf16.mxu1 %v11234_v20  ;;  %v11255_v20 = vld [vmem:[#allocation6 + $0x96c] ss:$16 sps:$4 sm:$0xff]  }
 0x2ab   :  { %3079 = vmatpush2.bf16.msra.mxu1 %v11232_v19  ;;  %v11247_v19 = vld [vmem:[#allocation6 + $0x988] ss:$16 sps:$4 sm:$0xff]  }
 0x2ac   :  { %3080 = vmatprep.subr.bf16.mxu1 %v11240_v23  ;;  %v11261_v23 = vld [vmem:[#allocation6 + $0x94c] ss:$16 sps:$4 sm:$0xff]  }
 0x2af   :  { %3081 = vmatpush2.bf16.msra.mxu1 %v11238_v22  ;;  %v11253_v22 = vld [vmem:[#allocation6 + $0x968] ss:$16 sps:$4 sm:$0xff]  }
 0x2b0   :  { %3082 = vmatprep.subr.bf16.mxu1 %v11246_v26  ;;  %v11259_v26 = vld [vmem:[#allocation6 + $0x948] ss:$16 sps:$4 sm:$0xff]  }
 0x2b3   :  { %3083 = vmatpush2.bf16.msra.mxu1 %v11244_v25  ;;  %v1406_v25 = vrot.slane %v12827_v41, %v12795_v21 }
 0x2b4   :  { %3084 = vmatprep.subr.bf16.mxu1 %v11252_v28  ;;  %v1410_v28 = vrot.slane %v12827_v41, %v12797_v24 }
 0x2b7   :  { %3085 = vmatpush2.bf16.msra.mxu1 %v11250_v27  ;;  %v11267_v27 = vld [vmem:[#allocation6 + $0x92c] ss:$16 sps:$4 sm:$0xff]  }
 0x2b8   :  { %3086 = vmatprep.subr.bf16.mxu1 %v11258_v30  ;;  %v11265_v30 = vld [vmem:[#allocation6 + $0x928] ss:$16 sps:$4 sm:$0xff]  }
 0x2bb   :  { %3087 = vmatpush2.bf16.msra.mxu1 %v11256_v29 }
 0x2bc   :  { %3088 = vmatprep.subr.bf16.mxu1 %v11264_v31 }
 0x2bf   :  { %3089 = vmatpush2.bf16.msra.mxu1 %v11262_v33 }
 0x2c0   :  { %3090 = vmatprep.subr.bf16.mxu1 %v11270_v36 }
 0x2c3   :  { %3091 = vmatpush2.bf16.msra.mxu1 %v11268_v38  ;;  %v11271_v38 = vld [vmem:[#allocation6 + $0x908] ss:$16 sps:$4 sm:$0xff]  }
 0x2c4   :  { %3142 = vmatprep.subr.bf16.mxu1 %v11276_v40 }
 0x2c6   :  { %v2089_v32 = vpop.f32.mrf.mxu0 }
 0x2c7   :  { %v2090_v44 = vadd.f32 %v2089_v32, %v1398_v42  ;;  %v11273_v32 = vld [vmem:[#allocation6 + $0x90c] ss:$16 sps:$4 sm:$0xff]  }
 0x2c8   :  { %v2091_v35 = vpop.f32.mrf.mxu0 }
 0x2c9   :  { %v2092_v47 = vadd.f32 %v2091_v35, %v1402_v43 }
 0x2ca   :  { %v2093_v37 = vpop.f32.mrf.mxu0 }
 0x2cc   :  { %v2094_v39 = vpop.f32.mrf.mxu0 }
 0x306   :  { %v2130_v45 = vpop.f32.mrf.mxu1  ;;  %v12833_v46 = vpop.f32.mrf.mxu0 }
 0x307   :  { %v2131_v48 = vadd.f32 %v2130_v45, %v2090_v44  ;;  %v2172_v29 = vadd.f32 %v12833_v46, %v1406_v25  ;;  %v11274_v44 = vld [vmem:[#allocation6 + $0xae8] ss:$16 sps:$4 sm:$0xff]   ;;  %v11279_v46 = vld [vmem:[#allocation6 + $0xacc] ss:$16 sps:$4 sm:$0xff]  }
 0x308   :  { %v2132_v49 = vpop.f32.mrf.mxu1  ;;  %v12835_v51 = vpop.f32.mrf.mxu0  ;;  %v11307_v25 = vld [vmem:[#allocation6 + $0xb88] ss:$16 sps:$4 sm:$0xff]  }
 0x309   :  { %v2133_v52 = vadd.f32 %v2132_v49, %v2092_v47  ;;  %v2219_v54 = vmax.f32 %v2131_v48, 0.0  ;;  %v2174_v33 = vadd.f32 %v12835_v51, %v1410_v28  ;;  %v11277_v47 = vld [vmem:[#allocation6 + $0xac8] ss:$16 sps:$4 sm:$0xff]   ;;  %v11282_v48 = vld [vmem:[#allocation6 + $0xaac] ss:$16 sps:$4 sm:$0xff]  }
 0x30a   :  { %v2134_v55 = vpop.f32.mrf.mxu1  ;;  %v2175_v56 = vpop.f32.mrf.mxu0  ;;  %v11280_v49 = vld [vmem:[#allocation6 + $0xaa8] ss:$16 sps:$4 sm:$0xff]   ;;  %v11285_v51 = vld [vmem:[#allocation6 + $0xa8c] ss:$16 sps:$4 sm:$0xff]   ;;  %v11354_v28 = vld [vmem:[#allocation6 + $0xda4] ss:$16 sps:$4 sm:$0xff]  }
 0x30b   :  { %v2220_v34 = vmax.f32 %v2133_v52, 0.0  ;;  %v12837_v60 = vpack.c.bf16 %v2219_v54, %v2219_v54  ;;  %v11322_v52 = vld [vmem:[#allocation6 + $0xce0] ss:$16 sps:$4 sm:$0xff]   ;;  %v11324_v54 = vld [vmem:[#allocation6 + $0xce4] ss:$16 sps:$4 sm:$0xff]  }
 0x30c   :  { %v2135_v57 = vpop.f32.mrf.mxu1  ;;  %v2176_v58 = vpop.f32.mrf.mxu0  ;;  %v11327_v55 = vld [vmem:[#allocation6 + $0xcc4] ss:$16 sps:$4 sm:$0xff]   ;;  %v11283_v56 = vld [vmem:[#allocation6 + $0xa88] ss:$16 sps:$4 sm:$0xff]  }
 0x30d   :  { %v2224_v59 = vpack.c.bf16 %v2220_v34, %v2220_v34  ;;  %v11325_v34 = vld [vmem:[#allocation6 + $0xcc0] ss:$16 sps:$4 sm:$0xff]   ;;  %v11288_v57 = vld [vmem:[#allocation6 + $0xa6c] ss:$16 sps:$4 sm:$0xff]   ;;  %v11330_v58 = vld [vmem:[#allocation6 + $0xca4] ss:$16 sps:$4 sm:$0xff]  }
 0x30f   :  { %3051 = vmatprep.mubr.bf16.mxu0 %v2224_v59 }
 0x310   :  { %3052 = vmatmul.mubr.bf16.vlgmr.msra.gmra.mxu0 %v12837_v60 }
 0x311   :  { %3102 = vmatpush1.bf16.msra.mxu0 %v11181_v53  ;;  %3133 = vmatprep.mubr.bf16.mxu0 %v2224_v59  ;;  %v11286_v59 = vld [vmem:[#allocation6 + $0xa68] ss:$16 sps:$4 sm:$0xff]   ;;  %v11328_v53 = vld [vmem:[#allocation6 + $0xca0] ss:$16 sps:$4 sm:$0xff]  }
 0x312   :  { %3103 = vmatprep.subr.bf16.mxu0 %v11189_v62  ;;  %v11333_v62 = vld [vmem:[#allocation6 + $0xc84] ss:$16 sps:$4 sm:$0xff]  }
 0x315   :  { %3104 = vmatpush1.bf16.msra.mxu0 %v11187_v63  ;;  %v11289_v63 = vld [vmem:[#allocation6 + $0xa48] ss:$16 sps:$4 sm:$0xff]  }
 0x316   :  { %3105 = vmatprep.subr.bf16.mxu0 %v11195_v50  ;;  %v11331_v50 = vld [vmem:[#allocation6 + $0xc80] ss:$16 sps:$4 sm:$0xff]  }
 0x319   :  { %3106 = vmatpush1.bf16.msra.mxu0 %v11193_v0  ;;  %v11294_v0 = vld [vmem:[#allocation6 + $0xa2c] ss:$16 sps:$4 sm:$0xff]  }
 0x31a   :  { %3107 = vmatprep.subr.bf16.mxu0 %v11201_v1  ;;  %v11336_v1 = vld [vmem:[#allocation6 + $0xc64] ss:$16 sps:$4 sm:$0xff]  }
 0x31d   :  { %3108 = vmatpush1.bf16.msra.mxu0 %v11199_v2  ;;  %v11292_v2 = vld [vmem:[#allocation6 + $0xa28] ss:$16 sps:$4 sm:$0xff]  }
 0x31e   :  { %3109 = vmatprep.subr.bf16.mxu0 %v11207_v3  ;;  %v11334_v3 = vld [vmem:[#allocation6 + $0xc60] ss:$16 sps:$4 sm:$0xff]  }
 0x321   :  { %3110 = vmatpush1.bf16.msra.mxu0 %v11205_v4  ;;  %v11297_v4 = vld [vmem:[#allocation6 + $0xa0c] ss:$16 sps:$4 sm:$0xff]  }
 0x322   :  { %3111 = vmatprep.subr.bf16.mxu0 %v11213_v61  ;;  %v11339_v61 = vld [vmem:[#allocation6 + $0xc44] ss:$16 sps:$4 sm:$0xff]  }
 0x325   :  { %3112 = vmatpush1.bf16.msra.mxu0 %v11211_v5  ;;  %v11295_v5 = vld [vmem:[#allocation6 + $0xa08] ss:$16 sps:$4 sm:$0xff]  }
 0x326   :  { %3113 = vmatprep.subr.bf16.mxu0 %v11219_v6  ;;  %v11337_v6 = vld [vmem:[#allocation6 + $0xc40] ss:$16 sps:$4 sm:$0xff]  }
 0x329   :  { %3114 = vmatpush1.bf16.msra.mxu0 %v11217_v7  ;;  %v11300_v7 = vld [vmem:[#allocation6 + $0xbec] ss:$16 sps:$4 sm:$0xff]  }
 0x32a   :  { %3115 = vmatprep.subr.bf16.mxu0 %v11225_v8  ;;  %v11342_v8 = vld [vmem:[#allocation6 + $0xc24] ss:$16 sps:$4 sm:$0xff]  }
 0x32d   :  { %3116 = vmatpush1.bf16.msra.mxu0 %v11223_v9  ;;  %v11298_v9 = vld [vmem:[#allocation6 + $0xbe8] ss:$16 sps:$4 sm:$0xff]  }
 0x32e   :  { %3117 = vmatprep.subr.bf16.mxu0 %v11231_v10  ;;  %v11340_v10 = vld [vmem:[#allocation6 + $0xc20] ss:$16 sps:$4 sm:$0xff]  }
 0x331   :  { %3118 = vmatpush2.bf16.msra.mxu0 %v11229_v11  ;;  %v11303_v11 = vld [vmem:[#allocation6 + $0xbcc] ss:$16 sps:$4 sm:$0xff]  }
 0x332   :  { %3119 = vmatprep.subr.bf16.mxu0 %v11237_v12  ;;  %v11345_v12 = vld [vmem:[#allocation6 + $0xc04] ss:$16 sps:$4 sm:$0xff]  }
 0x335   :  { %3120 = vmatpush2.bf16.msra.mxu0 %v11235_v13  ;;  %v11301_v13 = vld [vmem:[#allocation6 + $0xbc8] ss:$16 sps:$4 sm:$0xff]  }
 0x336   :  { %3121 = vmatprep.subr.bf16.mxu0 %v11243_v14  ;;  %v11343_v14 = vld [vmem:[#allocation6 + $0xc00] ss:$16 sps:$4 sm:$0xff]  }
 0x339   :  { %3122 = vmatpush2.bf16.msra.mxu0 %v11241_v17  ;;  %v11306_v17 = vld [vmem:[#allocation6 + $0xbac] ss:$16 sps:$4 sm:$0xff]  }
 0x33a   :  { %3123 = vmatprep.subr.bf16.mxu0 %v11249_v18  ;;  %v11348_v18 = vld [vmem:[#allocation6 + $0xde4] ss:$16 sps:$4 sm:$0xff]  }
 0x33d   :  { %3124 = vmatpush2.bf16.msra.mxu0 %v11247_v19  ;;  %v11304_v19 = vld [vmem:[#allocation6 + $0xba8] ss:$16 sps:$4 sm:$0xff]  }
 0x33e   :  { %3125 = vmatprep.subr.bf16.mxu0 %v11255_v20  ;;  %v11346_v20 = vld [vmem:[#allocation6 + $0xde0] ss:$16 sps:$4 sm:$0xff]  }
 0x341   :  { %3126 = vmatpush2.bf16.msra.mxu0 %v11253_v22  ;;  %v11309_v22 = vld [vmem:[#allocation6 + $0xb8c] ss:$16 sps:$4 sm:$0xff]  }
 0x342   :  { %3127 = vmatprep.subr.bf16.mxu0 %v11261_v23  ;;  %v11351_v23 = vld [vmem:[#allocation6 + $0xdc4] ss:$16 sps:$4 sm:$0xff]  }
 0x345   :  { %3128 = vmatpush2.bf16.msra.mxu0 %v11259_v26  ;;  %v11349_v26 = vld [vmem:[#allocation6 + $0xdc0] ss:$16 sps:$4 sm:$0xff]  }
 0x346   :  { %v2212_v31 = vpop.f32.mrf.mxu1  ;;  %3129 = vmatprep.subr.bf16.mxu0 %v11267_v27  ;;  %v11312_v27 = vld [vmem:[#allocation6 + $0xb6c] ss:$16 sps:$4 sm:$0xff]  }
 0x347   :  { %v2213_v35 = vadd.f32 %v2212_v31, %v2172_v29  ;;  %v11310_v29 = vld [vmem:[#allocation6 + $0xb68] ss:$16 sps:$4 sm:$0xff]   ;;  %v11315_v31 = vld [vmem:[#allocation6 + $0xb4c] ss:$16 sps:$4 sm:$0xff]  }
 0x348   :  { %v2214_v36 = vpop.f32.mrf.mxu1 }
 0x349   :  { %v2215_v37 = vadd.f32 %v2214_v36, %v2174_v33  ;;  %3130 = vmatpush2.bf16.msra.mxu0 %v11265_v30  ;;  %v2221_v39 = vmax.f32 %v2213_v35, 0.0  ;;  %v11352_v30 = vld [vmem:[#allocation6 + $0xda0] ss:$16 sps:$4 sm:$0xff]   ;;  %v11313_v33 = vld [vmem:[#allocation6 + $0xb48] ss:$16 sps:$4 sm:$0xff]  }
 0x34a   :  { %v2216_v40 = vpop.f32.mrf.mxu1  ;;  %3131 = vmatprep.subr.bf16.mxu0 %v11273_v32  ;;  %v11357_v32 = vld [vmem:[#allocation6 + $0xd84] ss:$16 sps:$4 sm:$0xff]   ;;  %v11355_v35 = vld [vmem:[#allocation6 + $0xd80] ss:$16 sps:$4 sm:$0xff]   ;;  %v11318_v36 = vld [vmem:[#allocation6 + $0xb2c] ss:$16 sps:$4 sm:$0xff]  }
 0x34b   :  { %v2222_v42 = vmax.f32 %v2215_v37, 0.0  ;;  %v12846_v45 = vpack.c.bf16 %v2221_v39, %v2221_v39  ;;  %v11360_v37 = vld [vmem:[#allocation6 + $0xd64] ss:$16 sps:$4 sm:$0xff]   ;;  %v11358_v39 = vld [vmem:[#allocation6 + $0xd60] ss:$16 sps:$4 sm:$0xff]  }
 0x34c   :  { %v2217_v43 = vpop.f32.mrf.mxu1  ;;  %v11321_v40 = vld [vmem:[#allocation6 + $0xb0c] ss:$16 sps:$4 sm:$0xff]  }
 0x34d   :  { %v2226_v41 = vpack.c.bf16 %v2222_v42, %v2222_v42  ;;  %3132 = vmatpush2.bf16.msra.mxu0 %v11271_v38  ;;  %v11316_v38 = vld [vmem:[#allocation6 + $0xb28] ss:$16 sps:$4 sm:$0xff]   ;;  %v11363_v42 = vld [vmem:[#allocation6 + $0xd44] ss:$16 sps:$4 sm:$0xff]  }
 0x34e   :  { %3983 = vmatprep.subr.bf16.mxu0 %v11324_v54  ;;  %v11319_v43 = vld [vmem:[#allocation6 + $0xb08] ss:$16 sps:$4 sm:$0xff]   ;;  %v11376_v54 = vld [vmem:[#allocation6 + $0xec0] ss:$16 sps:$4 sm:$0xff]  }
 0x34f   :  { %3092 = vmatprep.mubr.bf16.mxu1 %v2226_v41 }
 0x350   :  { %3093 = vmatmul.mubr.bf16.vlgmr.msra.gmra.mxu1 %v12846_v45  ;;  %3134 = vmatmul.mubr.bf16.vlgmr.msra.gmra.mxu0 %v12837_v60  ;;  %v11291_v60 = vld [vmem:[#allocation6 + $0xa4c] ss:$16 sps:$4 sm:$0xff]  }
 0x351   :  { %3143 = vmatpush1.bf16.msra.mxu1 %v11274_v44  ;;  %3174 = vmatprep.mubr.bf16.mxu1 %v2226_v41  ;;  %v11361_v41 = vld [vmem:[#allocation6 + $0xd40] ss:$16 sps:$4 sm:$0xff]   ;;  %v11366_v44 = vld [vmem:[#allocation6 + $0xd24] ss:$16 sps:$4 sm:$0xff]  }
 0x352   :  { %3144 = vmatprep.subr.bf16.mxu1 %v11279_v46  ;;  %3984 = vmatpush1.bf16.msra.mxu0 %v11322_v52  ;;  %v11364_v46 = vld [vmem:[#allocation6 + $0xd20] ss:$16 sps:$4 sm:$0xff]   ;;  %v11375_v52 = vld [vmem:[#allocation6 + $0xcec] ss:$16 sps:$4 sm:$0xff]  }
 0x353   :  { %3985 = vmatprep.subr.bf16.mxu0 %v11327_v55  ;;  %v11378_v55 = vld [vmem:[#allocation6 + $0xec4] ss:$16 sps:$4 sm:$0xff]  }
 0x355   :  { %3145 = vmatpush1.bf16.msra.mxu1 %v11277_v47  ;;  %v11369_v47 = vld [vmem:[#allocation6 + $0xd04] ss:$16 sps:$4 sm:$0xff]  }
 0x356   :  { %3146 = vmatprep.subr.bf16.mxu1 %v11282_v48  ;;  %3986 = vmatpush1.bf16.msra.mxu0 %v11325_v34  ;;  %v11367_v48 = vld [vmem:[#allocation6 + $0xd00] ss:$16 sps:$4 sm:$0xff]  }
 0x357   :  { %3987 = vmatprep.subr.bf16.mxu0 %v11330_v58  ;;  %v11388_v34 = vld [vmem:[#allocation6 + $0xe80] ss:$16 sps:$4 sm:$0xff]  }
 0x358   :  { %v11394_v58 = vld [vmem:[#allocation6 + $0xe60] ss:$16 sps:$4 sm:$0xff]  }
 0x359   :  { %3147 = vmatpush1.bf16.msra.mxu1 %v11280_v49  ;;  %v11370_v49 = vld [vmem:[#allocation6 + $0xee0] ss:$16 sps:$4 sm:$0xff]  }
 0x35a   :  { %3148 = vmatprep.subr.bf16.mxu1 %v11285_v51  ;;  %3988 = vmatpush1.bf16.msra.mxu0 %v11328_v53  ;;  %v11372_v51 = vld [vmem:[#allocation6 + $0xee4] ss:$16 sps:$4 sm:$0xff]   ;;  %v11400_v53 = vld [vmem:[#allocation6 + $0xe40] ss:$16 sps:$4 sm:$0xff]  }
 0x35b   :  { %3989 = vmatprep.subr.bf16.mxu0 %v11333_v62  ;;  %v11406_v62 = vld [vmem:[#allocation6 + $0xe20] ss:$16 sps:$4 sm:$0xff]  }
 0x35d   :  { %3149 = vmatpush1.bf16.msra.mxu1 %v11283_v56  ;;  %v11382_v56 = vld [vmem:[#allocation6 + $0xea0] ss:$16 sps:$4 sm:$0xff]  }
 0x35e   :  { %3150 = vmatprep.subr.bf16.mxu1 %v11288_v57  ;;  %3990 = vmatpush1.bf16.msra.mxu0 %v11331_v50  ;;  %v11390_v57 = vld [vmem:[#allocation6 + $0xe84] ss:$16 sps:$4 sm:$0xff]   ;;  %v11412_v50 = vld [vmem:[#allocation6 + $0xe00] ss:$16 sps:$4 sm:$0xff]  }
 0x35f   :  { %3991 = vmatprep.subr.bf16.mxu0 %v11336_v1  ;;  %v11418_v1 = vld [vmem:[#allocation6 + $0xfe0] ss:$16 sps:$4 sm:$0xff]  }
 0x361   :  { %3151 = vmatpush1.bf16.msra.mxu1 %v11286_v59  ;;  %v11396_v59 = vld [vmem:[#allocation6 + $0xe64] ss:$16 sps:$4 sm:$0xff]  }
 0x362   :  { %3152 = vmatprep.subr.bf16.mxu1 %v11291_v60  ;;  %3992 = vmatpush1.bf16.msra.mxu0 %v11334_v3  ;;  %v11402_v60 = vld [vmem:[#allocation6 + $0xe44] ss:$16 sps:$4 sm:$0xff]   ;;  %v11424_v3 = vld [vmem:[#allocation6 + $0xfc0] ss:$16 sps:$4 sm:$0xff]  }
 0x363   :  { %3993 = vmatprep.subr.bf16.mxu0 %v11339_v61  ;;  %v11430_v61 = vld [vmem:[#allocation6 + $0xfa0] ss:$16 sps:$4 sm:$0xff]  }
 0x365   :  { %3153 = vmatpush1.bf16.msra.mxu1 %v11289_v63  ;;  %v11408_v63 = vld [vmem:[#allocation6 + $0xe24] ss:$16 sps:$4 sm:$0xff]  }
 0x366   :  { %3154 = vmatprep.subr.bf16.mxu1 %v11294_v0  ;;  %3994 = vmatpush1.bf16.msra.mxu0 %v11337_v6  ;;  %v11414_v0 = vld [vmem:[#allocation6 + $0xe04] ss:$16 sps:$4 sm:$0xff]   ;;  %v11436_v6 = vld [vmem:[#allocation6 + $0xf80] ss:$16 sps:$4 sm:$0xff]  }
 0x367   :  { %3995 = vmatprep.subr.bf16.mxu0 %v11342_v8  ;;  %v11442_v8 = vld [vmem:[#allocation6 + $0xf60] ss:$16 sps:$4 sm:$0xff]  }
 0x369   :  { %3155 = vmatpush1.bf16.msra.mxu1 %v11292_v2  ;;  %v11420_v2 = vld [vmem:[#allocation6 + $0xfe4] ss:$16 sps:$4 sm:$0xff]  }
 0x36a   :  { %3156 = vmatprep.subr.bf16.mxu1 %v11297_v4  ;;  %3996 = vmatpush1.bf16.msra.mxu0 %v11340_v10  ;;  %v11426_v4 = vld [vmem:[#allocation6 + $0xfc4] ss:$16 sps:$4 sm:$0xff]   ;;  %v11448_v10 = vld [vmem:[#allocation6 + $0xf40] ss:$16 sps:$4 sm:$0xff]  }
 0x36b   :  { %3997 = vmatprep.subr.bf16.mxu0 %v11345_v12  ;;  %v11456_v12 = vld [vmem:[#allocation6 + $0xf24] ss:$16 sps:$4 sm:$0xff]  }
 0x36d   :  { %3157 = vmatpush1.bf16.msra.mxu1 %v11295_v5  ;;  %v11432_v5 = vld [vmem:[#allocation6 + $0xfa4] ss:$16 sps:$4 sm:$0xff]  }
 0x36e   :  { %3158 = vmatprep.subr.bf16.mxu1 %v11300_v7  ;;  %3998 = vmatpush1.bf16.msra.mxu0 %v11343_v14  ;;  %v11438_v7 = vld [vmem:[#allocation6 + $0xf84] ss:$16 sps:$4 sm:$0xff]   ;;  %v11454_v14 = vld [vmem:[#allocation6 + $0xf20] ss:$16 sps:$4 sm:$0xff]  }
 0x36f   :  { %3999 = vmatprep.subr.bf16.mxu0 %v11348_v18  ;;  %v11462_v18 = vld [vmem:[#allocation6 + $0xf04] ss:$16 sps:$4 sm:$0xff]  }
 0x371   :  { %3159 = vmatpush2.bf16.msra.mxu1 %v11298_v9  ;;  %v11444_v9 = vld [vmem:[#allocation6 + $0xf64] ss:$16 sps:$4 sm:$0xff]  }
 0x372   :  { %3160 = vmatprep.subr.bf16.mxu1 %v11303_v11  ;;  %4000 = vmatpush2.bf16.msra.mxu0 %v11346_v20  ;;  %v11450_v11 = vld [vmem:[#allocation6 + $0xf44] ss:$16 sps:$4 sm:$0xff]   ;;  %v11460_v20 = vld [vmem:[#allocation6 + $0xf00] ss:$16 sps:$4 sm:$0xff]  }
 0x373   :  { %4001 = vmatprep.subr.bf16.mxu0 %v11351_v23  ;;  %v11468_v23 = vld [vmem:[#allocation6 + $0xeec] ss:$16 sps:$4 sm:$0xff]  }
 0x375   :  { %3161 = vmatpush2.bf16.msra.mxu1 %v11301_v13 }
 0x376   :  { %3162 = vmatprep.subr.bf16.mxu1 %v11306_v17  ;;  %4002 = vmatpush2.bf16.msra.mxu0 %v11349_v26 }
 0x377   :  { %4003 = vmatprep.subr.bf16.mxu0 %v11354_v28 }
 0x379   :  { %3163 = vmatpush2.bf16.msra.mxu1 %v11304_v19 }
 0x37a   :  { %3164 = vmatprep.subr.bf16.mxu1 %v11309_v22  ;;  %4004 = vmatpush2.bf16.msra.mxu0 %v11352_v30 }
 0x37b   :  { %4005 = vmatprep.subr.bf16.mxu0 %v11357_v32 }
 0x37d   :  { %3165 = vmatpush2.bf16.msra.mxu1 %v11307_v25  ;;  %v12851_v25 = vld [vmem:[#allocation7 + $0x8] sm:$0xf] }
 0x37e   :  { %3166 = vmatprep.subr.bf16.mxu1 %v11312_v27  ;;  %4006 = vmatpush2.bf16.msra.mxu0 %v11355_v35  ;;  %v2362_v26 = vrot.slane %v12851_v25, %v12789_v15  ;;  %v2366_v27 = vrot.slane %v12851_v25, %v12791_v16 }
 0x37f   :  { %4007 = vmatprep.subr.bf16.mxu0 %v11360_v37 }
 0x381   :  { %3167 = vmatpush2.bf16.msra.mxu1 %v11310_v29 }
 0x382   :  { %3168 = vmatprep.subr.bf16.mxu1 %v11315_v31  ;;  %4008 = vmatpush2.bf16.msra.mxu0 %v11358_v39 }
 0x383   :  { %4009 = vmatprep.subr.bf16.mxu0 %v11363_v42 }
 0x385   :  { %3169 = vmatpush2.bf16.msra.mxu1 %v11313_v33 }
 0x386   :  { %3170 = vmatprep.subr.bf16.mxu1 %v11318_v36  ;;  %4010 = vmatpush2.bf16.msra.mxu0 %v11361_v41 }
 0x387   :  { %4011 = vmatprep.subr.bf16.mxu0 %v11366_v44  ;;  %v11373_v44 = vld [vmem:[#allocation6 + $0xce8] ss:$16 sps:$4 sm:$0xff]  }
 0x389   :  { %3171 = vmatpush2.bf16.msra.mxu1 %v11316_v38 }
 0x38a   :  { %3172 = vmatprep.subr.bf16.mxu1 %v11321_v40  ;;  %4012 = vmatpush2.bf16.msra.mxu0 %v11364_v46 }
 0x38b   :  { %4013 = vmatprep.subr.bf16.mxu0 %v11369_v47  ;;  %v11381_v47 = vld [vmem:[#allocation6 + $0xccc] ss:$16 sps:$4 sm:$0xff]  }
 0x38d   :  { %3173 = vmatpush2.bf16.msra.mxu1 %v11319_v43 }
 0x38e   :  { %4014 = vmatpush2.bf16.msra.mxu0 %v11367_v48  ;;  %4024 = vmatprep.subr.bf16.mxu1 %v11372_v51  ;;  %v11379_v48 = vld [vmem:[#allocation6 + $0xcc8] ss:$16 sps:$4 sm:$0xff]  }
 0x38f   :  { %4065 = vmatprep.subr.bf16.mxu0 %v11375_v52  ;;  %v11385_v51 = vld [vmem:[#allocation6 + $0xca8] ss:$16 sps:$4 sm:$0xff]   ;;  %v11393_v52 = vld [vmem:[#allocation6 + $0xc8c] ss:$16 sps:$4 sm:$0xff]  }
 0x390   :  { %3175 = vmatmul.mubr.bf16.vlgmr.msra.gmra.mxu1 %v12846_v45  ;;  %v11384_v45 = vld [vmem:[#allocation6 + $0xea4] ss:$16 sps:$4 sm:$0xff]  }
 0x391   :  { %4025 = vmatpush1.bf16.msra.mxu1 %v11370_v49  ;;  %v11387_v49 = vld [vmem:[#allocation6 + $0xcac] ss:$16 sps:$4 sm:$0xff]  }
 0x392   :  { %4026 = vmatprep.subr.bf16.mxu1 %v11378_v55  ;;  %v11399_v55 = vld [vmem:[#allocation6 + $0xc6c] ss:$16 sps:$4 sm:$0xff]  }
 0x395   :  { %4027 = vmatpush1.bf16.msra.mxu1 %v11376_v54  ;;  %v11391_v54 = vld [vmem:[#allocation6 + $0xc88] ss:$16 sps:$4 sm:$0xff]  }
 0x396   :  { %4028 = vmatprep.subr.bf16.mxu1 %v11384_v45  ;;  %v11405_v45 = vld [vmem:[#allocation6 + $0xc4c] ss:$16 sps:$4 sm:$0xff]  }
 0x399   :  { %4029 = vmatpush1.bf16.msra.mxu1 %v11382_v56  ;;  %v11397_v56 = vld [vmem:[#allocation6 + $0xc68] ss:$16 sps:$4 sm:$0xff]  }
 0x39a   :  { %4030 = vmatprep.subr.bf16.mxu1 %v11390_v57  ;;  %v11411_v57 = vld [vmem:[#allocation6 + $0xc2c] ss:$16 sps:$4 sm:$0xff]  }
 0x39d   :  { %4031 = vmatpush1.bf16.msra.mxu1 %v11388_v34  ;;  %v11403_v34 = vld [vmem:[#allocation6 + $0xc48] ss:$16 sps:$4 sm:$0xff]  }
 0x39e   :  { %4032 = vmatprep.subr.bf16.mxu1 %v11396_v59  ;;  %v11417_v59 = vld [vmem:[#allocation6 + $0xc0c] ss:$16 sps:$4 sm:$0xff]  }
 0x3a1   :  { %4033 = vmatpush1.bf16.msra.mxu1 %v11394_v58  ;;  %v11409_v58 = vld [vmem:[#allocation6 + $0xc28] ss:$16 sps:$4 sm:$0xff]  }
 0x3a2   :  { %4034 = vmatprep.subr.bf16.mxu1 %v11402_v60  ;;  %v11423_v60 = vld [vmem:[#allocation6 + $0xdec] ss:$16 sps:$4 sm:$0xff]  }
 0x3a5   :  { %4035 = vmatpush1.bf16.msra.mxu1 %v11400_v53  ;;  %v11415_v53 = vld [vmem:[#allocation6 + $0xc08] ss:$16 sps:$4 sm:$0xff]  }
 0x3a6   :  { %4036 = vmatprep.subr.bf16.mxu1 %v11408_v63  ;;  %v11429_v63 = vld [vmem:[#allocation6 + $0xdcc] ss:$16 sps:$4 sm:$0xff]  }
 0x3a9   :  { %4037 = vmatpush1.bf16.msra.mxu1 %v11406_v62  ;;  %v11421_v62 = vld [vmem:[#allocation6 + $0xde8] ss:$16 sps:$4 sm:$0xff]  }
 0x3aa   :  { %4038 = vmatprep.subr.bf16.mxu1 %v11414_v0  ;;  %v11435_v0 = vld [vmem:[#allocation6 + $0xdac] ss:$16 sps:$4 sm:$0xff]  }
 0x3ad   :  { %4039 = vmatpush1.bf16.msra.mxu1 %v11412_v50  ;;  %v11427_v50 = vld [vmem:[#allocation6 + $0xdc8] ss:$16 sps:$4 sm:$0xff]  }
 0x3ae   :  { %4040 = vmatprep.subr.bf16.mxu1 %v11420_v2  ;;  %v11441_v2 = vld [vmem:[#allocation6 + $0xd8c] ss:$16 sps:$4 sm:$0xff]  }
 0x3b1   :  { %4041 = vmatpush2.bf16.msra.mxu1 %v11418_v1  ;;  %v11433_v1 = vld [vmem:[#allocation6 + $0xda8] ss:$16 sps:$4 sm:$0xff]  }
 0x3b2   :  { %4042 = vmatprep.subr.bf16.mxu1 %v11426_v4  ;;  %v11447_v4 = vld [vmem:[#allocation6 + $0xd6c] ss:$16 sps:$4 sm:$0xff]  }
 0x3b5   :  { %4043 = vmatpush2.bf16.msra.mxu1 %v11424_v3  ;;  %v11439_v3 = vld [vmem:[#allocation6 + $0xd88] ss:$16 sps:$4 sm:$0xff]  }
 0x3b6   :  { %4044 = vmatprep.subr.bf16.mxu1 %v11432_v5  ;;  %v11453_v5 = vld [vmem:[#allocation6 + $0xd4c] ss:$16 sps:$4 sm:$0xff]  }
 0x3b9   :  { %4045 = vmatpush2.bf16.msra.mxu1 %v11430_v61  ;;  %v11445_v61 = vld [vmem:[#allocation6 + $0xd68] ss:$16 sps:$4 sm:$0xff]  }
 0x3ba   :  { %4046 = vmatprep.subr.bf16.mxu1 %v11438_v7  ;;  %v11451_v7 = vld [vmem:[#allocation6 + $0xd48] ss:$16 sps:$4 sm:$0xff]  }
 0x3bd   :  { %4047 = vmatpush2.bf16.msra.mxu1 %v11436_v6  ;;  %v2370_v6 = vrot.slane %v12851_v25, %v12795_v21 }
 0x3be   :  { %4048 = vmatprep.subr.bf16.mxu1 %v11444_v9  ;;  %v2374_v9 = vrot.slane %v12851_v25, %v12797_v24 }
 0x3c1   :  { %4049 = vmatpush2.bf16.msra.mxu1 %v11442_v8  ;;  %v11459_v8 = vld [vmem:[#allocation6 + $0xd2c] ss:$16 sps:$4 sm:$0xff]  }
 0x3c2   :  { %4050 = vmatprep.subr.bf16.mxu1 %v11450_v11  ;;  %v11457_v11 = vld [vmem:[#allocation6 + $0xd28] ss:$16 sps:$4 sm:$0xff]  }
 0x3c5   :  { %4051 = vmatpush2.bf16.msra.mxu1 %v11448_v10 }
 0x3c6   :  { %4052 = vmatprep.subr.bf16.mxu1 %v11456_v12 }
 0x3c9   :  { %4053 = vmatpush2.bf16.msra.mxu1 %v11454_v14 }
 0x3ca   :  { %4054 = vmatprep.subr.bf16.mxu1 %v11462_v18 }
 0x3cd   :  { %4055 = vmatpush2.bf16.msra.mxu1 %v11460_v20  ;;  %v11463_v20 = vld [vmem:[#allocation6 + $0xd08] ss:$16 sps:$4 sm:$0xff]  }
 0x3ce   :  { %4106 = vmatprep.subr.bf16.mxu1 %v11468_v23 }
 0x3d0   :  { %v3053_v13 = vpop.f32.mrf.mxu0 }
 0x3d1   :  { %v3054_v28 = vadd.f32 %v3053_v13, %v2362_v26  ;;  %v11465_v13 = vld [vmem:[#allocation6 + $0xd0c] ss:$16 sps:$4 sm:$0xff]  }
 0x3d2   :  { %v3055_v17 = vpop.f32.mrf.mxu0 }
 0x3d3   :  { %v3056_v31 = vadd.f32 %v3055_v17, %v2366_v27 }
 0x3d4   :  { %v3057_v19 = vpop.f32.mrf.mxu0 }
 0x3d6   :  { %v3058_v22 = vpop.f32.mrf.mxu0 }
 0x410   :  { %v3094_v29 = vpop.f32.mrf.mxu1  ;;  %v12857_v30 = vpop.f32.mrf.mxu0 }
 0x411   :  { %v3095_v32 = vadd.f32 %v3094_v29, %v3054_v28  ;;  %v3136_v10 = vadd.f32 %v12857_v30, %v2370_v6  ;;  %v11466_v28 = vld [vmem:[#allocation6 + $0xee8] ss:$16 sps:$4 sm:$0xff]   ;;  %v11471_v30 = vld [vmem:[#allocation6 + $0xecc] ss:$16 sps:$4 sm:$0xff]  }
 0x412   :  { %v3096_v33 = vpop.f32.mrf.mxu1  ;;  %v12859_v35 = vpop.f32.mrf.mxu0  ;;  %v11499_v6 = vld [vmem:[#allocation6 + $0xf88] ss:$16 sps:$4 sm:$0xff]  }
 0x413   :  { %v3097_v36 = vadd.f32 %v3096_v33, %v3056_v31  ;;  %v3183_v37 = vmax.f32 %v3095_v32, 0.0  ;;  %v3138_v14 = vadd.f32 %v12859_v35, %v2374_v9  ;;  %v11469_v31 = vld [vmem:[#allocation6 + $0xec8] ss:$16 sps:$4 sm:$0xff]   ;;  %v11474_v32 = vld [vmem:[#allocation6 + $0xeac] ss:$16 sps:$4 sm:$0xff]  }
 0x414   :  { %v3098_v38 = vpop.f32.mrf.mxu1  ;;  %v3139_v39 = vpop.f32.mrf.mxu0  ;;  %v11472_v33 = vld [vmem:[#allocation6 + $0xea8] ss:$16 sps:$4 sm:$0xff]   ;;  %v11477_v35 = vld [vmem:[#allocation6 + $0xe8c] ss:$16 sps:$4 sm:$0xff]   ;;  %v11546_v9 = vld [vmem:[#allocation6 + $0x11a4] ss:$16 sps:$4 sm:$0xff]  }
 0x415   :  { %v3184_v40 = vmax.f32 %v3097_v36, 0.0  ;;  %v12861_v46 = vpack.c.bf16 %v3183_v37, %v3183_v37  ;;  %v11514_v36 = vld [vmem:[#allocation6 + $0x10e0] ss:$16 sps:$4 sm:$0xff]   ;;  %v11516_v37 = vld [vmem:[#allocation6 + $0x10e4] ss:$16 sps:$4 sm:$0xff]  }
 0x416   :  { %v3099_v42 = vpop.f32.mrf.mxu1  ;;  %v3140_v43 = vpop.f32.mrf.mxu0  ;;  %v11519_v38 = vld [vmem:[#allocation6 + $0x10c4] ss:$16 sps:$4 sm:$0xff]   ;;  %v11475_v39 = vld [vmem:[#allocation6 + $0xe88] ss:$16 sps:$4 sm:$0xff]  }
 0x417   :  { %v3188_v41 = vpack.c.bf16 %v3184_v40, %v3184_v40  ;;  %v11517_v40 = vld [vmem:[#allocation6 + $0x10c0] ss:$16 sps:$4 sm:$0xff]   ;;  %v11480_v42 = vld [vmem:[#allocation6 + $0xe6c] ss:$16 sps:$4 sm:$0xff]   ;;  %v11522_v43 = vld [vmem:[#allocation6 + $0x10a4] ss:$16 sps:$4 sm:$0xff]  }
 0x419   :  { %4015 = vmatprep.mubr.bf16.mxu0 %v3188_v41 }
 0x41a   :  { %4016 = vmatmul.mubr.bf16.vlgmr.msra.gmra.mxu0 %v12861_v46 }
 0x41b   :  { %4066 = vmatpush1.bf16.msra.mxu0 %v11373_v44  ;;  %4097 = vmatprep.mubr.bf16.mxu0 %v3188_v41  ;;  %v11478_v41 = vld [vmem:[#allocation6 + $0xe68] ss:$16 sps:$4 sm:$0xff]   ;;  %v11520_v44 = vld [vmem:[#allocation6 + $0x10a0] ss:$16 sps:$4 sm:$0xff]  }
 0x41c   :  { %4067 = vmatprep.subr.bf16.mxu0 %v11381_v47  ;;  %v11525_v47 = vld [vmem:[#allocation6 + $0x1084] ss:$16 sps:$4 sm:$0xff]  }
 0x41f   :  { %4068 = vmatpush1.bf16.msra.mxu0 %v11379_v48  ;;  %v11481_v48 = vld [vmem:[#allocation6 + $0xe48] ss:$16 sps:$4 sm:$0xff]  }
 0x420   :  { %4069 = vmatprep.subr.bf16.mxu0 %v11387_v49  ;;  %v11523_v49 = vld [vmem:[#allocation6 + $0x1080] ss:$16 sps:$4 sm:$0xff]  }
 0x423   :  { %4070 = vmatpush1.bf16.msra.mxu0 %v11385_v51  ;;  %v11486_v51 = vld [vmem:[#allocation6 + $0xe2c] ss:$16 sps:$4 sm:$0xff]  }
 0x424   :  { %4071 = vmatprep.subr.bf16.mxu0 %v11393_v52  ;;  %v11528_v52 = vld [vmem:[#allocation6 + $0x1064] ss:$16 sps:$4 sm:$0xff]  }
 0x427   :  { %4072 = vmatpush1.bf16.msra.mxu0 %v11391_v54  ;;  %v11484_v54 = vld [vmem:[#allocation6 + $0xe28] ss:$16 sps:$4 sm:$0xff]  }
 0x428   :  { %4073 = vmatprep.subr.bf16.mxu0 %v11399_v55  ;;  %v11526_v55 = vld [vmem:[#allocation6 + $0x1060] ss:$16 sps:$4 sm:$0xff]  }
 0x42b   :  { %4074 = vmatpush1.bf16.msra.mxu0 %v11397_v56  ;;  %v11489_v56 = vld [vmem:[#allocation6 + $0xe0c] ss:$16 sps:$4 sm:$0xff]  }
 0x42c   :  { %4075 = vmatprep.subr.bf16.mxu0 %v11405_v45  ;;  %v11531_v45 = vld [vmem:[#allocation6 + $0x1044] ss:$16 sps:$4 sm:$0xff]  }
 0x42f   :  { %4076 = vmatpush1.bf16.msra.mxu0 %v11403_v34  ;;  %v11487_v34 = vld [vmem:[#allocation6 + $0xe08] ss:$16 sps:$4 sm:$0xff]  }
 0x430   :  { %4077 = vmatprep.subr.bf16.mxu0 %v11411_v57  ;;  %v11529_v57 = vld [vmem:[#allocation6 + $0x1040] ss:$16 sps:$4 sm:$0xff]  }
 0x433   :  { %4078 = vmatpush1.bf16.msra.mxu0 %v11409_v58  ;;  %v11492_v58 = vld [vmem:[#allocation6 + $0xfec] ss:$16 sps:$4 sm:$0xff]  }
 0x434   :  { %4079 = vmatprep.subr.bf16.mxu0 %v11417_v59  ;;  %v11534_v59 = vld [vmem:[#allocation6 + $0x1024] ss:$16 sps:$4 sm:$0xff]  }
 0x437   :  { %4080 = vmatpush1.bf16.msra.mxu0 %v11415_v53  ;;  %v11490_v53 = vld [vmem:[#allocation6 + $0xfe8] ss:$16 sps:$4 sm:$0xff]  }
 0x438   :  { %4081 = vmatprep.subr.bf16.mxu0 %v11423_v60  ;;  %v11532_v60 = vld [vmem:[#allocation6 + $0x1020] ss:$16 sps:$4 sm:$0xff]  }
 0x43b   :  { %4082 = vmatpush2.bf16.msra.mxu0 %v11421_v62  ;;  %v11495_v62 = vld [vmem:[#allocation6 + $0xfcc] ss:$16 sps:$4 sm:$0xff]  }
 0x43c   :  { %4083 = vmatprep.subr.bf16.mxu0 %v11429_v63  ;;  %v11537_v63 = vld [vmem:[#allocation6 + $0x1004] ss:$16 sps:$4 sm:$0xff]  }
 0x43f   :  { %4084 = vmatpush2.bf16.msra.mxu0 %v11427_v50  ;;  %v11493_v50 = vld [vmem:[#allocation6 + $0xfc8] ss:$16 sps:$4 sm:$0xff]  }
 0x440   :  { %4085 = vmatprep.subr.bf16.mxu0 %v11435_v0  ;;  %v11535_v0 = vld [vmem:[#allocation6 + $0x1000] ss:$16 sps:$4 sm:$0xff]  }
 0x443   :  { %4086 = vmatpush2.bf16.msra.mxu0 %v11433_v1  ;;  %v11498_v1 = vld [vmem:[#allocation6 + $0xfac] ss:$16 sps:$4 sm:$0xff]  }
 0x444   :  { %4087 = vmatprep.subr.bf16.mxu0 %v11441_v2  ;;  %v11540_v2 = vld [vmem:[#allocation6 + $0x11e4] ss:$16 sps:$4 sm:$0xff]  }
 0x447   :  { %4088 = vmatpush2.bf16.msra.mxu0 %v11439_v3  ;;  %v11496_v3 = vld [vmem:[#allocation6 + $0xfa8] ss:$16 sps:$4 sm:$0xff]  }
 0x448   :  { %4089 = vmatprep.subr.bf16.mxu0 %v11447_v4  ;;  %v11538_v4 = vld [vmem:[#allocation6 + $0x11e0] ss:$16 sps:$4 sm:$0xff]  }
 0x44b   :  { %4090 = vmatpush2.bf16.msra.mxu0 %v11445_v61  ;;  %v11501_v61 = vld [vmem:[#allocation6 + $0xf8c] ss:$16 sps:$4 sm:$0xff]  }
 0x44c   :  { %4091 = vmatprep.subr.bf16.mxu0 %v11453_v5  ;;  %v11543_v5 = vld [vmem:[#allocation6 + $0x11c4] ss:$16 sps:$4 sm:$0xff]  }
 0x44f   :  { %4092 = vmatpush2.bf16.msra.mxu0 %v11451_v7  ;;  %v11541_v7 = vld [vmem:[#allocation6 + $0x11c0] ss:$16 sps:$4 sm:$0xff]  }
 0x450   :  { %v3176_v12 = vpop.f32.mrf.mxu1  ;;  %4093 = vmatprep.subr.bf16.mxu0 %v11459_v8  ;;  %v11504_v8 = vld [vmem:[#allocation6 + $0xf6c] ss:$16 sps:$4 sm:$0xff]  }
 0x451   :  { %v3177_v17 = vadd.f32 %v3176_v12, %v3136_v10  ;;  %v11502_v10 = vld [vmem:[#allocation6 + $0xf68] ss:$16 sps:$4 sm:$0xff]   ;;  %v11507_v12 = vld [vmem:[#allocation6 + $0xf4c] ss:$16 sps:$4 sm:$0xff]  }
 0x452   :  { %v3178_v18 = vpop.f32.mrf.mxu1 }
 0x453   :  { %v3179_v19 = vadd.f32 %v3178_v18, %v3138_v14  ;;  %4094 = vmatpush2.bf16.msra.mxu0 %v11457_v11  ;;  %v3185_v22 = vmax.f32 %v3177_v17, 0.0  ;;  %v11544_v11 = vld [vmem:[#allocation6 + $0x11a0] ss:$16 sps:$4 sm:$0xff]   ;;  %v11505_v14 = vld [vmem:[#allocation6 + $0xf48] ss:$16 sps:$4 sm:$0xff]  }
 0x454   :  { %v3180_v23 = vpop.f32.mrf.mxu1  ;;  %4095 = vmatprep.subr.bf16.mxu0 %v11465_v13  ;;  %v11549_v13 = vld [vmem:[#allocation6 + $0x1184] ss:$16 sps:$4 sm:$0xff]   ;;  %v11547_v17 = vld [vmem:[#allocation6 + $0x1180] ss:$16 sps:$4 sm:$0xff]   ;;  %v11510_v18 = vld [vmem:[#allocation6 + $0xf2c] ss:$16 sps:$4 sm:$0xff]  }
 0x455   :  { %v3186_v26 = vmax.f32 %v3179_v19, 0.0  ;;  %v12870_v29 = vpack.c.bf16 %v3185_v22, %v3185_v22  ;;  %v11552_v19 = vld [vmem:[#allocation6 + $0x1164] ss:$16 sps:$4 sm:$0xff]   ;;  %v11550_v22 = vld [vmem:[#allocation6 + $0x1160] ss:$16 sps:$4 sm:$0xff]  }
 0x456   :  { %v3181_v27 = vpop.f32.mrf.mxu1  ;;  %v11513_v23 = vld [vmem:[#allocation6 + $0xf0c] ss:$16 sps:$4 sm:$0xff]  }
 0x457   :  { %v3190_v25 = vpack.c.bf16 %v3186_v26, %v3186_v26  ;;  %4096 = vmatpush2.bf16.msra.mxu0 %v11463_v20  ;;  %v11508_v20 = vld [vmem:[#allocation6 + $0xf28] ss:$16 sps:$4 sm:$0xff]   ;;  %v11555_v26 = vld [vmem:[#allocation6 + $0x1144] ss:$16 sps:$4 sm:$0xff]  }
 0x458   :  { %4947 = vmatprep.subr.bf16.mxu0 %v11516_v37  ;;  %v11511_v27 = vld [vmem:[#allocation6 + $0xf08] ss:$16 sps:$4 sm:$0xff]   ;;  %v11568_v37 = vld [vmem:[#allocation6 + $0x12c0] ss:$16 sps:$4 sm:$0xff]  }
 0x459   :  { %4056 = vmatprep.mubr.bf16.mxu1 %v3190_v25 }
 0x45a   :  { %4057 = vmatmul.mubr.bf16.vlgmr.msra.gmra.mxu1 %v12870_v29  ;;  %4098 = vmatmul.mubr.bf16.vlgmr.msra.gmra.mxu0 %v12861_v46  ;;  %v11483_v46 = vld [vmem:[#allocation6 + $0xe4c] ss:$16 sps:$4 sm:$0xff]  }
 0x45b   :  { %4107 = vmatpush1.bf16.msra.mxu1 %v11466_v28  ;;  %4138 = vmatprep.mubr.bf16.mxu1 %v3190_v25  ;;  %v11553_v25 = vld [vmem:[#allocation6 + $0x1140] ss:$16 sps:$4 sm:$0xff]   ;;  %v11558_v28 = vld [vmem:[#allocation6 + $0x1124] ss:$16 sps:$4 sm:$0xff]  }
 0x45c   :  { %4108 = vmatprep.subr.bf16.mxu1 %v11471_v30  ;;  %4948 = vmatpush1.bf16.msra.mxu0 %v11514_v36  ;;  %v11556_v30 = vld [vmem:[#allocation6 + $0x1120] ss:$16 sps:$4 sm:$0xff]   ;;  %v11567_v36 = vld [vmem:[#allocation6 + $0x10ec] ss:$16 sps:$4 sm:$0xff]  }
 0x45d   :  { %4949 = vmatprep.subr.bf16.mxu0 %v11519_v38  ;;  %v11570_v38 = vld [vmem:[#allocation6 + $0x12c4] ss:$16 sps:$4 sm:$0xff]  }
 0x45f   :  { %4109 = vmatpush1.bf16.msra.mxu1 %v11469_v31  ;;  %v11561_v31 = vld [vmem:[#allocation6 + $0x1104] ss:$16 sps:$4 sm:$0xff]  }
 0x460   :  { %4110 = vmatprep.subr.bf16.mxu1 %v11474_v32  ;;  %4950 = vmatpush1.bf16.msra.mxu0 %v11517_v40  ;;  %v11559_v32 = vld [vmem:[#allocation6 + $0x1100] ss:$16 sps:$4 sm:$0xff]  }
 0x461   :  { %4951 = vmatprep.subr.bf16.mxu0 %v11522_v43  ;;  %v11580_v40 = vld [vmem:[#allocation6 + $0x1280] ss:$16 sps:$4 sm:$0xff]  }
 0x462   :  { %v11586_v43 = vld [vmem:[#allocation6 + $0x1260] ss:$16 sps:$4 sm:$0xff]  }
 0x463   :  { %4111 = vmatpush1.bf16.msra.mxu1 %v11472_v33  ;;  %v11562_v33 = vld [vmem:[#allocation6 + $0x12e0] ss:$16 sps:$4 sm:$0xff]  }
 0x464   :  { %4112 = vmatprep.subr.bf16.mxu1 %v11477_v35  ;;  %4952 = vmatpush1.bf16.msra.mxu0 %v11520_v44  ;;  %v11564_v35 = vld [vmem:[#allocation6 + $0x12e4] ss:$16 sps:$4 sm:$0xff]   ;;  %v11592_v44 = vld [vmem:[#allocation6 + $0x1240] ss:$16 sps:$4 sm:$0xff]  }
 0x465   :  { %4953 = vmatprep.subr.bf16.mxu0 %v11525_v47  ;;  %v11598_v47 = vld [vmem:[#allocation6 + $0x1220] ss:$16 sps:$4 sm:$0xff]  }
 0x467   :  { %4113 = vmatpush1.bf16.msra.mxu1 %v11475_v39  ;;  %v11574_v39 = vld [vmem:[#allocation6 + $0x12a0] ss:$16 sps:$4 sm:$0xff]  }
 0x468   :  { %4114 = vmatprep.subr.bf16.mxu1 %v11480_v42  ;;  %4954 = vmatpush1.bf16.msra.mxu0 %v11523_v49  ;;  %v11582_v42 = vld [vmem:[#allocation6 + $0x1284] ss:$16 sps:$4 sm:$0xff]   ;;  %v11604_v49 = vld [vmem:[#allocation6 + $0x1200] ss:$16 sps:$4 sm:$0xff]  }
 0x469   :  { %4955 = vmatprep.subr.bf16.mxu0 %v11528_v52  ;;  %v11610_v52 = vld [vmem:[#allocation6 + $0x13e0] ss:$16 sps:$4 sm:$0xff]  }
 0x46b   :  { %4115 = vmatpush1.bf16.msra.mxu1 %v11478_v41  ;;  %v11588_v41 = vld [vmem:[#allocation6 + $0x1264] ss:$16 sps:$4 sm:$0xff]  }
 0x46c   :  { %4116 = vmatprep.subr.bf16.mxu1 %v11483_v46  ;;  %4956 = vmatpush1.bf16.msra.mxu0 %v11526_v55  ;;  %v11594_v46 = vld [vmem:[#allocation6 + $0x1244] ss:$16 sps:$4 sm:$0xff]   ;;  %v11616_v55 = vld [vmem:[#allocation6 + $0x13c0] ss:$16 sps:$4 sm:$0xff]  }
 0x46d   :  { %4957 = vmatprep.subr.bf16.mxu0 %v11531_v45  ;;  %v11622_v45 = vld [vmem:[#allocation6 + $0x13a0] ss:$16 sps:$4 sm:$0xff]  }
 0x46f   :  { %4117 = vmatpush1.bf16.msra.mxu1 %v11481_v48  ;;  %v11600_v48 = vld [vmem:[#allocation6 + $0x1224] ss:$16 sps:$4 sm:$0xff]  }
 0x470   :  { %4118 = vmatprep.subr.bf16.mxu1 %v11486_v51  ;;  %4958 = vmatpush1.bf16.msra.mxu0 %v11529_v57  ;;  %v11606_v51 = vld [vmem:[#allocation6 + $0x1204] ss:$16 sps:$4 sm:$0xff]   ;;  %v11628_v57 = vld [vmem:[#allocation6 + $0x1380] ss:$16 sps:$4 sm:$0xff]  }
 0x471   :  { %4959 = vmatprep.subr.bf16.mxu0 %v11534_v59  ;;  %v11634_v59 = vld [vmem:[#allocation6 + $0x1360] ss:$16 sps:$4 sm:$0xff]  }
 0x473   :  { %4119 = vmatpush1.bf16.msra.mxu1 %v11484_v54  ;;  %v11612_v54 = vld [vmem:[#allocation6 + $0x13e4] ss:$16 sps:$4 sm:$0xff]  }
 0x474   :  { %4120 = vmatprep.subr.bf16.mxu1 %v11489_v56  ;;  %4960 = vmatpush1.bf16.msra.mxu0 %v11532_v60  ;;  %v11618_v56 = vld [vmem:[#allocation6 + $0x13c4] ss:$16 sps:$4 sm:$0xff]   ;;  %v11640_v60 = vld [vmem:[#allocation6 + $0x1340] ss:$16 sps:$4 sm:$0xff]  }
 0x475   :  { %4961 = vmatprep.subr.bf16.mxu0 %v11537_v63  ;;  %v11648_v63 = vld [vmem:[#allocation6 + $0x1324] ss:$16 sps:$4 sm:$0xff]  }
 0x477   :  { %4121 = vmatpush1.bf16.msra.mxu1 %v11487_v34  ;;  %v11624_v34 = vld [vmem:[#allocation6 + $0x13a4] ss:$16 sps:$4 sm:$0xff]  }
 0x478   :  { %4122 = vmatprep.subr.bf16.mxu1 %v11492_v58  ;;  %4962 = vmatpush1.bf16.msra.mxu0 %v11535_v0  ;;  %v11630_v58 = vld [vmem:[#allocation6 + $0x1384] ss:$16 sps:$4 sm:$0xff]   ;;  %v11646_v0 = vld [vmem:[#allocation6 + $0x1320] ss:$16 sps:$4 sm:$0xff]  }
 0x479   :  { %4963 = vmatprep.subr.bf16.mxu0 %v11540_v2  ;;  %v11654_v2 = vld [vmem:[#allocation6 + $0x1304] ss:$16 sps:$4 sm:$0xff]  }
 0x47b   :  { %4123 = vmatpush2.bf16.msra.mxu1 %v11490_v53  ;;  %v11636_v53 = vld [vmem:[#allocation6 + $0x1364] ss:$16 sps:$4 sm:$0xff]  }
 0x47c   :  { %4124 = vmatprep.subr.bf16.mxu1 %v11495_v62  ;;  %4964 = vmatpush2.bf16.msra.mxu0 %v11538_v4  ;;  %v11642_v62 = vld [vmem:[#allocation6 + $0x1344] ss:$16 sps:$4 sm:$0xff]   ;;  %v11652_v4 = vld [vmem:[#allocation6 + $0x1300] ss:$16 sps:$4 sm:$0xff]  }
 0x47d   :  { %4965 = vmatprep.subr.bf16.mxu0 %v11543_v5  ;;  %v11660_v5 = vld [vmem:[#allocation6 + $0x12ec] ss:$16 sps:$4 sm:$0xff]  }
 0x47f   :  { %4125 = vmatpush2.bf16.msra.mxu1 %v11493_v50 }
 0x480   :  { %4126 = vmatprep.subr.bf16.mxu1 %v11498_v1  ;;  %4966 = vmatpush2.bf16.msra.mxu0 %v11541_v7 }
 0x481   :  { %4967 = vmatprep.subr.bf16.mxu0 %v11546_v9 }
 0x483   :  { %4127 = vmatpush2.bf16.msra.mxu1 %v11496_v3 }
 0x484   :  { %4128 = vmatprep.subr.bf16.mxu1 %v11501_v61  ;;  %4968 = vmatpush2.bf16.msra.mxu0 %v11544_v11 }
 0x485   :  { %4969 = vmatprep.subr.bf16.mxu0 %v11549_v13 }
 0x487   :  { %4129 = vmatpush2.bf16.msra.mxu1 %v11499_v6  ;;  %v12875_v6 = vld [vmem:[#allocation7 + $0xc] sm:$0xf] }
 0x488   :  { %4130 = vmatprep.subr.bf16.mxu1 %v11504_v8  ;;  %4970 = vmatpush2.bf16.msra.mxu0 %v11547_v17  ;;  %v3326_v7 = vrot.slane %v12875_v6, %v12789_v15  ;;  %v3330_v8 = vrot.slane %v12875_v6, %v12791_v16 }
 0x489   :  { %4971 = vmatprep.subr.bf16.mxu0 %v11552_v19 }
 0x48b   :  { %4131 = vmatpush2.bf16.msra.mxu1 %v11502_v10 }
 0x48c   :  { %4132 = vmatprep.subr.bf16.mxu1 %v11507_v12  ;;  %4972 = vmatpush2.bf16.msra.mxu0 %v11550_v22 }
 0x48d   :  { %4973 = vmatprep.subr.bf16.mxu0 %v11555_v26 }
 0x48f   :  { %4133 = vmatpush2.bf16.msra.mxu1 %v11505_v14 }
 0x490   :  { %4134 = vmatprep.subr.bf16.mxu1 %v11510_v18  ;;  %4974 = vmatpush2.bf16.msra.mxu0 %v11553_v25 }
 0x491   :  { %4975 = vmatprep.subr.bf16.mxu0 %v11558_v28  ;;  %v11565_v28 = vld [vmem:[#allocation6 + $0x10e8] ss:$16 sps:$4 sm:$0xff]  }
 0x493   :  { %4135 = vmatpush2.bf16.msra.mxu1 %v11508_v20 }
 0x494   :  { %4136 = vmatprep.subr.bf16.mxu1 %v11513_v23  ;;  %4976 = vmatpush2.bf16.msra.mxu0 %v11556_v30 }
 0x495   :  { %4977 = vmatprep.subr.bf16.mxu0 %v11561_v31  ;;  %v11573_v31 = vld [vmem:[#allocation6 + $0x10cc] ss:$16 sps:$4 sm:$0xff]  }
 0x497   :  { %4137 = vmatpush2.bf16.msra.mxu1 %v11511_v27 }
 0x498   :  { %4978 = vmatpush2.bf16.msra.mxu0 %v11559_v32  ;;  %4988 = vmatprep.subr.bf16.mxu1 %v11564_v35  ;;  %v11571_v32 = vld [vmem:[#allocation6 + $0x10c8] ss:$16 sps:$4 sm:$0xff]  }
 0x499   :  { %5029 = vmatprep.subr.bf16.mxu0 %v11567_v36  ;;  %v11577_v35 = vld [vmem:[#allocation6 + $0x10a8] ss:$16 sps:$4 sm:$0xff]   ;;  %v11585_v36 = vld [vmem:[#allocation6 + $0x108c] ss:$16 sps:$4 sm:$0xff]  }
 0x49a   :  { %4139 = vmatmul.mubr.bf16.vlgmr.msra.gmra.mxu1 %v12870_v29  ;;  %v11576_v29 = vld [vmem:[#allocation6 + $0x12a4] ss:$16 sps:$4 sm:$0xff]  }
 0x49b   :  { %4989 = vmatpush1.bf16.msra.mxu1 %v11562_v33  ;;  %v11579_v33 = vld [vmem:[#allocation6 + $0x10ac] ss:$16 sps:$4 sm:$0xff]  }
 0x49c   :  { %4990 = vmatprep.subr.bf16.mxu1 %v11570_v38  ;;  %v11591_v38 = vld [vmem:[#allocation6 + $0x106c] ss:$16 sps:$4 sm:$0xff]  }
 0x49f   :  { %4991 = vmatpush1.bf16.msra.mxu1 %v11568_v37  ;;  %v11583_v37 = vld [vmem:[#allocation6 + $0x1088] ss:$16 sps:$4 sm:$0xff]  }
 0x4a0   :  { %4992 = vmatprep.subr.bf16.mxu1 %v11576_v29  ;;  %v11597_v29 = vld [vmem:[#allocation6 + $0x104c] ss:$16 sps:$4 sm:$0xff]  }
 0x4a3   :  { %4993 = vmatpush1.bf16.msra.mxu1 %v11574_v39  ;;  %v11589_v39 = vld [vmem:[#allocation6 + $0x1068] ss:$16 sps:$4 sm:$0xff]  }
 0x4a4   :  { %4994 = vmatprep.subr.bf16.mxu1 %v11582_v42  ;;  %v11603_v42 = vld [vmem:[#allocation6 + $0x102c] ss:$16 sps:$4 sm:$0xff]  }
 0x4a7   :  { %4995 = vmatpush1.bf16.msra.mxu1 %v11580_v40  ;;  %v11595_v40 = vld [vmem:[#allocation6 + $0x1048] ss:$16 sps:$4 sm:$0xff]  }
 0x4a8   :  { %4996 = vmatprep.subr.bf16.mxu1 %v11588_v41  ;;  %v11609_v41 = vld [vmem:[#allocation6 + $0x100c] ss:$16 sps:$4 sm:$0xff]  }
 0x4ab   :  { %4997 = vmatpush1.bf16.msra.mxu1 %v11586_v43  ;;  %v11601_v43 = vld [vmem:[#allocation6 + $0x1028] ss:$16 sps:$4 sm:$0xff]  }
 0x4ac   :  { %4998 = vmatprep.subr.bf16.mxu1 %v11594_v46  ;;  %v11615_v46 = vld [vmem:[#allocation6 + $0x11ec] ss:$16 sps:$4 sm:$0xff]  }
 0x4af   :  { %4999 = vmatpush1.bf16.msra.mxu1 %v11592_v44  ;;  %v11607_v44 = vld [vmem:[#allocation6 + $0x1008] ss:$16 sps:$4 sm:$0xff]  }
 0x4b0   :  { %5000 = vmatprep.subr.bf16.mxu1 %v11600_v48  ;;  %v11621_v48 = vld [vmem:[#allocation6 + $0x11cc] ss:$16 sps:$4 sm:$0xff]  }
 0x4b3   :  { %5001 = vmatpush1.bf16.msra.mxu1 %v11598_v47  ;;  %v11613_v47 = vld [vmem:[#allocation6 + $0x11e8] ss:$16 sps:$4 sm:$0xff]  }
 0x4b4   :  { %5002 = vmatprep.subr.bf16.mxu1 %v11606_v51  ;;  %v11627_v51 = vld [vmem:[#allocation6 + $0x11ac] ss:$16 sps:$4 sm:$0xff]  }
 0x4b7   :  { %5003 = vmatpush1.bf16.msra.mxu1 %v11604_v49  ;;  %v11619_v49 = vld [vmem:[#allocation6 + $0x11c8] ss:$16 sps:$4 sm:$0xff]  }
 0x4b8   :  { %5004 = vmatprep.subr.bf16.mxu1 %v11612_v54  ;;  %v11633_v54 = vld [vmem:[#allocation6 + $0x118c] ss:$16 sps:$4 sm:$0xff]  }
 0x4bb   :  { %5005 = vmatpush2.bf16.msra.mxu1 %v11610_v52  ;;  %v11625_v52 = vld [vmem:[#allocation6 + $0x11a8] ss:$16 sps:$4 sm:$0xff]  }
 0x4bc   :  { %5006 = vmatprep.subr.bf16.mxu1 %v11618_v56  ;;  %v11639_v56 = vld [vmem:[#allocation6 + $0x116c] ss:$16 sps:$4 sm:$0xff]  }
 0x4bf   :  { %5007 = vmatpush2.bf16.msra.mxu1 %v11616_v55  ;;  %v11631_v55 = vld [vmem:[#allocation6 + $0x1188] ss:$16 sps:$4 sm:$0xff]  }
 0x4c0   :  { %5008 = vmatprep.subr.bf16.mxu1 %v11624_v34  ;;  %v11645_v34 = vld [vmem:[#allocation6 + $0x114c] ss:$16 sps:$4 sm:$0xff]  }
 0x4c3   :  { %5009 = vmatpush2.bf16.msra.mxu1 %v11622_v45  ;;  %v11637_v45 = vld [vmem:[#allocation6 + $0x1168] ss:$16 sps:$4 sm:$0xff]  }
 0x4c4   :  { %5010 = vmatprep.subr.bf16.mxu1 %v11630_v58  ;;  %v11643_v58 = vld [vmem:[#allocation6 + $0x1148] ss:$16 sps:$4 sm:$0xff]  }
 0x4c7   :  { %5011 = vmatpush2.bf16.msra.mxu1 %v11628_v57  ;;  %v3334_v57 = vrot.slane %v12875_v6, %v12795_v21 }
 0x4c8   :  { %5012 = vmatprep.subr.bf16.mxu1 %v11636_v53  ;;  %v3338_v53 = vrot.slane %v12875_v6, %v12797_v24 }
 0x4cb   :  { %5013 = vmatpush2.bf16.msra.mxu1 %v11634_v59  ;;  %v11651_v59 = vld [vmem:[#allocation6 + $0x112c] ss:$16 sps:$4 sm:$0xff]  }
 0x4cc   :  { %5014 = vmatprep.subr.bf16.mxu1 %v11642_v62  ;;  %v11649_v62 = vld [vmem:[#allocation6 + $0x1128] ss:$16 sps:$4 sm:$0xff]  }
 0x4cf   :  { %5015 = vmatpush2.bf16.msra.mxu1 %v11640_v60 }
 0x4d0   :  { %5016 = vmatprep.subr.bf16.mxu1 %v11648_v63 }
 0x4d3   :  { %5017 = vmatpush2.bf16.msra.mxu1 %v11646_v0 }
 0x4d4   :  { %5018 = vmatprep.subr.bf16.mxu1 %v11654_v2 }
 0x4d7   :  { %5019 = vmatpush2.bf16.msra.mxu1 %v11652_v4  ;;  %v11655_v4 = vld [vmem:[#allocation6 + $0x1108] ss:$16 sps:$4 sm:$0xff]  }
 0x4d8   :  { %5070 = vmatprep.subr.bf16.mxu1 %v11660_v5 }
 0x4da   :  { %v4017_v50 = vpop.f32.mrf.mxu0 }
 0x4db   :  { %v4018_v9 = vadd.f32 %v4017_v50, %v3326_v7  ;;  %v11657_v50 = vld [vmem:[#allocation6 + $0x110c] ss:$16 sps:$4 sm:$0xff]  }
 0x4dc   :  { %v4019_v1 = vpop.f32.mrf.mxu0 }
 0x4dd   :  { %v4020_v12 = vadd.f32 %v4019_v1, %v3330_v8 }
 0x4de   :  { %v4021_v3 = vpop.f32.mrf.mxu0 }
 0x4e0   :  { %v4022_v61 = vpop.f32.mrf.mxu0 }
 0x51a   :  { %v4058_v10 = vpop.f32.mrf.mxu1  ;;  %v12881_v11 = vpop.f32.mrf.mxu0 }
 0x51b   :  { %v4059_v13 = vadd.f32 %v4058_v10, %v4018_v9  ;;  %v4100_v60 = vadd.f32 %v12881_v11, %v3334_v57  ;;  %v11658_v9 = vld [vmem:[#allocation6 + $0x12e8] ss:$16 sps:$4 sm:$0xff]   ;;  %v11663_v11 = vld [vmem:[#allocation6 + $0x12cc] ss:$16 sps:$4 sm:$0xff]  }
 0x51c   :  { %v4060_v14 = vpop.f32.mrf.mxu1  ;;  %v12883_v17 = vpop.f32.mrf.mxu0  ;;  %v11691_v57 = vld [vmem:[#allocation6 + $0x1388] ss:$16 sps:$4 sm:$0xff]  }
 0x51d   :  { %v4061_v18 = vadd.f32 %v4060_v14, %v4020_v12  ;;  %v4147_v19 = vmax.f32 %v4059_v13, 0.0  ;;  %v4102_v0 = vadd.f32 %v12883_v17, %v3338_v53  ;;  %v11661_v12 = vld [vmem:[#allocation6 + $0x12c8] ss:$16 sps:$4 sm:$0xff]   ;;  %v11666_v13 = vld [vmem:[#allocation6 + $0x12ac] ss:$16 sps:$4 sm:$0xff]  }
 0x51e   :  { %v4062_v20 = vpop.f32.mrf.mxu1  ;;  %v4103_v22 = vpop.f32.mrf.mxu0  ;;  %v11664_v14 = vld [vmem:[#allocation6 + $0x12a8] ss:$16 sps:$4 sm:$0xff]   ;;  %v11669_v17 = vld [vmem:[#allocation6 + $0x128c] ss:$16 sps:$4 sm:$0xff]   ;;  %v11738_v53 = vld [vmem:[#allocation6 + $0x15a4] ss:$16 sps:$4 sm:$0xff]  }
 0x51f   :  { %v4148_v23 = vmax.f32 %v4061_v18, 0.0  ;;  %v12885_v30 = vpack.c.bf16 %v4147_v19, %v4147_v19  ;;  %v11706_v18 = vld [vmem:[#allocation6 + $0x14e0] ss:$16 sps:$4 sm:$0xff]   ;;  %v11708_v19 = vld [vmem:[#allocation6 + $0x14e4] ss:$16 sps:$4 sm:$0xff]  }
 0x520   :  { %v4063_v26 = vpop.f32.mrf.mxu1  ;;  %v4104_v27 = vpop.f32.mrf.mxu0  ;;  %v11711_v20 = vld [vmem:[#allocation6 + $0x14c4] ss:$16 sps:$4 sm:$0xff]   ;;  %v11667_v22 = vld [vmem:[#allocation6 + $0x1288] ss:$16 sps:$4 sm:$0xff]  }
 0x521   :  { %v4152_v25 = vpack.c.bf16 %v4148_v23, %v4148_v23  ;;  %v11709_v23 = vld [vmem:[#allocation6 + $0x14c0] ss:$16 sps:$4 sm:$0xff]   ;;  %v11672_v26 = vld [vmem:[#allocation6 + $0x126c] ss:$16 sps:$4 sm:$0xff]   ;;  %v11714_v27 = vld [vmem:[#allocation6 + $0x14a4] ss:$16 sps:$4 sm:$0xff]  }
 0x523   :  { %4979 = vmatprep.mubr.bf16.mxu0 %v4152_v25 }
 0x524   :  { %4980 = vmatmul.mubr.bf16.vlgmr.msra.gmra.mxu0 %v12885_v30 }
 0x525   :  { %5030 = vmatpush1.bf16.msra.mxu0 %v11565_v28  ;;  %5061 = vmatprep.mubr.bf16.mxu0 %v4152_v25  ;;  %v11670_v25 = vld [vmem:[#allocation6 + $0x1268] ss:$16 sps:$4 sm:$0xff]   ;;  %v11712_v28 = vld [vmem:[#allocation6 + $0x14a0] ss:$16 sps:$4 sm:$0xff]  }
 0x526   :  { %5031 = vmatprep.subr.bf16.mxu0 %v11573_v31  ;;  %v11717_v31 = vld [vmem:[#allocation6 + $0x1484] ss:$16 sps:$4 sm:$0xff]  }
 0x529   :  { %5032 = vmatpush1.bf16.msra.mxu0 %v11571_v32  ;;  %v11673_v32 = vld [vmem:[#allocation6 + $0x1248] ss:$16 sps:$4 sm:$0xff]  }
 0x52a   :  { %5033 = vmatprep.subr.bf16.mxu0 %v11579_v33  ;;  %v11715_v33 = vld [vmem:[#allocation6 + $0x1480] ss:$16 sps:$4 sm:$0xff]  }
 0x52d   :  { %5034 = vmatpush1.bf16.msra.mxu0 %v11577_v35  ;;  %v11678_v35 = vld [vmem:[#allocation6 + $0x122c] ss:$16 sps:$4 sm:$0xff]  }
 0x52e   :  { %5035 = vmatprep.subr.bf16.mxu0 %v11585_v36  ;;  %v11720_v36 = vld [vmem:[#allocation6 + $0x1464] ss:$16 sps:$4 sm:$0xff]  }
 0x531   :  { %5036 = vmatpush1.bf16.msra.mxu0 %v11583_v37  ;;  %v11676_v37 = vld [vmem:[#allocation6 + $0x1228] ss:$16 sps:$4 sm:$0xff]  }
 0x532   :  { %5037 = vmatprep.subr.bf16.mxu0 %v11591_v38  ;;  %v11718_v38 = vld [vmem:[#allocation6 + $0x1460] ss:$16 sps:$4 sm:$0xff]  }
 0x535   :  { %5038 = vmatpush1.bf16.msra.mxu0 %v11589_v39  ;;  %v11681_v39 = vld [vmem:[#allocation6 + $0x120c] ss:$16 sps:$4 sm:$0xff]  }
 0x536   :  { %5039 = vmatprep.subr.bf16.mxu0 %v11597_v29  ;;  %v11723_v29 = vld [vmem:[#allocation6 + $0x1444] ss:$16 sps:$4 sm:$0xff]  }
 0x539   :  { %5040 = vmatpush1.bf16.msra.mxu0 %v11595_v40  ;;  %v11679_v40 = vld [vmem:[#allocation6 + $0x1208] ss:$16 sps:$4 sm:$0xff]  }
 0x53a   :  { %5041 = vmatprep.subr.bf16.mxu0 %v11603_v42  ;;  %v11721_v42 = vld [vmem:[#allocation6 + $0x1440] ss:$16 sps:$4 sm:$0xff]  }
 0x53d   :  { %5042 = vmatpush1.bf16.msra.mxu0 %v11601_v43  ;;  %v11684_v43 = vld [vmem:[#allocation6 + $0x13ec] ss:$16 sps:$4 sm:$0xff]  }
 0x53e   :  { %5043 = vmatprep.subr.bf16.mxu0 %v11609_v41  ;;  %v11726_v41 = vld [vmem:[#allocation6 + $0x1424] ss:$16 sps:$4 sm:$0xff]  }
 0x541   :  { %5044 = vmatpush1.bf16.msra.mxu0 %v11607_v44  ;;  %v11682_v44 = vld [vmem:[#allocation6 + $0x13e8] ss:$16 sps:$4 sm:$0xff]  }
 0x542   :  { %5045 = vmatprep.subr.bf16.mxu0 %v11615_v46  ;;  %v11724_v46 = vld [vmem:[#allocation6 + $0x1420] ss:$16 sps:$4 sm:$0xff]  }
 0x545   :  { %5046 = vmatpush2.bf16.msra.mxu0 %v11613_v47  ;;  %v11687_v47 = vld [vmem:[#allocation6 + $0x13cc] ss:$16 sps:$4 sm:$0xff]  }
 0x546   :  { %5047 = vmatprep.subr.bf16.mxu0 %v11621_v48  ;;  %v11729_v48 = vld [vmem:[#allocation6 + $0x1404] ss:$16 sps:$4 sm:$0xff]  }
 0x549   :  { %5048 = vmatpush2.bf16.msra.mxu0 %v11619_v49  ;;  %v11685_v49 = vld [vmem:[#allocation6 + $0x13c8] ss:$16 sps:$4 sm:$0xff]  }
 0x54a   :  { %5049 = vmatprep.subr.bf16.mxu0 %v11627_v51  ;;  %v11727_v51 = vld [vmem:[#allocation6 + $0x1400] ss:$16 sps:$4 sm:$0xff]  }
 0x54d   :  { %5050 = vmatpush2.bf16.msra.mxu0 %v11625_v52  ;;  %v11690_v52 = vld [vmem:[#allocation6 + $0x13ac] ss:$16 sps:$4 sm:$0xff]  }
 0x54e   :  { %5051 = vmatprep.subr.bf16.mxu0 %v11633_v54  ;;  %v11732_v54 = vld [vmem:[#allocation6 + $0x15e4] ss:$16 sps:$4 sm:$0xff]  }
 0x551   :  { %5052 = vmatpush2.bf16.msra.mxu0 %v11631_v55  ;;  %v11688_v55 = vld [vmem:[#allocation6 + $0x13a8] ss:$16 sps:$4 sm:$0xff]  }
 0x552   :  { %5053 = vmatprep.subr.bf16.mxu0 %v11639_v56  ;;  %v11730_v56 = vld [vmem:[#allocation6 + $0x15e0] ss:$16 sps:$4 sm:$0xff]  }
 0x555   :  { %5054 = vmatpush2.bf16.msra.mxu0 %v11637_v45  ;;  %v11693_v45 = vld [vmem:[#allocation6 + $0x138c] ss:$16 sps:$4 sm:$0xff]  }
 0x556   :  { %5055 = vmatprep.subr.bf16.mxu0 %v11645_v34  ;;  %v11735_v34 = vld [vmem:[#allocation6 + $0x15c4] ss:$16 sps:$4 sm:$0xff]  }
 0x559   :  { %5056 = vmatpush2.bf16.msra.mxu0 %v11643_v58  ;;  %v11733_v58 = vld [vmem:[#allocation6 + $0x15c0] ss:$16 sps:$4 sm:$0xff]  }
 0x55a   :  { %v4140_v63 = vpop.f32.mrf.mxu1  ;;  %5057 = vmatprep.subr.bf16.mxu0 %v11651_v59  ;;  %v11696_v59 = vld [vmem:[#allocation6 + $0x136c] ss:$16 sps:$4 sm:$0xff]  }
 0x55b   :  { %v4141_v1 = vadd.f32 %v4140_v63, %v4100_v60  ;;  %v11694_v60 = vld [vmem:[#allocation6 + $0x1368] ss:$16 sps:$4 sm:$0xff]   ;;  %v11699_v63 = vld [vmem:[#allocation6 + $0x134c] ss:$16 sps:$4 sm:$0xff]  }
 0x55c   :  { %v4142_v2 = vpop.f32.mrf.mxu1 }
 0x55d   :  { %v4143_v3 = vadd.f32 %v4142_v2, %v4102_v0  ;;  %5058 = vmatpush2.bf16.msra.mxu0 %v11649_v62  ;;  %v4149_v61 = vmax.f32 %v4141_v1, 0.0  ;;  %v11736_v62 = vld [vmem:[#allocation6 + $0x15a0] ss:$16 sps:$4 sm:$0xff]   ;;  %v11697_v0 = vld [vmem:[#allocation6 + $0x1348] ss:$16 sps:$4 sm:$0xff]  }
 0x55e   :  { %v4144_v5 = vpop.f32.mrf.mxu1  ;;  %5059 = vmatprep.subr.bf16.mxu0 %v11657_v50  ;;  %v11741_v50 = vld [vmem:[#allocation6 + $0x1584] ss:$16 sps:$4 sm:$0xff]   ;;  %v11739_v1 = vld [vmem:[#allocation6 + $0x1580] ss:$16 sps:$4 sm:$0xff]   ;;  %v11702_v2 = vld [vmem:[#allocation6 + $0x132c] ss:$16 sps:$4 sm:$0xff]  }
 0x55f   :  { %v4150_v7 = vmax.f32 %v4143_v3, 0.0  ;;  %v12894_v10 = vpack.c.bf16 %v4149_v61, %v4149_v61  ;;  %v11744_v3 = vld [vmem:[#allocation6 + $0x1564] ss:$16 sps:$4 sm:$0xff]   ;;  %v11742_v61 = vld [vmem:[#allocation6 + $0x1560] ss:$16 sps:$4 sm:$0xff]  }
 0x560   :  { %v4145_v8 = vpop.f32.mrf.mxu1  ;;  %v11705_v5 = vld [vmem:[#allocation6 + $0x130c] ss:$16 sps:$4 sm:$0xff]  }
 0x561   :  { %v4154_v6 = vpack.c.bf16 %v4150_v7, %v4150_v7  ;;  %5060 = vmatpush2.bf16.msra.mxu0 %v11655_v4  ;;  %v11700_v4 = vld [vmem:[#allocation6 + $0x1328] ss:$16 sps:$4 sm:$0xff]   ;;  %v11747_v7 = vld [vmem:[#allocation6 + $0x1544] ss:$16 sps:$4 sm:$0xff]  }
 0x562   :  { %5911 = vmatprep.subr.bf16.mxu0 %v11708_v19  ;;  %v11703_v8 = vld [vmem:[#allocation6 + $0x1308] ss:$16 sps:$4 sm:$0xff]   ;;  %v11760_v19 = vld [vmem:[#allocation6 + $0x16c0] ss:$16 sps:$4 sm:$0xff]  }
 0x563   :  { %5020 = vmatprep.mubr.bf16.mxu1 %v4154_v6 }
 0x564   :  { %5021 = vmatmul.mubr.bf16.vlgmr.msra.gmra.mxu1 %v12894_v10  ;;  %5062 = vmatmul.mubr.bf16.vlgmr.msra.gmra.mxu0 %v12885_v30  ;;  %v11675_v30 = vld [vmem:[#allocation6 + $0x124c] ss:$16 sps:$4 sm:$0xff]  }
 0x565   :  { %5071 = vmatpush1.bf16.msra.mxu1 %v11658_v9  ;;  %5102 = vmatprep.mubr.bf16.mxu1 %v4154_v6  ;;  %v11745_v6 = vld [vmem:[#allocation6 + $0x1540] ss:$16 sps:$4 sm:$0xff]   ;;  %v11750_v9 = vld [vmem:[#allocation6 + $0x1524] ss:$16 sps:$4 sm:$0xff]  }
 0x566   :  { %5072 = vmatprep.subr.bf16.mxu1 %v11663_v11  ;;  %5912 = vmatpush1.bf16.msra.mxu0 %v11706_v18  ;;  %v11748_v11 = vld [vmem:[#allocation6 + $0x1520] ss:$16 sps:$4 sm:$0xff]   ;;  %v11759_v18 = vld [vmem:[#allocation6 + $0x14ec] ss:$16 sps:$4 sm:$0xff]  }
 0x567   :  { %5913 = vmatprep.subr.bf16.mxu0 %v11711_v20  ;;  %v11762_v20 = vld [vmem:[#allocation6 + $0x16c4] ss:$16 sps:$4 sm:$0xff]  }
 0x569   :  { %5073 = vmatpush1.bf16.msra.mxu1 %v11661_v12  ;;  %v11753_v12 = vld [vmem:[#allocation6 + $0x1504] ss:$16 sps:$4 sm:$0xff]  }
 0x56a   :  { %5074 = vmatprep.subr.bf16.mxu1 %v11666_v13  ;;  %5914 = vmatpush1.bf16.msra.mxu0 %v11709_v23  ;;  %v11751_v13 = vld [vmem:[#allocation6 + $0x1500] ss:$16 sps:$4 sm:$0xff]  }
 0x56b   :  { %5915 = vmatprep.subr.bf16.mxu0 %v11714_v27  ;;  %v11772_v23 = vld [vmem:[#allocation6 + $0x1680] ss:$16 sps:$4 sm:$0xff]  }
 0x56c   :  { %v11778_v27 = vld [vmem:[#allocation6 + $0x1660] ss:$16 sps:$4 sm:$0xff]  }
 0x56d   :  { %5075 = vmatpush1.bf16.msra.mxu1 %v11664_v14  ;;  %v11754_v14 = vld [vmem:[#allocation6 + $0x16e0] ss:$16 sps:$4 sm:$0xff]  }
 0x56e   :  { %5076 = vmatprep.subr.bf16.mxu1 %v11669_v17  ;;  %5916 = vmatpush1.bf16.msra.mxu0 %v11712_v28  ;;  %v11756_v17 = vld [vmem:[#allocation6 + $0x16e4] ss:$16 sps:$4 sm:$0xff]   ;;  %v11784_v28 = vld [vmem:[#allocation6 + $0x1640] ss:$16 sps:$4 sm:$0xff]  }
 0x56f   :  { %5917 = vmatprep.subr.bf16.mxu0 %v11717_v31  ;;  %v11790_v31 = vld [vmem:[#allocation6 + $0x1620] ss:$16 sps:$4 sm:$0xff]  }
 0x571   :  { %5077 = vmatpush1.bf16.msra.mxu1 %v11667_v22  ;;  %v11766_v22 = vld [vmem:[#allocation6 + $0x16a0] ss:$16 sps:$4 sm:$0xff]  }
 0x572   :  { %5078 = vmatprep.subr.bf16.mxu1 %v11672_v26  ;;  %5918 = vmatpush1.bf16.msra.mxu0 %v11715_v33  ;;  %v11774_v26 = vld [vmem:[#allocation6 + $0x1684] ss:$16 sps:$4 sm:$0xff]   ;;  %v11796_v33 = vld [vmem:[#allocation6 + $0x1600] ss:$16 sps:$4 sm:$0xff]  }
 0x573   :  { %5919 = vmatprep.subr.bf16.mxu0 %v11720_v36  ;;  %v11802_v36 = vld [vmem:[#allocation6 + $0x17e0] ss:$16 sps:$4 sm:$0xff]  }
 0x575   :  { %5079 = vmatpush1.bf16.msra.mxu1 %v11670_v25  ;;  %v11780_v25 = vld [vmem:[#allocation6 + $0x1664] ss:$16 sps:$4 sm:$0xff]  }
 0x576   :  { %5080 = vmatprep.subr.bf16.mxu1 %v11675_v30  ;;  %5920 = vmatpush1.bf16.msra.mxu0 %v11718_v38  ;;  %v11786_v30 = vld [vmem:[#allocation6 + $0x1644] ss:$16 sps:$4 sm:$0xff]   ;;  %v11808_v38 = vld [vmem:[#allocation6 + $0x17c0] ss:$16 sps:$4 sm:$0xff]  }
 0x577   :  { %5921 = vmatprep.subr.bf16.mxu0 %v11723_v29  ;;  %v11814_v29 = vld [vmem:[#allocation6 + $0x17a0] ss:$16 sps:$4 sm:$0xff]  }
 0x579   :  { %5081 = vmatpush1.bf16.msra.mxu1 %v11673_v32  ;;  %v11792_v32 = vld [vmem:[#allocation6 + $0x1624] ss:$16 sps:$4 sm:$0xff]  }
 0x57a   :  { %5082 = vmatprep.subr.bf16.mxu1 %v11678_v35  ;;  %5922 = vmatpush1.bf16.msra.mxu0 %v11721_v42  ;;  %v11798_v35 = vld [vmem:[#allocation6 + $0x1604] ss:$16 sps:$4 sm:$0xff]   ;;  %v11820_v42 = vld [vmem:[#allocation6 + $0x1780] ss:$16 sps:$4 sm:$0xff]  }
 0x57b   :  { %5923 = vmatprep.subr.bf16.mxu0 %v11726_v41  ;;  %v11826_v41 = vld [vmem:[#allocation6 + $0x1760] ss:$16 sps:$4 sm:$0xff]  }
 0x57d   :  { %5083 = vmatpush1.bf16.msra.mxu1 %v11676_v37  ;;  %v11804_v37 = vld [vmem:[#allocation6 + $0x17e4] ss:$16 sps:$4 sm:$0xff]  }
 0x57e   :  { %5084 = vmatprep.subr.bf16.mxu1 %v11681_v39  ;;  %5924 = vmatpush1.bf16.msra.mxu0 %v11724_v46  ;;  %v11810_v39 = vld [vmem:[#allocation6 + $0x17c4] ss:$16 sps:$4 sm:$0xff]   ;;  %v11832_v46 = vld [vmem:[#allocation6 + $0x1740] ss:$16 sps:$4 sm:$0xff]  }
 0x57f   :  { %5925 = vmatprep.subr.bf16.mxu0 %v11729_v48  ;;  %v11840_v48 = vld [vmem:[#allocation6 + $0x1724] ss:$16 sps:$4 sm:$0xff]  }
 0x581   :  { %5085 = vmatpush1.bf16.msra.mxu1 %v11679_v40  ;;  %v11816_v40 = vld [vmem:[#allocation6 + $0x17a4] ss:$16 sps:$4 sm:$0xff]  }
 0x582   :  { %5086 = vmatprep.subr.bf16.mxu1 %v11684_v43  ;;  %5926 = vmatpush1.bf16.msra.mxu0 %v11727_v51  ;;  %v11822_v43 = vld [vmem:[#allocation6 + $0x1784] ss:$16 sps:$4 sm:$0xff]   ;;  %v11838_v51 = vld [vmem:[#allocation6 + $0x1720] ss:$16 sps:$4 sm:$0xff]  }
 0x583   :  { %5927 = vmatprep.subr.bf16.mxu0 %v11732_v54  ;;  %v11846_v54 = vld [vmem:[#allocation6 + $0x1704] ss:$16 sps:$4 sm:$0xff]  }
 0x585   :  { %5087 = vmatpush2.bf16.msra.mxu1 %v11682_v44  ;;  %v11828_v44 = vld [vmem:[#allocation6 + $0x1764] ss:$16 sps:$4 sm:$0xff]  }
 0x586   :  { %5088 = vmatprep.subr.bf16.mxu1 %v11687_v47  ;;  %5928 = vmatpush2.bf16.msra.mxu0 %v11730_v56  ;;  %v11834_v47 = vld [vmem:[#allocation6 + $0x1744] ss:$16 sps:$4 sm:$0xff]   ;;  %v11844_v56 = vld [vmem:[#allocation6 + $0x1700] ss:$16 sps:$4 sm:$0xff]  }
 0x587   :  { %5929 = vmatprep.subr.bf16.mxu0 %v11735_v34  ;;  %v11852_v34 = vld [vmem:[#allocation6 + $0x16ec] ss:$16 sps:$4 sm:$0xff]  }
 0x589   :  { %5089 = vmatpush2.bf16.msra.mxu1 %v11685_v49 }
 0x58a   :  { %5090 = vmatprep.subr.bf16.mxu1 %v11690_v52  ;;  %5930 = vmatpush2.bf16.msra.mxu0 %v11733_v58 }
 0x58b   :  { %5931 = vmatprep.subr.bf16.mxu0 %v11738_v53 }
 0x58d   :  { %5091 = vmatpush2.bf16.msra.mxu1 %v11688_v55 }
 0x58e   :  { %5092 = vmatprep.subr.bf16.mxu1 %v11693_v45  ;;  %5932 = vmatpush2.bf16.msra.mxu0 %v11736_v62 }
 0x58f   :  { %5933 = vmatprep.subr.bf16.mxu0 %v11741_v50 }
 0x591   :  { %5093 = vmatpush2.bf16.msra.mxu1 %v11691_v57  ;;  %v12899_v57 = vld [vmem:[#allocation7 + $0x10] sm:$0xf] }
 0x592   :  { %5094 = vmatprep.subr.bf16.mxu1 %v11696_v59  ;;  %5934 = vmatpush2.bf16.msra.mxu0 %v11739_v1  ;;  %v4290_v58 = vrot.slane %v12899_v57, %v12789_v15  ;;  %v4294_v59 = vrot.slane %v12899_v57, %v12791_v16 }
 0x593   :  { %5935 = vmatprep.subr.bf16.mxu0 %v11744_v3 }
 0x595   :  { %5095 = vmatpush2.bf16.msra.mxu1 %v11694_v60 }
 0x596   :  { %5096 = vmatprep.subr.bf16.mxu1 %v11699_v63  ;;  %5936 = vmatpush2.bf16.msra.mxu0 %v11742_v61 }
 0x597   :  { %5937 = vmatprep.subr.bf16.mxu0 %v11747_v7 }
 0x599   :  { %5097 = vmatpush2.bf16.msra.mxu1 %v11697_v0 }
 0x59a   :  { %5098 = vmatprep.subr.bf16.mxu1 %v11702_v2  ;;  %5938 = vmatpush2.bf16.msra.mxu0 %v11745_v6 }
 0x59b   :  { %5939 = vmatprep.subr.bf16.mxu0 %v11750_v9  ;;  %v11757_v9 = vld [vmem:[#allocation6 + $0x14e8] ss:$16 sps:$4 sm:$0xff]  }
 0x59d   :  { %5099 = vmatpush2.bf16.msra.mxu1 %v11700_v4 }
 0x59e   :  { %5100 = vmatprep.subr.bf16.mxu1 %v11705_v5  ;;  %5940 = vmatpush2.bf16.msra.mxu0 %v11748_v11 }
 0x59f   :  { %5941 = vmatprep.subr.bf16.mxu0 %v11753_v12  ;;  %v11765_v12 = vld [vmem:[#allocation6 + $0x14cc] ss:$16 sps:$4 sm:$0xff]  }
 0x5a1   :  { %5101 = vmatpush2.bf16.msra.mxu1 %v11703_v8 }
 0x5a2   :  { %5942 = vmatpush2.bf16.msra.mxu0 %v11751_v13  ;;  %5952 = vmatprep.subr.bf16.mxu1 %v11756_v17  ;;  %v11763_v13 = vld [vmem:[#allocation6 + $0x14c8] ss:$16 sps:$4 sm:$0xff]  }
 0x5a3   :  { %5993 = vmatprep.subr.bf16.mxu0 %v11759_v18  ;;  %v11769_v17 = vld [vmem:[#allocation6 + $0x14a8] ss:$16 sps:$4 sm:$0xff]   ;;  %v11777_v18 = vld [vmem:[#allocation6 + $0x148c] ss:$16 sps:$4 sm:$0xff]  }
 0x5a4   :  { %5103 = vmatmul.mubr.bf16.vlgmr.msra.gmra.mxu1 %v12894_v10  ;;  %v11768_v10 = vld [vmem:[#allocation6 + $0x16a4] ss:$16 sps:$4 sm:$0xff]  }
 0x5a5   :  { %5953 = vmatpush1.bf16.msra.mxu1 %v11754_v14  ;;  %v11771_v14 = vld [vmem:[#allocation6 + $0x14ac] ss:$16 sps:$4 sm:$0xff]  }
 0x5a6   :  { %5954 = vmatprep.subr.bf16.mxu1 %v11762_v20  ;;  %v11783_v20 = vld [vmem:[#allocation6 + $0x146c] ss:$16 sps:$4 sm:$0xff]  }
 0x5a9   :  { %5955 = vmatpush1.bf16.msra.mxu1 %v11760_v19  ;;  %v11775_v19 = vld [vmem:[#allocation6 + $0x1488] ss:$16 sps:$4 sm:$0xff]  }
 0x5aa   :  { %5956 = vmatprep.subr.bf16.mxu1 %v11768_v10  ;;  %v11789_v10 = vld [vmem:[#allocation6 + $0x144c] ss:$16 sps:$4 sm:$0xff]  }
 0x5ad   :  { %5957 = vmatpush1.bf16.msra.mxu1 %v11766_v22  ;;  %v11781_v22 = vld [vmem:[#allocation6 + $0x1468] ss:$16 sps:$4 sm:$0xff]  }
 0x5ae   :  { %5958 = vmatprep.subr.bf16.mxu1 %v11774_v26  ;;  %v11795_v26 = vld [vmem:[#allocation6 + $0x142c] ss:$16 sps:$4 sm:$0xff]  }
 0x5b1   :  { %5959 = vmatpush1.bf16.msra.mxu1 %v11772_v23  ;;  %v11787_v23 = vld [vmem:[#allocation6 + $0x1448] ss:$16 sps:$4 sm:$0xff]  }
 0x5b2   :  { %5960 = vmatprep.subr.bf16.mxu1 %v11780_v25  ;;  %v11801_v25 = vld [vmem:[#allocation6 + $0x140c] ss:$16 sps:$4 sm:$0xff]  }
 0x5b5   :  { %5961 = vmatpush1.bf16.msra.mxu1 %v11778_v27  ;;  %v11793_v27 = vld [vmem:[#allocation6 + $0x1428] ss:$16 sps:$4 sm:$0xff]  }
 0x5b6   :  { %5962 = vmatprep.subr.bf16.mxu1 %v11786_v30  ;;  %v11807_v30 = vld [vmem:[#allocation6 + $0x15ec] ss:$16 sps:$4 sm:$0xff]  }
 0x5b9   :  { %5963 = vmatpush1.bf16.msra.mxu1 %v11784_v28  ;;  %v11799_v28 = vld [vmem:[#allocation6 + $0x1408] ss:$16 sps:$4 sm:$0xff]  }
 0x5ba   :  { %5964 = vmatprep.subr.bf16.mxu1 %v11792_v32  ;;  %v11813_v32 = vld [vmem:[#allocation6 + $0x15cc] ss:$16 sps:$4 sm:$0xff]  }
 0x5bd   :  { %5965 = vmatpush1.bf16.msra.mxu1 %v11790_v31  ;;  %v11805_v31 = vld [vmem:[#allocation6 + $0x15e8] ss:$16 sps:$4 sm:$0xff]  }
 0x5be   :  { %5966 = vmatprep.subr.bf16.mxu1 %v11798_v35  ;;  %v11819_v35 = vld [vmem:[#allocation6 + $0x15ac] ss:$16 sps:$4 sm:$0xff]  }
 0x5c1   :  { %5967 = vmatpush1.bf16.msra.mxu1 %v11796_v33  ;;  %v11811_v33 = vld [vmem:[#allocation6 + $0x15c8] ss:$16 sps:$4 sm:$0xff]  }
 0x5c2   :  { %5968 = vmatprep.subr.bf16.mxu1 %v11804_v37  ;;  %v11825_v37 = vld [vmem:[#allocation6 + $0x158c] ss:$16 sps:$4 sm:$0xff]  }
 0x5c5   :  { %5969 = vmatpush2.bf16.msra.mxu1 %v11802_v36  ;;  %v11817_v36 = vld [vmem:[#allocation6 + $0x15a8] ss:$16 sps:$4 sm:$0xff]  }
 0x5c6   :  { %5970 = vmatprep.subr.bf16.mxu1 %v11810_v39  ;;  %v11831_v39 = vld [vmem:[#allocation6 + $0x156c] ss:$16 sps:$4 sm:$0xff]  }
 0x5c9   :  { %5971 = vmatpush2.bf16.msra.mxu1 %v11808_v38  ;;  %v11823_v38 = vld [vmem:[#allocation6 + $0x1588] ss:$16 sps:$4 sm:$0xff]  }
 0x5ca   :  { %5972 = vmatprep.subr.bf16.mxu1 %v11816_v40  ;;  %v11837_v40 = vld [vmem:[#allocation6 + $0x154c] ss:$16 sps:$4 sm:$0xff]  }
 0x5cd   :  { %5973 = vmatpush2.bf16.msra.mxu1 %v11814_v29  ;;  %v11829_v29 = vld [vmem:[#allocation6 + $0x1568] ss:$16 sps:$4 sm:$0xff]  }
 0x5ce   :  { %5974 = vmatprep.subr.bf16.mxu1 %v11822_v43  ;;  %v11835_v43 = vld [vmem:[#allocation6 + $0x1548] ss:$16 sps:$4 sm:$0xff]  }
 0x5d1   :  { %5975 = vmatpush2.bf16.msra.mxu1 %v11820_v42  ;;  %v4298_v42 = vrot.slane %v12899_v57, %v12795_v21 }
 0x5d2   :  { %5976 = vmatprep.subr.bf16.mxu1 %v11828_v44  ;;  %v4302_v44 = vrot.slane %v12899_v57, %v12797_v24 }
 0x5d5   :  { %5977 = vmatpush2.bf16.msra.mxu1 %v11826_v41  ;;  %v11843_v41 = vld [vmem:[#allocation6 + $0x152c] ss:$16 sps:$4 sm:$0xff]  }
 0x5d6   :  { %5978 = vmatprep.subr.bf16.mxu1 %v11834_v47  ;;  %v11841_v47 = vld [vmem:[#allocation6 + $0x1528] ss:$16 sps:$4 sm:$0xff]  }
 0x5d9   :  { %5979 = vmatpush2.bf16.msra.mxu1 %v11832_v46 }
 0x5da   :  { %5980 = vmatprep.subr.bf16.mxu1 %v11840_v48 }
 0x5dd   :  { %5981 = vmatpush2.bf16.msra.mxu1 %v11838_v51 }
 0x5de   :  { %5982 = vmatprep.subr.bf16.mxu1 %v11846_v54 }
 0x5e1   :  { %5983 = vmatpush2.bf16.msra.mxu1 %v11844_v56  ;;  %v11847_v56 = vld [vmem:[#allocation6 + $0x1508] ss:$16 sps:$4 sm:$0xff]  }
 0x5e2   :  { %6034 = vmatprep.subr.bf16.mxu1 %v11852_v34 }
 0x5e4   :  { %v4981_v49 = vpop.f32.mrf.mxu0 }
 0x5e5   :  { %v4982_v53 = vadd.f32 %v4981_v49, %v4290_v58  ;;  %v11849_v49 = vld [vmem:[#allocation6 + $0x150c] ss:$16 sps:$4 sm:$0xff]  }
 0x5e6   :  { %v4983_v52 = vpop.f32.mrf.mxu0 }
 0x5e7   :  { %v4984_v63 = vadd.f32 %v4983_v52, %v4294_v59 }
 0x5e8   :  { %v4985_v55 = vpop.f32.mrf.mxu0 }
 0x5ea   :  { %v4986_v45 = vpop.f32.mrf.mxu0 }
 0x624   :  { %v5022_v60 = vpop.f32.mrf.mxu1  ;;  %v12905_v62 = vpop.f32.mrf.mxu0 }
 0x625   :  { %v5023_v50 = vadd.f32 %v5022_v60, %v4982_v53  ;;  %v5064_v46 = vadd.f32 %v12905_v62, %v4298_v42  ;;  %v11850_v53 = vld [vmem:[#allocation6 + $0x16e8] ss:$16 sps:$4 sm:$0xff]   ;;  %v11855_v62 = vld [vmem:[#allocation6 + $0x16cc] ss:$16 sps:$4 sm:$0xff]  }
 0x626   :  { %v5024_v0 = vpop.f32.mrf.mxu1  ;;  %v12907_v1 = vpop.f32.mrf.mxu0  ;;  %v11883_v42 = vld [vmem:[#allocation6 + $0x1788] ss:$16 sps:$4 sm:$0xff]  }
 0x627   :  { %v5025_v2 = vadd.f32 %v5024_v0, %v4984_v63  ;;  %v5111_v3 = vmax.f32 %v5023_v50, 0.0  ;;  %v5066_v51 = vadd.f32 %v12907_v1, %v4302_v44  ;;  %v11853_v63 = vld [vmem:[#allocation6 + $0x16c8] ss:$16 sps:$4 sm:$0xff]   ;;  %v11858_v50 = vld [vmem:[#allocation6 + $0x16ac] ss:$16 sps:$4 sm:$0xff]  }
 0x628   :  { %v5026_v4 = vpop.f32.mrf.mxu1  ;;  %v5067_v61 = vpop.f32.mrf.mxu0  ;;  %v11856_v0 = vld [vmem:[#allocation6 + $0x16a8] ss:$16 sps:$4 sm:$0xff]   ;;  %v11861_v1 = vld [vmem:[#allocation6 + $0x168c] ss:$16 sps:$4 sm:$0xff]   ;;  %v11930_v44 = vld [vmem:[#allocation6 + $0x19a4] ss:$16 sps:$4 sm:$0xff]  }
 0x629   :  { %v5112_v5 = vmax.f32 %v5025_v2, 0.0  ;;  %v12909_v11 = vpack.c.bf16 %v5111_v3, %v5111_v3  ;;  %v11898_v2 = vld [vmem:[#allocation6 + $0x18e0] ss:$16 sps:$4 sm:$0xff]   ;;  %v11900_v3 = vld [vmem:[#allocation6 + $0x18e4] ss:$16 sps:$4 sm:$0xff]  }
 0x62a   :  { %v5027_v7 = vpop.f32.mrf.mxu1  ;;  %v5068_v8 = vpop.f32.mrf.mxu0  ;;  %v11903_v4 = vld [vmem:[#allocation6 + $0x18c4] ss:$16 sps:$4 sm:$0xff]   ;;  %v11859_v61 = vld [vmem:[#allocation6 + $0x1688] ss:$16 sps:$4 sm:$0xff]  }
 0x62b   :  { %v5116_v6 = vpack.c.bf16 %v5112_v5, %v5112_v5  ;;  %v11901_v5 = vld [vmem:[#allocation6 + $0x18c0] ss:$16 sps:$4 sm:$0xff]   ;;  %v11864_v7 = vld [vmem:[#allocation6 + $0x166c] ss:$16 sps:$4 sm:$0xff]   ;;  %v11906_v8 = vld [vmem:[#allocation6 + $0x18a4] ss:$16 sps:$4 sm:$0xff]  }
 0x62d   :  { %5943 = vmatprep.mubr.bf16.mxu0 %v5116_v6 }
 0x62e   :  { %5944 = vmatmul.mubr.bf16.vlgmr.msra.gmra.mxu0 %v12909_v11 }
 0x62f   :  { %5994 = vmatpush1.bf16.msra.mxu0 %v11757_v9  ;;  %6025 = vmatprep.mubr.bf16.mxu0 %v5116_v6  ;;  %v11862_v6 = vld [vmem:[#allocation6 + $0x1668] ss:$16 sps:$4 sm:$0xff]   ;;  %v11904_v9 = vld [vmem:[#allocation6 + $0x18a0] ss:$16 sps:$4 sm:$0xff]  }
 0x630   :  { %5995 = vmatprep.subr.bf16.mxu0 %v11765_v12  ;;  %v11909_v12 = vld [vmem:[#allocation6 + $0x1884] ss:$16 sps:$4 sm:$0xff]  }
 0x633   :  { %5996 = vmatpush1.bf16.msra.mxu0 %v11763_v13  ;;  %v11865_v13 = vld [vmem:[#allocation6 + $0x1648] ss:$16 sps:$4 sm:$0xff]  }
 0x634   :  { %5997 = vmatprep.subr.bf16.mxu0 %v11771_v14  ;;  %v11907_v14 = vld [vmem:[#allocation6 + $0x1880] ss:$16 sps:$4 sm:$0xff]  }
 0x637   :  { %5998 = vmatpush1.bf16.msra.mxu0 %v11769_v17  ;;  %v11870_v17 = vld [vmem:[#allocation6 + $0x162c] ss:$16 sps:$4 sm:$0xff]  }
 0x638   :  { %5999 = vmatprep.subr.bf16.mxu0 %v11777_v18  ;;  %v11912_v18 = vld [vmem:[#allocation6 + $0x1864] ss:$16 sps:$4 sm:$0xff]  }
 0x63b   :  { %6000 = vmatpush1.bf16.msra.mxu0 %v11775_v19  ;;  %v11868_v19 = vld [vmem:[#allocation6 + $0x1628] ss:$16 sps:$4 sm:$0xff]  }
 0x63c   :  { %6001 = vmatprep.subr.bf16.mxu0 %v11783_v20  ;;  %v11910_v20 = vld [vmem:[#allocation6 + $0x1860] ss:$16 sps:$4 sm:$0xff]  }
 0x63f   :  { %6002 = vmatpush1.bf16.msra.mxu0 %v11781_v22  ;;  %v11873_v22 = vld [vmem:[#allocation6 + $0x160c] ss:$16 sps:$4 sm:$0xff]  }
 0x640   :  { %6003 = vmatprep.subr.bf16.mxu0 %v11789_v10  ;;  %v11915_v10 = vld [vmem:[#allocation6 + $0x1844] ss:$16 sps:$4 sm:$0xff]  }
 0x643   :  { %6004 = vmatpush1.bf16.msra.mxu0 %v11787_v23  ;;  %v11871_v23 = vld [vmem:[#allocation6 + $0x1608] ss:$16 sps:$4 sm:$0xff]  }
 0x644   :  { %6005 = vmatprep.subr.bf16.mxu0 %v11795_v26  ;;  %v11913_v26 = vld [vmem:[#allocation6 + $0x1840] ss:$16 sps:$4 sm:$0xff]  }
 0x647   :  { %6006 = vmatpush1.bf16.msra.mxu0 %v11793_v27  ;;  %v11876_v27 = vld [vmem:[#allocation6 + $0x17ec] ss:$16 sps:$4 sm:$0xff]  }
 0x648   :  { %6007 = vmatprep.subr.bf16.mxu0 %v11801_v25  ;;  %v11918_v25 = vld [vmem:[#allocation6 + $0x1824] ss:$16 sps:$4 sm:$0xff]  }
 0x64b   :  { %6008 = vmatpush1.bf16.msra.mxu0 %v11799_v28  ;;  %v11874_v28 = vld [vmem:[#allocation6 + $0x17e8] ss:$16 sps:$4 sm:$0xff]  }
 0x64c   :  { %6009 = vmatprep.subr.bf16.mxu0 %v11807_v30  ;;  %v11916_v30 = vld [vmem:[#allocation6 + $0x1820] ss:$16 sps:$4 sm:$0xff]  }
 0x64f   :  { %6010 = vmatpush2.bf16.msra.mxu0 %v11805_v31  ;;  %v11879_v31 = vld [vmem:[#allocation6 + $0x17cc] ss:$16 sps:$4 sm:$0xff]  }
 0x650   :  { %6011 = vmatprep.subr.bf16.mxu0 %v11813_v32  ;;  %v11921_v32 = vld [vmem:[#allocation6 + $0x1804] ss:$16 sps:$4 sm:$0xff]  }
 0x653   :  { %6012 = vmatpush2.bf16.msra.mxu0 %v11811_v33  ;;  %v11877_v33 = vld [vmem:[#allocation6 + $0x17c8] ss:$16 sps:$4 sm:$0xff]  }
 0x654   :  { %6013 = vmatprep.subr.bf16.mxu0 %v11819_v35  ;;  %v11919_v35 = vld [vmem:[#allocation6 + $0x1800] ss:$16 sps:$4 sm:$0xff]  }
 0x657   :  { %6014 = vmatpush2.bf16.msra.mxu0 %v11817_v36  ;;  %v11882_v36 = vld [vmem:[#allocation6 + $0x17ac] ss:$16 sps:$4 sm:$0xff]  }
 0x658   :  { %6015 = vmatprep.subr.bf16.mxu0 %v11825_v37  ;;  %v11924_v37 = vld [vmem:[#allocation6 + $0x19e4] ss:$16 sps:$4 sm:$0xff]  }
 0x65b   :  { %6016 = vmatpush2.bf16.msra.mxu0 %v11823_v38  ;;  %v11880_v38 = vld [vmem:[#allocation6 + $0x17a8] ss:$16 sps:$4 sm:$0xff]  }
 0x65c   :  { %6017 = vmatprep.subr.bf16.mxu0 %v11831_v39  ;;  %v11922_v39 = vld [vmem:[#allocation6 + $0x19e0] ss:$16 sps:$4 sm:$0xff]  }
 0x65f   :  { %6018 = vmatpush2.bf16.msra.mxu0 %v11829_v29  ;;  %v11885_v29 = vld [vmem:[#allocation6 + $0x178c] ss:$16 sps:$4 sm:$0xff]  }
 0x660   :  { %6019 = vmatprep.subr.bf16.mxu0 %v11837_v40  ;;  %v11927_v40 = vld [vmem:[#allocation6 + $0x19c4] ss:$16 sps:$4 sm:$0xff]  }
 0x663   :  { %6020 = vmatpush2.bf16.msra.mxu0 %v11835_v43  ;;  %v11925_v43 = vld [vmem:[#allocation6 + $0x19c0] ss:$16 sps:$4 sm:$0xff]  }
 0x664   :  { %v5104_v48 = vpop.f32.mrf.mxu1  ;;  %6021 = vmatprep.subr.bf16.mxu0 %v11843_v41  ;;  %v11888_v41 = vld [vmem:[#allocation6 + $0x176c] ss:$16 sps:$4 sm:$0xff]  }
 0x665   :  { %v5105_v52 = vadd.f32 %v5104_v48, %v5064_v46  ;;  %v11886_v46 = vld [vmem:[#allocation6 + $0x1768] ss:$16 sps:$4 sm:$0xff]   ;;  %v11891_v48 = vld [vmem:[#allocation6 + $0x174c] ss:$16 sps:$4 sm:$0xff]  }
 0x666   :  { %v5106_v54 = vpop.f32.mrf.mxu1 }
 0x667   :  { %v5107_v55 = vadd.f32 %v5106_v54, %v5066_v51  ;;  %6022 = vmatpush2.bf16.msra.mxu0 %v11841_v47  ;;  %v5113_v45 = vmax.f32 %v5105_v52, 0.0  ;;  %v11928_v47 = vld [vmem:[#allocation6 + $0x19a0] ss:$16 sps:$4 sm:$0xff]   ;;  %v11889_v51 = vld [vmem:[#allocation6 + $0x1748] ss:$16 sps:$4 sm:$0xff]  }
 0x668   :  { %v5108_v34 = vpop.f32.mrf.mxu1  ;;  %6023 = vmatprep.subr.bf16.mxu0 %v11849_v49  ;;  %v11933_v49 = vld [vmem:[#allocation6 + $0x1984] ss:$16 sps:$4 sm:$0xff]   ;;  %v11931_v52 = vld [vmem:[#allocation6 + $0x1980] ss:$16 sps:$4 sm:$0xff]   ;;  %v11894_v54 = vld [vmem:[#allocation6 + $0x172c] ss:$16 sps:$4 sm:$0xff]  }
 0x669   :  { %v5114_v58 = vmax.f32 %v5107_v55, 0.0  ;;  %v12918_v60 = vpack.c.bf16 %v5113_v45, %v5113_v45  ;;  %v11936_v55 = vld [vmem:[#allocation6 + $0x1964] ss:$16 sps:$4 sm:$0xff]   ;;  %v11934_v45 = vld [vmem:[#allocation6 + $0x1960] ss:$16 sps:$4 sm:$0xff]  }
 0x66a   :  { %v5109_v59 = vpop.f32.mrf.mxu1  ;;  %v11897_v34 = vld [vmem:[#allocation6 + $0x170c] ss:$16 sps:$4 sm:$0xff]  }
 0x66b   :  { %v5118_v57 = vpack.c.bf16 %v5114_v58, %v5114_v58  ;;  %6024 = vmatpush2.bf16.msra.mxu0 %v11847_v56  ;;  %v11892_v56 = vld [vmem:[#allocation6 + $0x1728] ss:$16 sps:$4 sm:$0xff]   ;;  %v11939_v58 = vld [vmem:[#allocation6 + $0x1944] ss:$16 sps:$4 sm:$0xff]  }
 0x66c   :  { %6875 = vmatprep.subr.bf16.mxu0 %v11900_v3  ;;  %v11895_v59 = vld [vmem:[#allocation6 + $0x1708] ss:$16 sps:$4 sm:$0xff]   ;;  %v11952_v3 = vld [vmem:[#allocation6 + $0x1ac0] ss:$16 sps:$4 sm:$0xff]  }
 0x66d   :  { %5984 = vmatprep.mubr.bf16.mxu1 %v5118_v57 }
 0x66e   :  { %5985 = vmatmul.mubr.bf16.vlgmr.msra.gmra.mxu1 %v12918_v60  ;;  %6026 = vmatmul.mubr.bf16.vlgmr.msra.gmra.mxu0 %v12909_v11  ;;  %v11867_v11 = vld [vmem:[#allocation6 + $0x164c] ss:$16 sps:$4 sm:$0xff]  }
 0x66f   :  { %6035 = vmatpush1.bf16.msra.mxu1 %v11850_v53  ;;  %6066 = vmatprep.mubr.bf16.mxu1 %v5118_v57  ;;  %v11937_v57 = vld [vmem:[#allocation6 + $0x1940] ss:$16 sps:$4 sm:$0xff]   ;;  %v11942_v53 = vld [vmem:[#allocation6 + $0x1924] ss:$16 sps:$4 sm:$0xff]  }
 0x670   :  { %6036 = vmatprep.subr.bf16.mxu1 %v11855_v62  ;;  %6876 = vmatpush1.bf16.msra.mxu0 %v11898_v2  ;;  %v11940_v62 = vld [vmem:[#allocation6 + $0x1920] ss:$16 sps:$4 sm:$0xff]   ;;  %v11951_v2 = vld [vmem:[#allocation6 + $0x18ec] ss:$16 sps:$4 sm:$0xff]  }
 0x671   :  { %6877 = vmatprep.subr.bf16.mxu0 %v11903_v4  ;;  %v11954_v4 = vld [vmem:[#allocation6 + $0x1ac4] ss:$16 sps:$4 sm:$0xff]  }
 0x673   :  { %6037 = vmatpush1.bf16.msra.mxu1 %v11853_v63  ;;  %v11945_v63 = vld [vmem:[#allocation6 + $0x1904] ss:$16 sps:$4 sm:$0xff]  }
 0x674   :  { %6038 = vmatprep.subr.bf16.mxu1 %v11858_v50  ;;  %6878 = vmatpush1.bf16.msra.mxu0 %v11901_v5  ;;  %v11943_v50 = vld [vmem:[#allocation6 + $0x1900] ss:$16 sps:$4 sm:$0xff]  }
 0x675   :  { %6879 = vmatprep.subr.bf16.mxu0 %v11906_v8  ;;  %v11964_v5 = vld [vmem:[#allocation6 + $0x1a80] ss:$16 sps:$4 sm:$0xff]  }
 0x676   :  { %v11970_v8 = vld [vmem:[#allocation6 + $0x1a60] ss:$16 sps:$4 sm:$0xff]  }
 0x677   :  { %6039 = vmatpush1.bf16.msra.mxu1 %v11856_v0  ;;  %v11946_v0 = vld [vmem:[#allocation6 + $0x1ae0] ss:$16 sps:$4 sm:$0xff]  }
 0x678   :  { %6040 = vmatprep.subr.bf16.mxu1 %v11861_v1  ;;  %6880 = vmatpush1.bf16.msra.mxu0 %v11904_v9  ;;  %v11948_v1 = vld [vmem:[#allocation6 + $0x1ae4] ss:$16 sps:$4 sm:$0xff]   ;;  %v11976_v9 = vld [vmem:[#allocation6 + $0x1a40] ss:$16 sps:$4 sm:$0xff]  }
 0x679   :  { %6881 = vmatprep.subr.bf16.mxu0 %v11909_v12  ;;  %v11982_v12 = vld [vmem:[#allocation6 + $0x1a20] ss:$16 sps:$4 sm:$0xff]  }
 0x67b   :  { %6041 = vmatpush1.bf16.msra.mxu1 %v11859_v61  ;;  %v11958_v61 = vld [vmem:[#allocation6 + $0x1aa0] ss:$16 sps:$4 sm:$0xff]  }
 0x67c   :  { %6042 = vmatprep.subr.bf16.mxu1 %v11864_v7  ;;  %6882 = vmatpush1.bf16.msra.mxu0 %v11907_v14  ;;  %v11966_v7 = vld [vmem:[#allocation6 + $0x1a84] ss:$16 sps:$4 sm:$0xff]   ;;  %v11988_v14 = vld [vmem:[#allocation6 + $0x1a00] ss:$16 sps:$4 sm:$0xff]  }
 0x67d   :  { %6883 = vmatprep.subr.bf16.mxu0 %v11912_v18  ;;  %v11994_v18 = vld [vmem:[#allocation6 + $0x1be0] ss:$16 sps:$4 sm:$0xff]  }
 0x67f   :  { %6043 = vmatpush1.bf16.msra.mxu1 %v11862_v6  ;;  %v11972_v6 = vld [vmem:[#allocation6 + $0x1a64] ss:$16 sps:$4 sm:$0xff]  }
 0x680   :  { %6044 = vmatprep.subr.bf16.mxu1 %v11867_v11  ;;  %6884 = vmatpush1.bf16.msra.mxu0 %v11910_v20  ;;  %v11978_v11 = vld [vmem:[#allocation6 + $0x1a44] ss:$16 sps:$4 sm:$0xff]   ;;  %v12000_v20 = vld [vmem:[#allocation6 + $0x1bc0] ss:$16 sps:$4 sm:$0xff]  }
 0x681   :  { %6885 = vmatprep.subr.bf16.mxu0 %v11915_v10  ;;  %v12006_v10 = vld [vmem:[#allocation6 + $0x1ba0] ss:$16 sps:$4 sm:$0xff]  }
 0x683   :  { %6045 = vmatpush1.bf16.msra.mxu1 %v11865_v13  ;;  %v11984_v13 = vld [vmem:[#allocation6 + $0x1a24] ss:$16 sps:$4 sm:$0xff]  }
 0x684   :  { %6046 = vmatprep.subr.bf16.mxu1 %v11870_v17  ;;  %6886 = vmatpush1.bf16.msra.mxu0 %v11913_v26  ;;  %v11990_v17 = vld [vmem:[#allocation6 + $0x1a04] ss:$16 sps:$4 sm:$0xff]   ;;  %v12012_v26 = vld [vmem:[#allocation6 + $0x1b80] ss:$16 sps:$4 sm:$0xff]  }
 0x685   :  { %6887 = vmatprep.subr.bf16.mxu0 %v11918_v25  ;;  %v12018_v25 = vld [vmem:[#allocation6 + $0x1b60] ss:$16 sps:$4 sm:$0xff]  }
 0x687   :  { %6047 = vmatpush1.bf16.msra.mxu1 %v11868_v19  ;;  %v11996_v19 = vld [vmem:[#allocation6 + $0x1be4] ss:$16 sps:$4 sm:$0xff]  }
 0x688   :  { %6048 = vmatprep.subr.bf16.mxu1 %v11873_v22  ;;  %6888 = vmatpush1.bf16.msra.mxu0 %v11916_v30  ;;  %v12002_v22 = vld [vmem:[#allocation6 + $0x1bc4] ss:$16 sps:$4 sm:$0xff]   ;;  %v12024_v30 = vld [vmem:[#allocation6 + $0x1b40] ss:$16 sps:$4 sm:$0xff]  }
 0x689   :  { %6889 = vmatprep.subr.bf16.mxu0 %v11921_v32  ;;  %v12032_v32 = vld [vmem:[#allocation6 + $0x1b24] ss:$16 sps:$4 sm:$0xff]  }
 0x68b   :  { %6049 = vmatpush1.bf16.msra.mxu1 %v11871_v23  ;;  %v12008_v23 = vld [vmem:[#allocation6 + $0x1ba4] ss:$16 sps:$4 sm:$0xff]  }
 0x68c   :  { %6050 = vmatprep.subr.bf16.mxu1 %v11876_v27  ;;  %6890 = vmatpush1.bf16.msra.mxu0 %v11919_v35  ;;  %v12014_v27 = vld [vmem:[#allocation6 + $0x1b84] ss:$16 sps:$4 sm:$0xff]   ;;  %v12030_v35 = vld [vmem:[#allocation6 + $0x1b20] ss:$16 sps:$4 sm:$0xff]  }
 0x68d   :  { %6891 = vmatprep.subr.bf16.mxu0 %v11924_v37  ;;  %v12038_v37 = vld [vmem:[#allocation6 + $0x1b04] ss:$16 sps:$4 sm:$0xff]  }
 0x68f   :  { %6051 = vmatpush2.bf16.msra.mxu1 %v11874_v28  ;;  %v12020_v28 = vld [vmem:[#allocation6 + $0x1b64] ss:$16 sps:$4 sm:$0xff]  }
 0x690   :  { %6052 = vmatprep.subr.bf16.mxu1 %v11879_v31  ;;  %6892 = vmatpush2.bf16.msra.mxu0 %v11922_v39  ;;  %v12026_v31 = vld [vmem:[#allocation6 + $0x1b44] ss:$16 sps:$4 sm:$0xff]   ;;  %v12036_v39 = vld [vmem:[#allocation6 + $0x1b00] ss:$16 sps:$4 sm:$0xff]  }
 0x691   :  { %6893 = vmatprep.subr.bf16.mxu0 %v11927_v40  ;;  %v12044_v40 = vld [vmem:[#allocation6 + $0x1aec] ss:$16 sps:$4 sm:$0xff]  }
 0x693   :  { %6053 = vmatpush2.bf16.msra.mxu1 %v11877_v33 }
 0x694   :  { %6054 = vmatprep.subr.bf16.mxu1 %v11882_v36  ;;  %6894 = vmatpush2.bf16.msra.mxu0 %v11925_v43 }
 0x695   :  { %6895 = vmatprep.subr.bf16.mxu0 %v11930_v44 }
 0x697   :  { %6055 = vmatpush2.bf16.msra.mxu1 %v11880_v38 }
 0x698   :  { %6056 = vmatprep.subr.bf16.mxu1 %v11885_v29  ;;  %6896 = vmatpush2.bf16.msra.mxu0 %v11928_v47 }
 0x699   :  { %6897 = vmatprep.subr.bf16.mxu0 %v11933_v49 }
 0x69b   :  { %6057 = vmatpush2.bf16.msra.mxu1 %v11883_v42  ;;  %v12923_v42 = vld [vmem:[#allocation7 + $0x14] sm:$0xf] }
 0x69c   :  { %6058 = vmatprep.subr.bf16.mxu1 %v11888_v41  ;;  %6898 = vmatpush2.bf16.msra.mxu0 %v11931_v52  ;;  %v5254_v43 = vrot.slane %v12923_v42, %v12789_v15  ;;  %v5258_v41 = vrot.slane %v12923_v42, %v12791_v16 }
 0x69d   :  { %6899 = vmatprep.subr.bf16.mxu0 %v11936_v55 }
 0x69f   :  { %6059 = vmatpush2.bf16.msra.mxu1 %v11886_v46 }
 0x6a0   :  { %6060 = vmatprep.subr.bf16.mxu1 %v11891_v48  ;;  %6900 = vmatpush2.bf16.msra.mxu0 %v11934_v45 }
 0x6a1   :  { %6901 = vmatprep.subr.bf16.mxu0 %v11939_v58 }
 0x6a3   :  { %6061 = vmatpush2.bf16.msra.mxu1 %v11889_v51 }
 0x6a4   :  { %6062 = vmatprep.subr.bf16.mxu1 %v11894_v54  ;;  %6902 = vmatpush2.bf16.msra.mxu0 %v11937_v57 }
 0x6a5   :  { %6903 = vmatprep.subr.bf16.mxu0 %v11942_v53  ;;  %v11949_v53 = vld [vmem:[#allocation6 + $0x18e8] ss:$16 sps:$4 sm:$0xff]  }
 0x6a7   :  { %6063 = vmatpush2.bf16.msra.mxu1 %v11892_v56 }
 0x6a8   :  { %6064 = vmatprep.subr.bf16.mxu1 %v11897_v34  ;;  %6904 = vmatpush2.bf16.msra.mxu0 %v11940_v62 }
 0x6a9   :  { %6905 = vmatprep.subr.bf16.mxu0 %v11945_v63  ;;  %v11957_v63 = vld [vmem:[#allocation6 + $0x18cc] ss:$16 sps:$4 sm:$0xff]  }
 0x6ab   :  { %6065 = vmatpush2.bf16.msra.mxu1 %v11895_v59 }
 0x6ac   :  { %6906 = vmatpush2.bf16.msra.mxu0 %v11943_v50  ;;  %6916 = vmatprep.subr.bf16.mxu1 %v11948_v1  ;;  %v11955_v50 = vld [vmem:[#allocation6 + $0x18c8] ss:$16 sps:$4 sm:$0xff]  }
 0x6ad   :  { %6957 = vmatprep.subr.bf16.mxu0 %v11951_v2  ;;  %v11961_v1 = vld [vmem:[#allocation6 + $0x18a8] ss:$16 sps:$4 sm:$0xff]   ;;  %v11969_v2 = vld [vmem:[#allocation6 + $0x188c] ss:$16 sps:$4 sm:$0xff]  }
 0x6ae   :  { %6067 = vmatmul.mubr.bf16.vlgmr.msra.gmra.mxu1 %v12918_v60  ;;  %v11960_v60 = vld [vmem:[#allocation6 + $0x1aa4] ss:$16 sps:$4 sm:$0xff]  }
 0x6af   :  { %6917 = vmatpush1.bf16.msra.mxu1 %v11946_v0  ;;  %v11963_v0 = vld [vmem:[#allocation6 + $0x18ac] ss:$16 sps:$4 sm:$0xff]  }
 0x6b0   :  { %6918 = vmatprep.subr.bf16.mxu1 %v11954_v4  ;;  %v11975_v4 = vld [vmem:[#allocation6 + $0x186c] ss:$16 sps:$4 sm:$0xff]  }
 0x6b3   :  { %6919 = vmatpush1.bf16.msra.mxu1 %v11952_v3  ;;  %v11967_v3 = vld [vmem:[#allocation6 + $0x1888] ss:$16 sps:$4 sm:$0xff]  }
 0x6b4   :  { %6920 = vmatprep.subr.bf16.mxu1 %v11960_v60  ;;  %v11981_v60 = vld [vmem:[#allocation6 + $0x184c] ss:$16 sps:$4 sm:$0xff]  }
 0x6b7   :  { %6921 = vmatpush1.bf16.msra.mxu1 %v11958_v61  ;;  %v11973_v61 = vld [vmem:[#allocation6 + $0x1868] ss:$16 sps:$4 sm:$0xff]  }
 0x6b8   :  { %6922 = vmatprep.subr.bf16.mxu1 %v11966_v7  ;;  %v11987_v7 = vld [vmem:[#allocation6 + $0x182c] ss:$16 sps:$4 sm:$0xff]  }
 0x6bb   :  { %6923 = vmatpush1.bf16.msra.mxu1 %v11964_v5  ;;  %v11979_v5 = vld [vmem:[#allocation6 + $0x1848] ss:$16 sps:$4 sm:$0xff]  }
 0x6bc   :  { %6924 = vmatprep.subr.bf16.mxu1 %v11972_v6  ;;  %v11993_v6 = vld [vmem:[#allocation6 + $0x180c] ss:$16 sps:$4 sm:$0xff]  }
 0x6bf   :  { %6925 = vmatpush1.bf16.msra.mxu1 %v11970_v8  ;;  %v11985_v8 = vld [vmem:[#allocation6 + $0x1828] ss:$16 sps:$4 sm:$0xff]  }
 0x6c0   :  { %6926 = vmatprep.subr.bf16.mxu1 %v11978_v11  ;;  %v11999_v11 = vld [vmem:[#allocation6 + $0x19ec] ss:$16 sps:$4 sm:$0xff]  }
 0x6c3   :  { %6927 = vmatpush1.bf16.msra.mxu1 %v11976_v9  ;;  %v11991_v9 = vld [vmem:[#allocation6 + $0x1808] ss:$16 sps:$4 sm:$0xff]  }
 0x6c4   :  { %6928 = vmatprep.subr.bf16.mxu1 %v11984_v13  ;;  %v12005_v13 = vld [vmem:[#allocation6 + $0x19cc] ss:$16 sps:$4 sm:$0xff]  }
 0x6c7   :  { %6929 = vmatpush1.bf16.msra.mxu1 %v11982_v12  ;;  %v11997_v12 = vld [vmem:[#allocation6 + $0x19e8] ss:$16 sps:$4 sm:$0xff]  }
 0x6c8   :  { %6930 = vmatprep.subr.bf16.mxu1 %v11990_v17  ;;  %v12011_v17 = vld [vmem:[#allocation6 + $0x19ac] ss:$16 sps:$4 sm:$0xff]  }
 0x6cb   :  { %6931 = vmatpush1.bf16.msra.mxu1 %v11988_v14  ;;  %v12003_v14 = vld [vmem:[#allocation6 + $0x19c8] ss:$16 sps:$4 sm:$0xff]  }
 0x6cc   :  { %6932 = vmatprep.subr.bf16.mxu1 %v11996_v19  ;;  %v12017_v19 = vld [vmem:[#allocation6 + $0x198c] ss:$16 sps:$4 sm:$0xff]  }
 0x6cf   :  { %6933 = vmatpush2.bf16.msra.mxu1 %v11994_v18  ;;  %v12009_v18 = vld [vmem:[#allocation6 + $0x19a8] ss:$16 sps:$4 sm:$0xff]  }
 0x6d0   :  { %6934 = vmatprep.subr.bf16.mxu1 %v12002_v22  ;;  %v12023_v22 = vld [vmem:[#allocation6 + $0x196c] ss:$16 sps:$4 sm:$0xff]  }
 0x6d3   :  { %6935 = vmatpush2.bf16.msra.mxu1 %v12000_v20  ;;  %v12015_v20 = vld [vmem:[#allocation6 + $0x1988] ss:$16 sps:$4 sm:$0xff]  }
 0x6d4   :  { %6936 = vmatprep.subr.bf16.mxu1 %v12008_v23  ;;  %v12029_v23 = vld [vmem:[#allocation6 + $0x194c] ss:$16 sps:$4 sm:$0xff]  }
 0x6d7   :  { %6937 = vmatpush2.bf16.msra.mxu1 %v12006_v10  ;;  %v12021_v10 = vld [vmem:[#allocation6 + $0x1968] ss:$16 sps:$4 sm:$0xff]  }
 0x6d8   :  { %6938 = vmatprep.subr.bf16.mxu1 %v12014_v27  ;;  %v12027_v27 = vld [vmem:[#allocation6 + $0x1948] ss:$16 sps:$4 sm:$0xff]  }
 0x6db   :  { %6939 = vmatpush2.bf16.msra.mxu1 %v12012_v26  ;;  %v5262_v26 = vrot.slane %v12923_v42, %v12795_v21 }
 0x6dc   :  { %6940 = vmatprep.subr.bf16.mxu1 %v12020_v28  ;;  %v5266_v28 = vrot.slane %v12923_v42, %v12797_v24 }
 0x6df   :  { %6941 = vmatpush2.bf16.msra.mxu1 %v12018_v25  ;;  %v12035_v25 = vld [vmem:[#allocation6 + $0x192c] ss:$16 sps:$4 sm:$0xff]  }
 0x6e0   :  { %6942 = vmatprep.subr.bf16.mxu1 %v12026_v31  ;;  %v12033_v31 = vld [vmem:[#allocation6 + $0x1928] ss:$16 sps:$4 sm:$0xff]  }
 0x6e3   :  { %6943 = vmatpush2.bf16.msra.mxu1 %v12024_v30 }
 0x6e4   :  { %6944 = vmatprep.subr.bf16.mxu1 %v12032_v32 }
 0x6e7   :  { %6945 = vmatpush2.bf16.msra.mxu1 %v12030_v35 }
 0x6e8   :  { %6946 = vmatprep.subr.bf16.mxu1 %v12038_v37 }
 0x6eb   :  { %6947 = vmatpush2.bf16.msra.mxu1 %v12036_v39  ;;  %v12039_v39 = vld [vmem:[#allocation6 + $0x1908] ss:$16 sps:$4 sm:$0xff]  }
 0x6ec   :  { %6998 = vmatprep.subr.bf16.mxu1 %v12044_v40 }
 0x6ee   :  { %v5945_v33 = vpop.f32.mrf.mxu0 }
 0x6ef   :  { %v5946_v44 = vadd.f32 %v5945_v33, %v5254_v43  ;;  %v12041_v33 = vld [vmem:[#allocation6 + $0x190c] ss:$16 sps:$4 sm:$0xff]  }
 0x6f0   :  { %v5947_v36 = vpop.f32.mrf.mxu0 }
 0x6f1   :  { %v5948_v48 = vadd.f32 %v5947_v36, %v5258_v41 }
 0x6f2   :  { %v5949_v38 = vpop.f32.mrf.mxu0 }
 0x6f4   :  { %v5950_v29 = vpop.f32.mrf.mxu0 }
 0x72e   :  { %v5986_v46 = vpop.f32.mrf.mxu1  ;;  %v12929_v47 = vpop.f32.mrf.mxu0 }
 0x72f   :  { %v5987_v49 = vadd.f32 %v5986_v46, %v5946_v44  ;;  %v6028_v30 = vadd.f32 %v12929_v47, %v5262_v26  ;;  %v12042_v44 = vld [vmem:[#allocation6 + $0x1ae8] ss:$16 sps:$4 sm:$0xff]   ;;  %v12047_v47 = vld [vmem:[#allocation6 + $0x1acc] ss:$16 sps:$4 sm:$0xff]  }
 0x730   :  { %v5988_v51 = vpop.f32.mrf.mxu1  ;;  %v12931_v52 = vpop.f32.mrf.mxu0  ;;  %v12075_v26 = vld [vmem:[#allocation6 + $0x1b88] ss:$16 sps:$4 sm:$0xff]  }
 0x731   :  { %v5989_v54 = vadd.f32 %v5988_v51, %v5948_v48  ;;  %v6075_v55 = vmax.f32 %v5987_v49, 0.0  ;;  %v6030_v35 = vadd.f32 %v12931_v52, %v5266_v28  ;;  %v12045_v48 = vld [vmem:[#allocation6 + $0x1ac8] ss:$16 sps:$4 sm:$0xff]   ;;  %v12050_v49 = vld [vmem:[#allocation6 + $0x1aac] ss:$16 sps:$4 sm:$0xff]  }
 0x732   :  { %v5990_v56 = vpop.f32.mrf.mxu1  ;;  %v6031_v45 = vpop.f32.mrf.mxu0  ;;  %v12048_v51 = vld [vmem:[#allocation6 + $0x1aa8] ss:$16 sps:$4 sm:$0xff]   ;;  %v12053_v52 = vld [vmem:[#allocation6 + $0x1a8c] ss:$16 sps:$4 sm:$0xff]   ;;  %v12122_v28 = vld [vmem:[#allocation6 + $0x1da4] ss:$16 sps:$4 sm:$0xff]  }
 0x733   :  { %v6076_v34 = vmax.f32 %v5989_v54, 0.0  ;;  %v12933_v62 = vpack.c.bf16 %v6075_v55, %v6075_v55  ;;  %v12090_v54 = vld [vmem:[#allocation6 + $0x1ce0] ss:$16 sps:$4 sm:$0xff]   ;;  %v12092_v55 = vld [vmem:[#allocation6 + $0x1ce4] ss:$16 sps:$4 sm:$0xff]  }
 0x734   :  { %v5991_v58 = vpop.f32.mrf.mxu1  ;;  %v6032_v59 = vpop.f32.mrf.mxu0  ;;  %v12095_v56 = vld [vmem:[#allocation6 + $0x1cc4] ss:$16 sps:$4 sm:$0xff]   ;;  %v12051_v45 = vld [vmem:[#allocation6 + $0x1a88] ss:$16 sps:$4 sm:$0xff]  }
 0x735   :  { %v6080_v57 = vpack.c.bf16 %v6076_v34, %v6076_v34  ;;  %v12093_v34 = vld [vmem:[#allocation6 + $0x1cc0] ss:$16 sps:$4 sm:$0xff]   ;;  %v12056_v58 = vld [vmem:[#allocation6 + $0x1a6c] ss:$16 sps:$4 sm:$0xff]   ;;  %v12098_v59 = vld [vmem:[#allocation6 + $0x1ca4] ss:$16 sps:$4 sm:$0xff]  }
 0x737   :  { %6907 = vmatprep.mubr.bf16.mxu0 %v6080_v57 }
 0x738   :  { %6908 = vmatmul.mubr.bf16.vlgmr.msra.gmra.mxu0 %v12933_v62 }
 0x739   :  { %6958 = vmatpush1.bf16.msra.mxu0 %v11949_v53  ;;  %6989 = vmatprep.mubr.bf16.mxu0 %v6080_v57  ;;  %v12054_v57 = vld [vmem:[#allocation6 + $0x1a68] ss:$16 sps:$4 sm:$0xff]   ;;  %v12096_v53 = vld [vmem:[#allocation6 + $0x1ca0] ss:$16 sps:$4 sm:$0xff]  }
 0x73a   :  { %6959 = vmatprep.subr.bf16.mxu0 %v11957_v63  ;;  %v12101_v63 = vld [vmem:[#allocation6 + $0x1c84] ss:$16 sps:$4 sm:$0xff]  }
 0x73d   :  { %6960 = vmatpush1.bf16.msra.mxu0 %v11955_v50  ;;  %v12057_v50 = vld [vmem:[#allocation6 + $0x1a48] ss:$16 sps:$4 sm:$0xff]  }
 0x73e   :  { %6961 = vmatprep.subr.bf16.mxu0 %v11963_v0  ;;  %v12099_v0 = vld [vmem:[#allocation6 + $0x1c80] ss:$16 sps:$4 sm:$0xff]  }
 0x741   :  { %6962 = vmatpush1.bf16.msra.mxu0 %v11961_v1  ;;  %v12062_v1 = vld [vmem:[#allocation6 + $0x1a2c] ss:$16 sps:$4 sm:$0xff]  }
 0x742   :  { %6963 = vmatprep.subr.bf16.mxu0 %v11969_v2  ;;  %v12104_v2 = vld [vmem:[#allocation6 + $0x1c64] ss:$16 sps:$4 sm:$0xff]  }
 0x745   :  { %6964 = vmatpush1.bf16.msra.mxu0 %v11967_v3  ;;  %v12060_v3 = vld [vmem:[#allocation6 + $0x1a28] ss:$16 sps:$4 sm:$0xff]  }
 0x746   :  { %6965 = vmatprep.subr.bf16.mxu0 %v11975_v4  ;;  %v12102_v4 = vld [vmem:[#allocation6 + $0x1c60] ss:$16 sps:$4 sm:$0xff]  }
 0x749   :  { %6966 = vmatpush1.bf16.msra.mxu0 %v11973_v61  ;;  %v12065_v61 = vld [vmem:[#allocation6 + $0x1a0c] ss:$16 sps:$4 sm:$0xff]  }
 0x74a   :  { %6967 = vmatprep.subr.bf16.mxu0 %v11981_v60  ;;  %v12107_v60 = vld [vmem:[#allocation6 + $0x1c44] ss:$16 sps:$4 sm:$0xff]  }
 0x74d   :  { %6968 = vmatpush1.bf16.msra.mxu0 %v11979_v5  ;;  %v12063_v5 = vld [vmem:[#allocation6 + $0x1a08] ss:$16 sps:$4 sm:$0xff]  }
 0x74e   :  { %6969 = vmatprep.subr.bf16.mxu0 %v11987_v7  ;;  %v12105_v7 = vld [vmem:[#allocation6 + $0x1c40] ss:$16 sps:$4 sm:$0xff]  }
 0x751   :  { %6970 = vmatpush1.bf16.msra.mxu0 %v11985_v8  ;;  %v12068_v8 = vld [vmem:[#allocation6 + $0x1bec] ss:$16 sps:$4 sm:$0xff]  }
 0x752   :  { %6971 = vmatprep.subr.bf16.mxu0 %v11993_v6  ;;  %v12110_v6 = vld [vmem:[#allocation6 + $0x1c24] ss:$16 sps:$4 sm:$0xff]  }
 0x755   :  { %6972 = vmatpush1.bf16.msra.mxu0 %v11991_v9  ;;  %v12066_v9 = vld [vmem:[#allocation6 + $0x1be8] ss:$16 sps:$4 sm:$0xff]  }
 0x756   :  { %6973 = vmatprep.subr.bf16.mxu0 %v11999_v11  ;;  %v12108_v11 = vld [vmem:[#allocation6 + $0x1c20] ss:$16 sps:$4 sm:$0xff]  }
 0x759   :  { %6974 = vmatpush2.bf16.msra.mxu0 %v11997_v12  ;;  %v12071_v12 = vld [vmem:[#allocation6 + $0x1bcc] ss:$16 sps:$4 sm:$0xff]  }
 0x75a   :  { %6975 = vmatprep.subr.bf16.mxu0 %v12005_v13  ;;  %v12113_v13 = vld [vmem:[#allocation6 + $0x1c04] ss:$16 sps:$4 sm:$0xff]  }
 0x75d   :  { %6976 = vmatpush2.bf16.msra.mxu0 %v12003_v14  ;;  %v12069_v14 = vld [vmem:[#allocation6 + $0x1bc8] ss:$16 sps:$4 sm:$0xff]  }
 0x75e   :  { %6977 = vmatprep.subr.bf16.mxu0 %v12011_v17  ;;  %v12111_v17 = vld [vmem:[#allocation6 + $0x1c00] ss:$16 sps:$4 sm:$0xff]  }
 0x761   :  { %6978 = vmatpush2.bf16.msra.mxu0 %v12009_v18  ;;  %v12074_v18 = vld [vmem:[#allocation6 + $0x1bac] ss:$16 sps:$4 sm:$0xff]  }
 0x762   :  { %6979 = vmatprep.subr.bf16.mxu0 %v12017_v19  ;;  %v12116_v19 = vld [vmem:[#allocation6 + $0x1de4] ss:$16 sps:$4 sm:$0xff]  }
 0x765   :  { %6980 = vmatpush2.bf16.msra.mxu0 %v12015_v20  ;;  %v12072_v20 = vld [vmem:[#allocation6 + $0x1ba8] ss:$16 sps:$4 sm:$0xff]  }
 0x766   :  { %6981 = vmatprep.subr.bf16.mxu0 %v12023_v22  ;;  %v12114_v22 = vld [vmem:[#allocation6 + $0x1de0] ss:$16 sps:$4 sm:$0xff]  }
 0x769   :  { %6982 = vmatpush2.bf16.msra.mxu0 %v12021_v10  ;;  %v12077_v10 = vld [vmem:[#allocation6 + $0x1b8c] ss:$16 sps:$4 sm:$0xff]  }
 0x76a   :  { %6983 = vmatprep.subr.bf16.mxu0 %v12029_v23  ;;  %v12119_v23 = vld [vmem:[#allocation6 + $0x1dc4] ss:$16 sps:$4 sm:$0xff]  }
 0x76d   :  { %6984 = vmatpush2.bf16.msra.mxu0 %v12027_v27  ;;  %v12117_v27 = vld [vmem:[#allocation6 + $0x1dc0] ss:$16 sps:$4 sm:$0xff]  }
 0x76e   :  { %v6068_v32 = vpop.f32.mrf.mxu1  ;;  %6985 = vmatprep.subr.bf16.mxu0 %v12035_v25  ;;  %v12080_v25 = vld [vmem:[#allocation6 + $0x1b6c] ss:$16 sps:$4 sm:$0xff]  }
 0x76f   :  { %v6069_v36 = vadd.f32 %v6068_v32, %v6028_v30  ;;  %v12078_v30 = vld [vmem:[#allocation6 + $0x1b68] ss:$16 sps:$4 sm:$0xff]   ;;  %v12083_v32 = vld [vmem:[#allocation6 + $0x1b4c] ss:$16 sps:$4 sm:$0xff]  }
 0x770   :  { %v6070_v37 = vpop.f32.mrf.mxu1 }
 0x771   :  { %v6071_v38 = vadd.f32 %v6070_v37, %v6030_v35  ;;  %6986 = vmatpush2.bf16.msra.mxu0 %v12033_v31  ;;  %v6077_v29 = vmax.f32 %v6069_v36, 0.0  ;;  %v12120_v31 = vld [vmem:[#allocation6 + $0x1da0] ss:$16 sps:$4 sm:$0xff]   ;;  %v12081_v35 = vld [vmem:[#allocation6 + $0x1b48] ss:$16 sps:$4 sm:$0xff]  }
 0x772   :  { %v6072_v40 = vpop.f32.mrf.mxu1  ;;  %6987 = vmatprep.subr.bf16.mxu0 %v12041_v33  ;;  %v12125_v33 = vld [vmem:[#allocation6 + $0x1d84] ss:$16 sps:$4 sm:$0xff]   ;;  %v12123_v36 = vld [vmem:[#allocation6 + $0x1d80] ss:$16 sps:$4 sm:$0xff]   ;;  %v12086_v37 = vld [vmem:[#allocation6 + $0x1b2c] ss:$16 sps:$4 sm:$0xff]  }
 0x773   :  { %v6078_v43 = vmax.f32 %v6071_v38, 0.0  ;;  %v12942_v46 = vpack.c.bf16 %v6077_v29, %v6077_v29  ;;  %v12128_v38 = vld [vmem:[#allocation6 + $0x1d64] ss:$16 sps:$4 sm:$0xff]   ;;  %v12126_v29 = vld [vmem:[#allocation6 + $0x1d60] ss:$16 sps:$4 sm:$0xff]  }
 0x774   :  { %v6073_v41 = vpop.f32.mrf.mxu1  ;;  %v12089_v40 = vld [vmem:[#allocation6 + $0x1b0c] ss:$16 sps:$4 sm:$0xff]  }
 0x775   :  { %v6082_v42 = vpack.c.bf16 %v6078_v43, %v6078_v43  ;;  %6988 = vmatpush2.bf16.msra.mxu0 %v12039_v39  ;;  %v12084_v39 = vld [vmem:[#allocation6 + $0x1b28] ss:$16 sps:$4 sm:$0xff]   ;;  %v12131_v43 = vld [vmem:[#allocation6 + $0x1d44] ss:$16 sps:$4 sm:$0xff]  }
 0x776   :  { %7839 = vmatprep.subr.bf16.mxu0 %v12092_v55  ;;  %v12087_v41 = vld [vmem:[#allocation6 + $0x1b08] ss:$16 sps:$4 sm:$0xff]   ;;  %v12144_v55 = vld [vmem:[#allocation6 + $0x1ec0] ss:$16 sps:$4 sm:$0xff]  }
 0x777   :  { %6948 = vmatprep.mubr.bf16.mxu1 %v6082_v42 }
 0x778   :  { %6949 = vmatmul.mubr.bf16.vlgmr.msra.gmra.mxu1 %v12942_v46  ;;  %6990 = vmatmul.mubr.bf16.vlgmr.msra.gmra.mxu0 %v12933_v62  ;;  %v12059_v62 = vld [vmem:[#allocation6 + $0x1a4c] ss:$16 sps:$4 sm:$0xff]  }
 0x779   :  { %6999 = vmatpush1.bf16.msra.mxu1 %v12042_v44  ;;  %7030 = vmatprep.mubr.bf16.mxu1 %v6082_v42  ;;  %v12129_v42 = vld [vmem:[#allocation6 + $0x1d40] ss:$16 sps:$4 sm:$0xff]   ;;  %v12134_v44 = vld [vmem:[#allocation6 + $0x1d24] ss:$16 sps:$4 sm:$0xff]  }
 0x77a   :  { %7000 = vmatprep.subr.bf16.mxu1 %v12047_v47  ;;  %7840 = vmatpush1.bf16.msra.mxu0 %v12090_v54  ;;  %v12132_v47 = vld [vmem:[#allocation6 + $0x1d20] ss:$16 sps:$4 sm:$0xff]   ;;  %v12143_v54 = vld [vmem:[#allocation6 + $0x1cec] ss:$16 sps:$4 sm:$0xff]  }
 0x77b   :  { %7841 = vmatprep.subr.bf16.mxu0 %v12095_v56  ;;  %v12146_v56 = vld [vmem:[#allocation6 + $0x1ec4] ss:$16 sps:$4 sm:$0xff]  }
 0x77d   :  { %7001 = vmatpush1.bf16.msra.mxu1 %v12045_v48  ;;  %v12137_v48 = vld [vmem:[#allocation6 + $0x1d04] ss:$16 sps:$4 sm:$0xff]  }
 0x77e   :  { %7002 = vmatprep.subr.bf16.mxu1 %v12050_v49  ;;  %7842 = vmatpush1.bf16.msra.mxu0 %v12093_v34  ;;  %v12135_v49 = vld [vmem:[#allocation6 + $0x1d00] ss:$16 sps:$4 sm:$0xff]  }
 0x77f   :  { %7843 = vmatprep.subr.bf16.mxu0 %v12098_v59  ;;  %v12156_v34 = vld [vmem:[#allocation6 + $0x1e80] ss:$16 sps:$4 sm:$0xff]  }
 0x780   :  { %v12162_v59 = vld [vmem:[#allocation6 + $0x1e60] ss:$16 sps:$4 sm:$0xff]  }
 0x781   :  { %7003 = vmatpush1.bf16.msra.mxu1 %v12048_v51  ;;  %v12138_v51 = vld [vmem:[#allocation6 + $0x1ee0] ss:$16 sps:$4 sm:$0xff]  }
 0x782   :  { %7004 = vmatprep.subr.bf16.mxu1 %v12053_v52  ;;  %7844 = vmatpush1.bf16.msra.mxu0 %v12096_v53  ;;  %v12140_v52 = vld [vmem:[#allocation6 + $0x1ee4] ss:$16 sps:$4 sm:$0xff]   ;;  %v12168_v53 = vld [vmem:[#allocation6 + $0x1e40] ss:$16 sps:$4 sm:$0xff]  }
 0x783   :  { %7845 = vmatprep.subr.bf16.mxu0 %v12101_v63  ;;  %v12174_v63 = vld [vmem:[#allocation6 + $0x1e20] ss:$16 sps:$4 sm:$0xff]  }
 0x785   :  { %7005 = vmatpush1.bf16.msra.mxu1 %v12051_v45  ;;  %v12150_v45 = vld [vmem:[#allocation6 + $0x1ea0] ss:$16 sps:$4 sm:$0xff]  }
 0x786   :  { %7006 = vmatprep.subr.bf16.mxu1 %v12056_v58  ;;  %7846 = vmatpush1.bf16.msra.mxu0 %v12099_v0  ;;  %v12158_v58 = vld [vmem:[#allocation6 + $0x1e84] ss:$16 sps:$4 sm:$0xff]   ;;  %v12180_v0 = vld [vmem:[#allocation6 + $0x1e00] ss:$16 sps:$4 sm:$0xff]  }
 0x787   :  { %7847 = vmatprep.subr.bf16.mxu0 %v12104_v2  ;;  %v12186_v2 = vld [vmem:[#allocation6 + $0x1fe0] ss:$16 sps:$4 sm:$0xff]  }
 0x789   :  { %7007 = vmatpush1.bf16.msra.mxu1 %v12054_v57  ;;  %v12164_v57 = vld [vmem:[#allocation6 + $0x1e64] ss:$16 sps:$4 sm:$0xff]  }
 0x78a   :  { %7008 = vmatprep.subr.bf16.mxu1 %v12059_v62  ;;  %7848 = vmatpush1.bf16.msra.mxu0 %v12102_v4  ;;  %v12170_v62 = vld [vmem:[#allocation6 + $0x1e44] ss:$16 sps:$4 sm:$0xff]   ;;  %v12192_v4 = vld [vmem:[#allocation6 + $0x1fc0] ss:$16 sps:$4 sm:$0xff]  }
 0x78b   :  { %7849 = vmatprep.subr.bf16.mxu0 %v12107_v60  ;;  %v12198_v60 = vld [vmem:[#allocation6 + $0x1fa0] ss:$16 sps:$4 sm:$0xff]  }
 0x78d   :  { %7009 = vmatpush1.bf16.msra.mxu1 %v12057_v50  ;;  %v12176_v50 = vld [vmem:[#allocation6 + $0x1e24] ss:$16 sps:$4 sm:$0xff]  }
 0x78e   :  { %7010 = vmatprep.subr.bf16.mxu1 %v12062_v1  ;;  %7850 = vmatpush1.bf16.msra.mxu0 %v12105_v7  ;;  %v12182_v1 = vld [vmem:[#allocation6 + $0x1e04] ss:$16 sps:$4 sm:$0xff]   ;;  %v12204_v7 = vld [vmem:[#allocation6 + $0x1f80] ss:$16 sps:$4 sm:$0xff]  }
 0x78f   :  { %7851 = vmatprep.subr.bf16.mxu0 %v12110_v6  ;;  %v12210_v6 = vld [vmem:[#allocation6 + $0x1f60] ss:$16 sps:$4 sm:$0xff]  }
 0x791   :  { %7011 = vmatpush1.bf16.msra.mxu1 %v12060_v3  ;;  %v12188_v3 = vld [vmem:[#allocation6 + $0x1fe4] ss:$16 sps:$4 sm:$0xff]  }
 0x792   :  { %7012 = vmatprep.subr.bf16.mxu1 %v12065_v61  ;;  %7852 = vmatpush1.bf16.msra.mxu0 %v12108_v11  ;;  %v12194_v61 = vld [vmem:[#allocation6 + $0x1fc4] ss:$16 sps:$4 sm:$0xff]   ;;  %v12216_v11 = vld [vmem:[#allocation6 + $0x1f40] ss:$16 sps:$4 sm:$0xff]  }
 0x793   :  { %7853 = vmatprep.subr.bf16.mxu0 %v12113_v13  ;;  %v12224_v13 = vld [vmem:[#allocation6 + $0x1f24] ss:$16 sps:$4 sm:$0xff]  }
 0x795   :  { %7013 = vmatpush1.bf16.msra.mxu1 %v12063_v5  ;;  %v12200_v5 = vld [vmem:[#allocation6 + $0x1fa4] ss:$16 sps:$4 sm:$0xff]  }
 0x796   :  { %7014 = vmatprep.subr.bf16.mxu1 %v12068_v8  ;;  %7854 = vmatpush1.bf16.msra.mxu0 %v12111_v17  ;;  %v12206_v8 = vld [vmem:[#allocation6 + $0x1f84] ss:$16 sps:$4 sm:$0xff]   ;;  %v12222_v17 = vld [vmem:[#allocation6 + $0x1f20] ss:$16 sps:$4 sm:$0xff]  }
 0x797   :  { %7855 = vmatprep.subr.bf16.mxu0 %v12116_v19  ;;  %v12230_v19 = vld [vmem:[#allocation6 + $0x1f04] ss:$16 sps:$4 sm:$0xff]  }
 0x799   :  { %7015 = vmatpush2.bf16.msra.mxu1 %v12066_v9  ;;  %v12212_v9 = vld [vmem:[#allocation6 + $0x1f64] ss:$16 sps:$4 sm:$0xff]  }
 0x79a   :  { %7016 = vmatprep.subr.bf16.mxu1 %v12071_v12  ;;  %7856 = vmatpush2.bf16.msra.mxu0 %v12114_v22  ;;  %v12218_v12 = vld [vmem:[#allocation6 + $0x1f44] ss:$16 sps:$4 sm:$0xff]   ;;  %v12228_v22 = vld [vmem:[#allocation6 + $0x1f00] ss:$16 sps:$4 sm:$0xff]  }
 0x79b   :  { %7857 = vmatprep.subr.bf16.mxu0 %v12119_v23  ;;  %v12236_v23 = vld [vmem:[#allocation6 + $0x1eec] ss:$16 sps:$4 sm:$0xff]  }
 0x79d   :  { %7017 = vmatpush2.bf16.msra.mxu1 %v12069_v14 }
 0x79e   :  { %7018 = vmatprep.subr.bf16.mxu1 %v12074_v18  ;;  %7858 = vmatpush2.bf16.msra.mxu0 %v12117_v27 }
 0x79f   :  { %7859 = vmatprep.subr.bf16.mxu0 %v12122_v28 }
 0x7a1   :  { %7019 = vmatpush2.bf16.msra.mxu1 %v12072_v20 }
 0x7a2   :  { %7020 = vmatprep.subr.bf16.mxu1 %v12077_v10  ;;  %7860 = vmatpush2.bf16.msra.mxu0 %v12120_v31 }
 0x7a3   :  { %7861 = vmatprep.subr.bf16.mxu0 %v12125_v33 }
 0x7a5   :  { %7021 = vmatpush2.bf16.msra.mxu1 %v12075_v26  ;;  %v12947_v26 = vld [vmem:[#allocation7 + $0x18] sm:$0xf] }
 0x7a6   :  { %7022 = vmatprep.subr.bf16.mxu1 %v12080_v25  ;;  %7862 = vmatpush2.bf16.msra.mxu0 %v12123_v36  ;;  %v6218_v27 = vrot.slane %v12947_v26, %v12789_v15  ;;  %v6222_v25 = vrot.slane %v12947_v26, %v12791_v16 }
 0x7a7   :  { %7863 = vmatprep.subr.bf16.mxu0 %v12128_v38 }
 0x7a9   :  { %7023 = vmatpush2.bf16.msra.mxu1 %v12078_v30 }
 0x7aa   :  { %7024 = vmatprep.subr.bf16.mxu1 %v12083_v32  ;;  %7864 = vmatpush2.bf16.msra.mxu0 %v12126_v29 }
 0x7ab   :  { %7865 = vmatprep.subr.bf16.mxu0 %v12131_v43 }
 0x7ad   :  { %7025 = vmatpush2.bf16.msra.mxu1 %v12081_v35 }
 0x7ae   :  { %7026 = vmatprep.subr.bf16.mxu1 %v12086_v37  ;;  %7866 = vmatpush2.bf16.msra.mxu0 %v12129_v42 }
 0x7af   :  { %7867 = vmatprep.subr.bf16.mxu0 %v12134_v44  ;;  %v12141_v44 = vld [vmem:[#allocation6 + $0x1ce8] ss:$16 sps:$4 sm:$0xff]  }
 0x7b1   :  { %7027 = vmatpush2.bf16.msra.mxu1 %v12084_v39 }
 0x7b2   :  { %7028 = vmatprep.subr.bf16.mxu1 %v12089_v40  ;;  %7868 = vmatpush2.bf16.msra.mxu0 %v12132_v47 }
 0x7b3   :  { %7869 = vmatprep.subr.bf16.mxu0 %v12137_v48  ;;  %v12149_v48 = vld [vmem:[#allocation6 + $0x1ccc] ss:$16 sps:$4 sm:$0xff]  }
 0x7b5   :  { %7029 = vmatpush2.bf16.msra.mxu1 %v12087_v41 }
 0x7b6   :  { %7870 = vmatpush2.bf16.msra.mxu0 %v12135_v49  ;;  %7880 = vmatprep.subr.bf16.mxu1 %v12140_v52  ;;  %v12147_v49 = vld [vmem:[#allocation6 + $0x1cc8] ss:$16 sps:$4 sm:$0xff]  }
 0x7b7   :  { %7921 = vmatprep.subr.bf16.mxu0 %v12143_v54  ;;  %v12153_v52 = vld [vmem:[#allocation6 + $0x1ca8] ss:$16 sps:$4 sm:$0xff]   ;;  %v12161_v54 = vld [vmem:[#allocation6 + $0x1c8c] ss:$16 sps:$4 sm:$0xff]  }
 0x7b8   :  { %7031 = vmatmul.mubr.bf16.vlgmr.msra.gmra.mxu1 %v12942_v46  ;;  %v12152_v46 = vld [vmem:[#allocation6 + $0x1ea4] ss:$16 sps:$4 sm:$0xff]  }
 0x7b9   :  { %7881 = vmatpush1.bf16.msra.mxu1 %v12138_v51  ;;  %v12155_v51 = vld [vmem:[#allocation6 + $0x1cac] ss:$16 sps:$4 sm:$0xff]  }
 0x7ba   :  { %7882 = vmatprep.subr.bf16.mxu1 %v12146_v56  ;;  %v12167_v56 = vld [vmem:[#allocation6 + $0x1c6c] ss:$16 sps:$4 sm:$0xff]  }
 0x7bd   :  { %7883 = vmatpush1.bf16.msra.mxu1 %v12144_v55  ;;  %v12159_v55 = vld [vmem:[#allocation6 + $0x1c88] ss:$16 sps:$4 sm:$0xff]  }
 0x7be   :  { %7884 = vmatprep.subr.bf16.mxu1 %v12152_v46  ;;  %v12173_v46 = vld [vmem:[#allocation6 + $0x1c4c] ss:$16 sps:$4 sm:$0xff]  }
 0x7c1   :  { %7885 = vmatpush1.bf16.msra.mxu1 %v12150_v45  ;;  %v12165_v45 = vld [vmem:[#allocation6 + $0x1c68] ss:$16 sps:$4 sm:$0xff]  }
 0x7c2   :  { %7886 = vmatprep.subr.bf16.mxu1 %v12158_v58  ;;  %v12179_v58 = vld [vmem:[#allocation6 + $0x1c2c] ss:$16 sps:$4 sm:$0xff]  }
 0x7c5   :  { %7887 = vmatpush1.bf16.msra.mxu1 %v12156_v34  ;;  %v12171_v34 = vld [vmem:[#allocation6 + $0x1c48] ss:$16 sps:$4 sm:$0xff]  }
 0x7c6   :  { %7888 = vmatprep.subr.bf16.mxu1 %v12164_v57  ;;  %v12185_v57 = vld [vmem:[#allocation6 + $0x1c0c] ss:$16 sps:$4 sm:$0xff]  }
 0x7c9   :  { %7889 = vmatpush1.bf16.msra.mxu1 %v12162_v59  ;;  %v12177_v59 = vld [vmem:[#allocation6 + $0x1c28] ss:$16 sps:$4 sm:$0xff]  }
 0x7ca   :  { %7890 = vmatprep.subr.bf16.mxu1 %v12170_v62  ;;  %v12191_v62 = vld [vmem:[#allocation6 + $0x1dec] ss:$16 sps:$4 sm:$0xff]  }
 0x7cd   :  { %7891 = vmatpush1.bf16.msra.mxu1 %v12168_v53  ;;  %v12183_v53 = vld [vmem:[#allocation6 + $0x1c08] ss:$16 sps:$4 sm:$0xff]  }
 0x7ce   :  { %7892 = vmatprep.subr.bf16.mxu1 %v12176_v50  ;;  %v12197_v50 = vld [vmem:[#allocation6 + $0x1dcc] ss:$16 sps:$4 sm:$0xff]  }
 0x7d1   :  { %7893 = vmatpush1.bf16.msra.mxu1 %v12174_v63  ;;  %v12189_v63 = vld [vmem:[#allocation6 + $0x1de8] ss:$16 sps:$4 sm:$0xff]  }
 0x7d2   :  { %7894 = vmatprep.subr.bf16.mxu1 %v12182_v1  ;;  %v12203_v1 = vld [vmem:[#allocation6 + $0x1dac] ss:$16 sps:$4 sm:$0xff]  }
 0x7d5   :  { %7895 = vmatpush1.bf16.msra.mxu1 %v12180_v0  ;;  %v12195_v0 = vld [vmem:[#allocation6 + $0x1dc8] ss:$16 sps:$4 sm:$0xff]  }
 0x7d6   :  { %7896 = vmatprep.subr.bf16.mxu1 %v12188_v3  ;;  %v12209_v3 = vld [vmem:[#allocation6 + $0x1d8c] ss:$16 sps:$4 sm:$0xff]  }
 0x7d9   :  { %7897 = vmatpush2.bf16.msra.mxu1 %v12186_v2  ;;  %v12201_v2 = vld [vmem:[#allocation6 + $0x1da8] ss:$16 sps:$4 sm:$0xff]  }
 0x7da   :  { %7898 = vmatprep.subr.bf16.mxu1 %v12194_v61  ;;  %v12215_v61 = vld [vmem:[#allocation6 + $0x1d6c] ss:$16 sps:$4 sm:$0xff]  }
 0x7dd   :  { %7899 = vmatpush2.bf16.msra.mxu1 %v12192_v4  ;;  %v12207_v4 = vld [vmem:[#allocation6 + $0x1d88] ss:$16 sps:$4 sm:$0xff]  }
 0x7de   :  { %7900 = vmatprep.subr.bf16.mxu1 %v12200_v5  ;;  %v12221_v5 = vld [vmem:[#allocation6 + $0x1d4c] ss:$16 sps:$4 sm:$0xff]  }
 0x7e1   :  { %7901 = vmatpush2.bf16.msra.mxu1 %v12198_v60  ;;  %v12213_v60 = vld [vmem:[#allocation6 + $0x1d68] ss:$16 sps:$4 sm:$0xff]  }
 0x7e2   :  { %7902 = vmatprep.subr.bf16.mxu1 %v12206_v8  ;;  %v12219_v8 = vld [vmem:[#allocation6 + $0x1d48] ss:$16 sps:$4 sm:$0xff]  }
 0x7e5   :  { %7903 = vmatpush2.bf16.msra.mxu1 %v12204_v7  ;;  %v6226_v7 = vrot.slane %v12947_v26, %v12795_v21 }
 0x7e6   :  { %7904 = vmatprep.subr.bf16.mxu1 %v12212_v9  ;;  %v6230_v9 = vrot.slane %v12947_v26, %v12797_v24 }
 0x7e9   :  { %7905 = vmatpush2.bf16.msra.mxu1 %v12210_v6  ;;  %v12227_v6 = vld [vmem:[#allocation6 + $0x1d2c] ss:$16 sps:$4 sm:$0xff]  }
 0x7ea   :  { %7906 = vmatprep.subr.bf16.mxu1 %v12218_v12  ;;  %v12225_v12 = vld [vmem:[#allocation6 + $0x1d28] ss:$16 sps:$4 sm:$0xff]  }
 0x7ed   :  { %7907 = vmatpush2.bf16.msra.mxu1 %v12216_v11 }
 0x7ee   :  { %7908 = vmatprep.subr.bf16.mxu1 %v12224_v13 }
 0x7f1   :  { %7909 = vmatpush2.bf16.msra.mxu1 %v12222_v17 }
 0x7f2   :  { %7910 = vmatprep.subr.bf16.mxu1 %v12230_v19 }
 0x7f5   :  { %7911 = vmatpush2.bf16.msra.mxu1 %v12228_v22  ;;  %v12231_v22 = vld [vmem:[#allocation6 + $0x1d08] ss:$16 sps:$4 sm:$0xff]  }
 0x7f6   :  { %7962 = vmatprep.subr.bf16.mxu1 %v12236_v23 }
 0x7f8   :  { %v6909_v14 = vpop.f32.mrf.mxu0 }
 0x7f9   :  { %v6910_v28 = vadd.f32 %v6909_v14, %v6218_v27  ;;  %v12233_v14 = vld [vmem:[#allocation6 + $0x1d0c] ss:$16 sps:$4 sm:$0xff]  }
 0x7fa   :  { %v6911_v18 = vpop.f32.mrf.mxu0 }
 0x7fb   :  { %v6912_v32 = vadd.f32 %v6911_v18, %v6222_v25 }
 0x7fc   :  { %v6913_v20 = vpop.f32.mrf.mxu0 }
 0x7fe   :  { %v6914_v10 = vpop.f32.mrf.mxu0 }
 0x838   :  { %v6950_v30 = vpop.f32.mrf.mxu1  ;;  %v12953_v31 = vpop.f32.mrf.mxu0 }
 0x839   :  { %v6951_v33 = vadd.f32 %v6950_v30, %v6910_v28  ;;  %v6992_v11 = vadd.f32 %v12953_v31, %v6226_v7  ;;  %v12234_v28 = vld [vmem:[#allocation6 + $0x1ee8] ss:$16 sps:$4 sm:$0xff]   ;;  %v12239_v31 = vld [vmem:[#allocation6 + $0x1ecc] ss:$16 sps:$4 sm:$0xff]  }
 0x83a   :  { %v6952_v35 = vpop.f32.mrf.mxu1  ;;  %v12955_v36 = vpop.f32.mrf.mxu0  ;;  %v12267_v7 = vld [vmem:[#allocation6 + $0x1f88] ss:$16 sps:$4 sm:$0xff]  }
 0x83b   :  { %v6953_v37 = vadd.f32 %v6952_v35, %v6912_v32  ;;  %v7039_v38 = vmax.f32 %v6951_v33, 0.0  ;;  %v6994_v17 = vadd.f32 %v12955_v36, %v6230_v9  ;;  %v12237_v32 = vld [vmem:[#allocation6 + $0x1ec8] ss:$16 sps:$4 sm:$0xff]   ;;  %v12242_v33 = vld [vmem:[#allocation6 + $0x1eac] ss:$16 sps:$4 sm:$0xff]  }
 0x83c   :  { %v6954_v39 = vpop.f32.mrf.mxu1  ;;  %v6995_v29 = vpop.f32.mrf.mxu0  ;;  %v12240_v35 = vld [vmem:[#allocation6 + $0x1ea8] ss:$16 sps:$4 sm:$0xff]   ;;  %v12245_v36 = vld [vmem:[#allocation6 + $0x1e8c] ss:$16 sps:$4 sm:$0xff]   ;;  %v12314_v9 = vld [vmem:[#allocation6 + $0x21a4] ss:$16 sps:$4 sm:$0xff]  }
 0x83d   :  { %v7040_v40 = vmax.f32 %v6953_v37, 0.0  ;;  %v12957_v47 = vpack.c.bf16 %v7039_v38, %v7039_v38  ;;  %v12282_v37 = vld [vmem:[#allocation6 + $0x20e0] ss:$16 sps:$4 sm:$0xff]   ;;  %v12284_v38 = vld [vmem:[#allocation6 + $0x20e4] ss:$16 sps:$4 sm:$0xff]  }
 0x83e   :  { %v6955_v43 = vpop.f32.mrf.mxu1  ;;  %v6996_v41 = vpop.f32.mrf.mxu0  ;;  %v12287_v39 = vld [vmem:[#allocation6 + $0x20c4] ss:$16 sps:$4 sm:$0xff]   ;;  %v12243_v29 = vld [vmem:[#allocation6 + $0x1e88] ss:$16 sps:$4 sm:$0xff]  }
 0x83f   :  { %v7044_v42 = vpack.c.bf16 %v7040_v40, %v7040_v40  ;;  %v12285_v40 = vld [vmem:[#allocation6 + $0x20c0] ss:$16 sps:$4 sm:$0xff]   ;;  %v12248_v43 = vld [vmem:[#allocation6 + $0x1e6c] ss:$16 sps:$4 sm:$0xff]   ;;  %v12290_v41 = vld [vmem:[#allocation6 + $0x20a4] ss:$16 sps:$4 sm:$0xff]  }
 0x841   :  { %7871 = vmatprep.mubr.bf16.mxu0 %v7044_v42 }
 0x842   :  { %7872 = vmatmul.mubr.bf16.vlgmr.msra.gmra.mxu0 %v12957_v47 }
 0x843   :  { %7922 = vmatpush1.bf16.msra.mxu0 %v12141_v44  ;;  %7953 = vmatprep.mubr.bf16.mxu0 %v7044_v42  ;;  %v12246_v42 = vld [vmem:[#allocation6 + $0x1e68] ss:$16 sps:$4 sm:$0xff]   ;;  %v12288_v44 = vld [vmem:[#allocation6 + $0x20a0] ss:$16 sps:$4 sm:$0xff]  }
 0x844   :  { %7923 = vmatprep.subr.bf16.mxu0 %v12149_v48  ;;  %v12293_v48 = vld [vmem:[#allocation6 + $0x2084] ss:$16 sps:$4 sm:$0xff]  }
 0x847   :  { %7924 = vmatpush1.bf16.msra.mxu0 %v12147_v49  ;;  %v12249_v49 = vld [vmem:[#allocation6 + $0x1e48] ss:$16 sps:$4 sm:$0xff]  }
 0x848   :  { %7925 = vmatprep.subr.bf16.mxu0 %v12155_v51  ;;  %v12291_v51 = vld [vmem:[#allocation6 + $0x2080] ss:$16 sps:$4 sm:$0xff]  }
 0x84b   :  { %7926 = vmatpush1.bf16.msra.mxu0 %v12153_v52  ;;  %v12254_v52 = vld [vmem:[#allocation6 + $0x1e2c] ss:$16 sps:$4 sm:$0xff]  }
 0x84c   :  { %7927 = vmatprep.subr.bf16.mxu0 %v12161_v54  ;;  %v12296_v54 = vld [vmem:[#allocation6 + $0x2064] ss:$16 sps:$4 sm:$0xff]  }
 0x84f   :  { %7928 = vmatpush1.bf16.msra.mxu0 %v12159_v55  ;;  %v12252_v55 = vld [vmem:[#allocation6 + $0x1e28] ss:$16 sps:$4 sm:$0xff]  }
 0x850   :  { %7929 = vmatprep.subr.bf16.mxu0 %v12167_v56  ;;  %v12294_v56 = vld [vmem:[#allocation6 + $0x2060] ss:$16 sps:$4 sm:$0xff]  }
 0x853   :  { %7930 = vmatpush1.bf16.msra.mxu0 %v12165_v45  ;;  %v12257_v45 = vld [vmem:[#allocation6 + $0x1e0c] ss:$16 sps:$4 sm:$0xff]  }
 0x854   :  { %7931 = vmatprep.subr.bf16.mxu0 %v12173_v46  ;;  %v12299_v46 = vld [vmem:[#allocation6 + $0x2044] ss:$16 sps:$4 sm:$0xff]  }
 0x857   :  { %7932 = vmatpush1.bf16.msra.mxu0 %v12171_v34  ;;  %v12255_v34 = vld [vmem:[#allocation6 + $0x1e08] ss:$16 sps:$4 sm:$0xff]  }
 0x858   :  { %7933 = vmatprep.subr.bf16.mxu0 %v12179_v58  ;;  %v12297_v58 = vld [vmem:[#allocation6 + $0x2040] ss:$16 sps:$4 sm:$0xff]  }
 0x85b   :  { %7934 = vmatpush1.bf16.msra.mxu0 %v12177_v59  ;;  %v12260_v59 = vld [vmem:[#allocation6 + $0x1fec] ss:$16 sps:$4 sm:$0xff]  }
 0x85c   :  { %7935 = vmatprep.subr.bf16.mxu0 %v12185_v57  ;;  %v12302_v57 = vld [vmem:[#allocation6 + $0x2024] ss:$16 sps:$4 sm:$0xff]  }
 0x85f   :  { %7936 = vmatpush1.bf16.msra.mxu0 %v12183_v53  ;;  %v12258_v53 = vld [vmem:[#allocation6 + $0x1fe8] ss:$16 sps:$4 sm:$0xff]  }
 0x860   :  { %7937 = vmatprep.subr.bf16.mxu0 %v12191_v62  ;;  %v12300_v62 = vld [vmem:[#allocation6 + $0x2020] ss:$16 sps:$4 sm:$0xff]  }
 0x863   :  { %7938 = vmatpush2.bf16.msra.mxu0 %v12189_v63  ;;  %v12263_v63 = vld [vmem:[#allocation6 + $0x1fcc] ss:$16 sps:$4 sm:$0xff]  }
 0x864   :  { %7939 = vmatprep.subr.bf16.mxu0 %v12197_v50  ;;  %v12305_v50 = vld [vmem:[#allocation6 + $0x2004] ss:$16 sps:$4 sm:$0xff]  }
 0x867   :  { %7940 = vmatpush2.bf16.msra.mxu0 %v12195_v0  ;;  %v12261_v0 = vld [vmem:[#allocation6 + $0x1fc8] ss:$16 sps:$4 sm:$0xff]  }
 0x868   :  { %7941 = vmatprep.subr.bf16.mxu0 %v12203_v1  ;;  %v12303_v1 = vld [vmem:[#allocation6 + $0x2000] ss:$16 sps:$4 sm:$0xff]  }
 0x86b   :  { %7942 = vmatpush2.bf16.msra.mxu0 %v12201_v2  ;;  %v12266_v2 = vld [vmem:[#allocation6 + $0x1fac] ss:$16 sps:$4 sm:$0xff]  }
 0x86c   :  { %7943 = vmatprep.subr.bf16.mxu0 %v12209_v3  ;;  %v12308_v3 = vld [vmem:[#allocation6 + $0x21e4] ss:$16 sps:$4 sm:$0xff]  }
 0x86f   :  { %7944 = vmatpush2.bf16.msra.mxu0 %v12207_v4  ;;  %v12264_v4 = vld [vmem:[#allocation6 + $0x1fa8] ss:$16 sps:$4 sm:$0xff]  }
 0x870   :  { %7945 = vmatprep.subr.bf16.mxu0 %v12215_v61  ;;  %v12306_v61 = vld [vmem:[#allocation6 + $0x21e0] ss:$16 sps:$4 sm:$0xff]  }
 0x873   :  { %7946 = vmatpush2.bf16.msra.mxu0 %v12213_v60  ;;  %v12269_v60 = vld [vmem:[#allocation6 + $0x1f8c] ss:$16 sps:$4 sm:$0xff]  }
 0x874   :  { %7947 = vmatprep.subr.bf16.mxu0 %v12221_v5  ;;  %v12311_v5 = vld [vmem:[#allocation6 + $0x21c4] ss:$16 sps:$4 sm:$0xff]  }
 0x877   :  { %7948 = vmatpush2.bf16.msra.mxu0 %v12219_v8  ;;  %v12309_v8 = vld [vmem:[#allocation6 + $0x21c0] ss:$16 sps:$4 sm:$0xff]  }
 0x878   :  { %v7032_v13 = vpop.f32.mrf.mxu1  ;;  %7949 = vmatprep.subr.bf16.mxu0 %v12227_v6  ;;  %v12272_v6 = vld [vmem:[#allocation6 + $0x1f6c] ss:$16 sps:$4 sm:$0xff]  }
 0x879   :  { %v7033_v18 = vadd.f32 %v7032_v13, %v6992_v11  ;;  %v12270_v11 = vld [vmem:[#allocation6 + $0x1f68] ss:$16 sps:$4 sm:$0xff]   ;;  %v12275_v13 = vld [vmem:[#allocation6 + $0x1f4c] ss:$16 sps:$4 sm:$0xff]  }
 0x87a   :  { %v7034_v19 = vpop.f32.mrf.mxu1 }
 0x87b   :  { %v7035_v20 = vadd.f32 %v7034_v19, %v6994_v17  ;;  %7950 = vmatpush2.bf16.msra.mxu0 %v12225_v12  ;;  %v7041_v10 = vmax.f32 %v7033_v18, 0.0  ;;  %v12312_v12 = vld [vmem:[#allocation6 + $0x21a0] ss:$16 sps:$4 sm:$0xff]   ;;  %v12273_v17 = vld [vmem:[#allocation6 + $0x1f48] ss:$16 sps:$4 sm:$0xff]  }
 0x87c   :  { %v7036_v23 = vpop.f32.mrf.mxu1  ;;  %7951 = vmatprep.subr.bf16.mxu0 %v12233_v14  ;;  %v12317_v14 = vld [vmem:[#allocation6 + $0x2184] ss:$16 sps:$4 sm:$0xff]   ;;  %v12315_v18 = vld [vmem:[#allocation6 + $0x2180] ss:$16 sps:$4 sm:$0xff]   ;;  %v12278_v19 = vld [vmem:[#allocation6 + $0x1f2c] ss:$16 sps:$4 sm:$0xff]  }
 0x87d   :  { %v7042_v27 = vmax.f32 %v7035_v20, 0.0  ;;  %v12966_v30 = vpack.c.bf16 %v7041_v10, %v7041_v10  ;;  %v12320_v20 = vld [vmem:[#allocation6 + $0x2164] ss:$16 sps:$4 sm:$0xff]   ;;  %v12318_v10 = vld [vmem:[#allocation6 + $0x2160] ss:$16 sps:$4 sm:$0xff]  }
 0x87e   :  { %v7037_v25 = vpop.f32.mrf.mxu1  ;;  %v12281_v23 = vld [vmem:[#allocation6 + $0x1f0c] ss:$16 sps:$4 sm:$0xff]  }
 0x87f   :  { %v7046_v26 = vpack.c.bf16 %v7042_v27, %v7042_v27  ;;  %7952 = vmatpush2.bf16.msra.mxu0 %v12231_v22  ;;  %v12276_v22 = vld [vmem:[#allocation6 + $0x1f28] ss:$16 sps:$4 sm:$0xff]   ;;  %v12323_v27 = vld [vmem:[#allocation6 + $0x2144] ss:$16 sps:$4 sm:$0xff]  }
 0x880   :  { %8803 = vmatprep.subr.bf16.mxu0 %v12284_v38  ;;  %v12279_v25 = vld [vmem:[#allocation6 + $0x1f08] ss:$16 sps:$4 sm:$0xff]   ;;  %v12336_v38 = vld [vmem:[#allocation6 + $0x22c0] ss:$16 sps:$4 sm:$0xff]  }
 0x881   :  { %7912 = vmatprep.mubr.bf16.mxu1 %v7046_v26 }
 0x882   :  { %7913 = vmatmul.mubr.bf16.vlgmr.msra.gmra.mxu1 %v12966_v30  ;;  %7954 = vmatmul.mubr.bf16.vlgmr.msra.gmra.mxu0 %v12957_v47  ;;  %v12251_v47 = vld [vmem:[#allocation6 + $0x1e4c] ss:$16 sps:$4 sm:$0xff]  }
 0x883   :  { %7963 = vmatpush1.bf16.msra.mxu1 %v12234_v28  ;;  %7994 = vmatprep.mubr.bf16.mxu1 %v7046_v26  ;;  %v12321_v26 = vld [vmem:[#allocation6 + $0x2140] ss:$16 sps:$4 sm:$0xff]   ;;  %v12326_v28 = vld [vmem:[#allocation6 + $0x2124] ss:$16 sps:$4 sm:$0xff]  }
 0x884   :  { %7964 = vmatprep.subr.bf16.mxu1 %v12239_v31  ;;  %8804 = vmatpush1.bf16.msra.mxu0 %v12282_v37  ;;  %v12324_v31 = vld [vmem:[#allocation6 + $0x2120] ss:$16 sps:$4 sm:$0xff]   ;;  %v12335_v37 = vld [vmem:[#allocation6 + $0x20ec] ss:$16 sps:$4 sm:$0xff]  }
 0x885   :  { %8805 = vmatprep.subr.bf16.mxu0 %v12287_v39  ;;  %v12338_v39 = vld [vmem:[#allocation6 + $0x22c4] ss:$16 sps:$4 sm:$0xff]  }
 0x887   :  { %7965 = vmatpush1.bf16.msra.mxu1 %v12237_v32  ;;  %v12329_v32 = vld [vmem:[#allocation6 + $0x2104] ss:$16 sps:$4 sm:$0xff]  }
 0x888   :  { %7966 = vmatprep.subr.bf16.mxu1 %v12242_v33  ;;  %8806 = vmatpush1.bf16.msra.mxu0 %v12285_v40  ;;  %v12327_v33 = vld [vmem:[#allocation6 + $0x2100] ss:$16 sps:$4 sm:$0xff]  }
 0x889   :  { %8807 = vmatprep.subr.bf16.mxu0 %v12290_v41  ;;  %v12348_v40 = vld [vmem:[#allocation6 + $0x2280] ss:$16 sps:$4 sm:$0xff]  }
 0x88a   :  { %v12354_v41 = vld [vmem:[#allocation6 + $0x2260] ss:$16 sps:$4 sm:$0xff]  }
 0x88b   :  { %7967 = vmatpush1.bf16.msra.mxu1 %v12240_v35  ;;  %v12330_v35 = vld [vmem:[#allocation6 + $0x22e0] ss:$16 sps:$4 sm:$0xff]  }
 0x88c   :  { %7968 = vmatprep.subr.bf16.mxu1 %v12245_v36  ;;  %8808 = vmatpush1.bf16.msra.mxu0 %v12288_v44  ;;  %v12332_v36 = vld [vmem:[#allocation6 + $0x22e4] ss:$16 sps:$4 sm:$0xff]   ;;  %v12360_v44 = vld [vmem:[#allocation6 + $0x2240] ss:$16 sps:$4 sm:$0xff]  }
 0x88d   :  { %8809 = vmatprep.subr.bf16.mxu0 %v12293_v48  ;;  %v12366_v48 = vld [vmem:[#allocation6 + $0x2220] ss:$16 sps:$4 sm:$0xff]  }
 0x88f   :  { %7969 = vmatpush1.bf16.msra.mxu1 %v12243_v29  ;;  %v12342_v29 = vld [vmem:[#allocation6 + $0x22a0] ss:$16 sps:$4 sm:$0xff]  }
 0x890   :  { %7970 = vmatprep.subr.bf16.mxu1 %v12248_v43  ;;  %8810 = vmatpush1.bf16.msra.mxu0 %v12291_v51  ;;  %v12350_v43 = vld [vmem:[#allocation6 + $0x2284] ss:$16 sps:$4 sm:$0xff]   ;;  %v12372_v51 = vld [vmem:[#allocation6 + $0x2200] ss:$16 sps:$4 sm:$0xff]  }
 0x891   :  { %8811 = vmatprep.subr.bf16.mxu0 %v12296_v54  ;;  %v12378_v54 = vld [vmem:[#allocation6 + $0x23e0] ss:$16 sps:$4 sm:$0xff]  }
 0x893   :  { %7971 = vmatpush1.bf16.msra.mxu1 %v12246_v42  ;;  %v12356_v42 = vld [vmem:[#allocation6 + $0x2264] ss:$16 sps:$4 sm:$0xff]  }
 0x894   :  { %7972 = vmatprep.subr.bf16.mxu1 %v12251_v47  ;;  %8812 = vmatpush1.bf16.msra.mxu0 %v12294_v56  ;;  %v12362_v47 = vld [vmem:[#allocation6 + $0x2244] ss:$16 sps:$4 sm:$0xff]   ;;  %v12384_v56 = vld [vmem:[#allocation6 + $0x23c0] ss:$16 sps:$4 sm:$0xff]  }
 0x895   :  { %8813 = vmatprep.subr.bf16.mxu0 %v12299_v46  ;;  %v12390_v46 = vld [vmem:[#allocation6 + $0x23a0] ss:$16 sps:$4 sm:$0xff]  }
 0x897   :  { %7973 = vmatpush1.bf16.msra.mxu1 %v12249_v49  ;;  %v12368_v49 = vld [vmem:[#allocation6 + $0x2224] ss:$16 sps:$4 sm:$0xff]  }
 0x898   :  { %7974 = vmatprep.subr.bf16.mxu1 %v12254_v52  ;;  %8814 = vmatpush1.bf16.msra.mxu0 %v12297_v58  ;;  %v12374_v52 = vld [vmem:[#allocation6 + $0x2204] ss:$16 sps:$4 sm:$0xff]   ;;  %v12396_v58 = vld [vmem:[#allocation6 + $0x2380] ss:$16 sps:$4 sm:$0xff]  }
 0x899   :  { %8815 = vmatprep.subr.bf16.mxu0 %v12302_v57  ;;  %v12402_v57 = vld [vmem:[#allocation6 + $0x2360] ss:$16 sps:$4 sm:$0xff]  }
 0x89b   :  { %7975 = vmatpush1.bf16.msra.mxu1 %v12252_v55  ;;  %v12380_v55 = vld [vmem:[#allocation6 + $0x23e4] ss:$16 sps:$4 sm:$0xff]  }
 0x89c   :  { %7976 = vmatprep.subr.bf16.mxu1 %v12257_v45  ;;  %8816 = vmatpush1.bf16.msra.mxu0 %v12300_v62  ;;  %v12386_v45 = vld [vmem:[#allocation6 + $0x23c4] ss:$16 sps:$4 sm:$0xff]   ;;  %v12408_v62 = vld [vmem:[#allocation6 + $0x2340] ss:$16 sps:$4 sm:$0xff]  }
 0x89d   :  { %8817 = vmatprep.subr.bf16.mxu0 %v12305_v50  ;;  %v12416_v50 = vld [vmem:[#allocation6 + $0x2324] ss:$16 sps:$4 sm:$0xff]  }
 0x89f   :  { %7977 = vmatpush1.bf16.msra.mxu1 %v12255_v34  ;;  %v12392_v34 = vld [vmem:[#allocation6 + $0x23a4] ss:$16 sps:$4 sm:$0xff]  }
 0x8a0   :  { %7978 = vmatprep.subr.bf16.mxu1 %v12260_v59  ;;  %8818 = vmatpush1.bf16.msra.mxu0 %v12303_v1  ;;  %v12398_v59 = vld [vmem:[#allocation6 + $0x2384] ss:$16 sps:$4 sm:$0xff]   ;;  %v12414_v1 = vld [vmem:[#allocation6 + $0x2320] ss:$16 sps:$4 sm:$0xff]  }
 0x8a1   :  { %8819 = vmatprep.subr.bf16.mxu0 %v12308_v3  ;;  %v12422_v3 = vld [vmem:[#allocation6 + $0x2304] ss:$16 sps:$4 sm:$0xff]  }
 0x8a3   :  { %7979 = vmatpush2.bf16.msra.mxu1 %v12258_v53  ;;  %v12404_v53 = vld [vmem:[#allocation6 + $0x2364] ss:$16 sps:$4 sm:$0xff]  }
 0x8a4   :  { %7980 = vmatprep.subr.bf16.mxu1 %v12263_v63  ;;  %8820 = vmatpush2.bf16.msra.mxu0 %v12306_v61  ;;  %v12410_v63 = vld [vmem:[#allocation6 + $0x2344] ss:$16 sps:$4 sm:$0xff]   ;;  %v12420_v61 = vld [vmem:[#allocation6 + $0x2300] ss:$16 sps:$4 sm:$0xff]  }
 0x8a5   :  { %8821 = vmatprep.subr.bf16.mxu0 %v12311_v5  ;;  %v12428_v5 = vld [vmem:[#allocation6 + $0x22ec] ss:$16 sps:$4 sm:$0xff]  }
 0x8a7   :  { %7981 = vmatpush2.bf16.msra.mxu1 %v12261_v0 }
 0x8a8   :  { %7982 = vmatprep.subr.bf16.mxu1 %v12266_v2  ;;  %8822 = vmatpush2.bf16.msra.mxu0 %v12309_v8 }
 0x8a9   :  { %8823 = vmatprep.subr.bf16.mxu0 %v12314_v9 }
 0x8ab   :  { %7983 = vmatpush2.bf16.msra.mxu1 %v12264_v4 }
 0x8ac   :  { %7984 = vmatprep.subr.bf16.mxu1 %v12269_v60  ;;  %8824 = vmatpush2.bf16.msra.mxu0 %v12312_v12 }
 0x8ad   :  { %8825 = vmatprep.subr.bf16.mxu0 %v12317_v14 }
 0x8af   :  { %7985 = vmatpush2.bf16.msra.mxu1 %v12267_v7  ;;  %v12971_v7 = vld [vmem:[#allocation7 + $0x1c] sm:$0xf] }
 0x8b0   :  { %7986 = vmatprep.subr.bf16.mxu1 %v12272_v6  ;;  %8826 = vmatpush2.bf16.msra.mxu0 %v12315_v18  ;;  %v7182_v8 = vrot.slane %v12971_v7, %v12789_v15  ;;  %v7186_v6 = vrot.slane %v12971_v7, %v12791_v16 }
 0x8b1   :  { %8827 = vmatprep.subr.bf16.mxu0 %v12320_v20 }
 0x8b3   :  { %7987 = vmatpush2.bf16.msra.mxu1 %v12270_v11 }
 0x8b4   :  { %7988 = vmatprep.subr.bf16.mxu1 %v12275_v13  ;;  %8828 = vmatpush2.bf16.msra.mxu0 %v12318_v10 }
 0x8b5   :  { %8829 = vmatprep.subr.bf16.mxu0 %v12323_v27 }
 0x8b7   :  { %7989 = vmatpush2.bf16.msra.mxu1 %v12273_v17 }
 0x8b8   :  { %7990 = vmatprep.subr.bf16.mxu1 %v12278_v19  ;;  %8830 = vmatpush2.bf16.msra.mxu0 %v12321_v26 }
 0x8b9   :  { %8831 = vmatprep.subr.bf16.mxu0 %v12326_v28  ;;  %v12333_v28 = vld [vmem:[#allocation6 + $0x20e8] ss:$16 sps:$4 sm:$0xff]  }
 0x8bb   :  { %7991 = vmatpush2.bf16.msra.mxu1 %v12276_v22 }
 0x8bc   :  { %7992 = vmatprep.subr.bf16.mxu1 %v12281_v23  ;;  %8832 = vmatpush2.bf16.msra.mxu0 %v12324_v31 }
 0x8bd   :  { %8833 = vmatprep.subr.bf16.mxu0 %v12329_v32  ;;  %v12341_v32 = vld [vmem:[#allocation6 + $0x20cc] ss:$16 sps:$4 sm:$0xff]  }
 0x8bf   :  { %7993 = vmatpush2.bf16.msra.mxu1 %v12279_v25 }
 0x8c0   :  { %8834 = vmatpush2.bf16.msra.mxu0 %v12327_v33  ;;  %8844 = vmatprep.subr.bf16.mxu1 %v12332_v36  ;;  %v12339_v33 = vld [vmem:[#allocation6 + $0x20c8] ss:$16 sps:$4 sm:$0xff]  }
 0x8c1   :  { %8885 = vmatprep.subr.bf16.mxu0 %v12335_v37  ;;  %v12345_v36 = vld [vmem:[#allocation6 + $0x20a8] ss:$16 sps:$4 sm:$0xff]   ;;  %v12353_v37 = vld [vmem:[#allocation6 + $0x208c] ss:$16 sps:$4 sm:$0xff]  }
 0x8c2   :  { %7995 = vmatmul.mubr.bf16.vlgmr.msra.gmra.mxu1 %v12966_v30  ;;  %v12344_v30 = vld [vmem:[#allocation6 + $0x22a4] ss:$16 sps:$4 sm:$0xff]  }
 0x8c3   :  { %8845 = vmatpush1.bf16.msra.mxu1 %v12330_v35  ;;  %v12347_v35 = vld [vmem:[#allocation6 + $0x20ac] ss:$16 sps:$4 sm:$0xff]  }
 0x8c4   :  { %8846 = vmatprep.subr.bf16.mxu1 %v12338_v39  ;;  %v12359_v39 = vld [vmem:[#allocation6 + $0x206c] ss:$16 sps:$4 sm:$0xff]  }
 0x8c7   :  { %8847 = vmatpush1.bf16.msra.mxu1 %v12336_v38  ;;  %v12351_v38 = vld [vmem:[#allocation6 + $0x2088] ss:$16 sps:$4 sm:$0xff]  }
 0x8c8   :  { %8848 = vmatprep.subr.bf16.mxu1 %v12344_v30  ;;  %v12365_v30 = vld [vmem:[#allocation6 + $0x204c] ss:$16 sps:$4 sm:$0xff]  }
 0x8cb   :  { %8849 = vmatpush1.bf16.msra.mxu1 %v12342_v29  ;;  %v12357_v29 = vld [vmem:[#allocation6 + $0x2068] ss:$16 sps:$4 sm:$0xff]  }
 0x8cc   :  { %8850 = vmatprep.subr.bf16.mxu1 %v12350_v43  ;;  %v12371_v43 = vld [vmem:[#allocation6 + $0x202c] ss:$16 sps:$4 sm:$0xff]  }
 0x8cf   :  { %8851 = vmatpush1.bf16.msra.mxu1 %v12348_v40  ;;  %v12363_v40 = vld [vmem:[#allocation6 + $0x2048] ss:$16 sps:$4 sm:$0xff]  }
 0x8d0   :  { %8852 = vmatprep.subr.bf16.mxu1 %v12356_v42  ;;  %v12377_v42 = vld [vmem:[#allocation6 + $0x200c] ss:$16 sps:$4 sm:$0xff]  }
 0x8d3   :  { %8853 = vmatpush1.bf16.msra.mxu1 %v12354_v41  ;;  %v12369_v41 = vld [vmem:[#allocation6 + $0x2028] ss:$16 sps:$4 sm:$0xff]  }
 0x8d4   :  { %8854 = vmatprep.subr.bf16.mxu1 %v12362_v47  ;;  %v12383_v47 = vld [vmem:[#allocation6 + $0x21ec] ss:$16 sps:$4 sm:$0xff]  }
 0x8d7   :  { %8855 = vmatpush1.bf16.msra.mxu1 %v12360_v44  ;;  %v12375_v44 = vld [vmem:[#allocation6 + $0x2008] ss:$16 sps:$4 sm:$0xff]  }
 0x8d8   :  { %8856 = vmatprep.subr.bf16.mxu1 %v12368_v49  ;;  %v12389_v49 = vld [vmem:[#allocation6 + $0x21cc] ss:$16 sps:$4 sm:$0xff]  }
 0x8db   :  { %8857 = vmatpush1.bf16.msra.mxu1 %v12366_v48  ;;  %v12381_v48 = vld [vmem:[#allocation6 + $0x21e8] ss:$16 sps:$4 sm:$0xff]  }
 0x8dc   :  { %8858 = vmatprep.subr.bf16.mxu1 %v12374_v52  ;;  %v12395_v52 = vld [vmem:[#allocation6 + $0x21ac] ss:$16 sps:$4 sm:$0xff]  }
 0x8df   :  { %8859 = vmatpush1.bf16.msra.mxu1 %v12372_v51  ;;  %v12387_v51 = vld [vmem:[#allocation6 + $0x21c8] ss:$16 sps:$4 sm:$0xff]  }
 0x8e0   :  { %8860 = vmatprep.subr.bf16.mxu1 %v12380_v55  ;;  %v12401_v55 = vld [vmem:[#allocation6 + $0x218c] ss:$16 sps:$4 sm:$0xff]  }
 0x8e3   :  { %8861 = vmatpush2.bf16.msra.mxu1 %v12378_v54  ;;  %v12393_v54 = vld [vmem:[#allocation6 + $0x21a8] ss:$16 sps:$4 sm:$0xff]  }
 0x8e4   :  { %8862 = vmatprep.subr.bf16.mxu1 %v12386_v45  ;;  %v12407_v45 = vld [vmem:[#allocation6 + $0x216c] ss:$16 sps:$4 sm:$0xff]  }
 0x8e7   :  { %8863 = vmatpush2.bf16.msra.mxu1 %v12384_v56  ;;  %v12399_v56 = vld [vmem:[#allocation6 + $0x2188] ss:$16 sps:$4 sm:$0xff]  }
 0x8e8   :  { %8864 = vmatprep.subr.bf16.mxu1 %v12392_v34  ;;  %v12413_v34 = vld [vmem:[#allocation6 + $0x214c] ss:$16 sps:$4 sm:$0xff]  }
 0x8eb   :  { %8865 = vmatpush2.bf16.msra.mxu1 %v12390_v46  ;;  %v12405_v46 = vld [vmem:[#allocation6 + $0x2168] ss:$16 sps:$4 sm:$0xff]  }
 0x8ec   :  { %8866 = vmatprep.subr.bf16.mxu1 %v12398_v59  ;;  %v12411_v59 = vld [vmem:[#allocation6 + $0x2148] ss:$16 sps:$4 sm:$0xff]  }
 0x8ef   :  { %8867 = vmatpush2.bf16.msra.mxu1 %v12396_v58  ;;  %v7190_v58 = vrot.slane %v12971_v7, %v12795_v21 }
 0x8f0   :  { %8868 = vmatprep.subr.bf16.mxu1 %v12404_v53  ;;  %v7194_v53 = vrot.slane %v12971_v7, %v12797_v24 }
 0x8f3   :  { %8869 = vmatpush2.bf16.msra.mxu1 %v12402_v57  ;;  %v12419_v57 = vld [vmem:[#allocation6 + $0x212c] ss:$16 sps:$4 sm:$0xff]  }
 0x8f4   :  { %8870 = vmatprep.subr.bf16.mxu1 %v12410_v63  ;;  %v12417_v63 = vld [vmem:[#allocation6 + $0x2128] ss:$16 sps:$4 sm:$0xff]  }
 0x8f7   :  { %8871 = vmatpush2.bf16.msra.mxu1 %v12408_v62 }
 0x8f8   :  { %8872 = vmatprep.subr.bf16.mxu1 %v12416_v50 }
 0x8fb   :  { %8873 = vmatpush2.bf16.msra.mxu1 %v12414_v1 }
 0x8fc   :  { %8874 = vmatprep.subr.bf16.mxu1 %v12422_v3 }
 0x8ff   :  { %8875 = vmatpush2.bf16.msra.mxu1 %v12420_v61  ;;  %v12423_v61 = vld [vmem:[#allocation6 + $0x2108] ss:$16 sps:$4 sm:$0xff]  }
 0x900   :  { %8926 = vmatprep.subr.bf16.mxu1 %v12428_v5 }
 0x902   :  { %v7873_v0 = vpop.f32.mrf.mxu0 }
 0x903   :  { %v7874_v9 = vadd.f32 %v7873_v0, %v7182_v8  ;;  %v12425_v0 = vld [vmem:[#allocation6 + $0x210c] ss:$16 sps:$4 sm:$0xff]  }
 0x904   :  { %v7875_v2 = vpop.f32.mrf.mxu0 }
 0x905   :  { %v7876_v13 = vadd.f32 %v7875_v2, %v7186_v6 }
 0x906   :  { %v7877_v4 = vpop.f32.mrf.mxu0 }
 0x908   :  { %v7878_v60 = vpop.f32.mrf.mxu0 }
 0x942   :  { %v7914_v11 = vpop.f32.mrf.mxu1  ;;  %v12977_v12 = vpop.f32.mrf.mxu0 }
 0x943   :  { %v7915_v14 = vadd.f32 %v7914_v11, %v7874_v9  ;;  %v7956_v62 = vadd.f32 %v12977_v12, %v7190_v58  ;;  %v12426_v9 = vld [vmem:[#allocation6 + $0x22e8] ss:$16 sps:$4 sm:$0xff]   ;;  %v12431_v12 = vld [vmem:[#allocation6 + $0x22cc] ss:$16 sps:$4 sm:$0xff]  }
 0x944   :  { %v7916_v17 = vpop.f32.mrf.mxu1  ;;  %v12979_v18 = vpop.f32.mrf.mxu0  ;;  %v12473_v58 = vld [vmem:[#allocation6 + $0x230c] ss:$16 sps:$4 sm:$0xff]  }
 0x945   :  { %v7917_v19 = vadd.f32 %v7916_v17, %v7876_v13  ;;  %v8003_v20 = vmax.f32 %v7915_v14, 0.0  ;;  %v7958_v1 = vadd.f32 %v12979_v18, %v7194_v53  ;;  %v12429_v13 = vld [vmem:[#allocation6 + $0x22c8] ss:$16 sps:$4 sm:$0xff]   ;;  %v12434_v14 = vld [vmem:[#allocation6 + $0x22ac] ss:$16 sps:$4 sm:$0xff]  }
 0x946   :  { %v7918_v22 = vpop.f32.mrf.mxu1  ;;  %v7959_v10 = vpop.f32.mrf.mxu0  ;;  %v12432_v17 = vld [vmem:[#allocation6 + $0x22a8] ss:$16 sps:$4 sm:$0xff]   ;;  %v12437_v18 = vld [vmem:[#allocation6 + $0x228c] ss:$16 sps:$4 sm:$0xff]  }
 0x947   :  { %v8004_v23 = vmax.f32 %v7917_v19, 0.0  ;;  %v12981_v31 = vpack.c.bf16 %v8003_v20, %v8003_v20  ;;  %v12474_v19 = vld [vmem:[#allocation9 + $0x78] sm:$0xff]   ;;  %v12476_v22 = vld [vmem:[#allocation9 + $0x70] sm:$0xff]   ;;  %v12487_v53 = vld [vmem:[#allocation9 + $0x8] sm:$0xff]  }
 0x948   :  { %v7919_v27 = vpop.f32.mrf.mxu1  ;;  %v7960_v25 = vpop.f32.mrf.mxu0  ;;  %v12475_v20 = vld [vmem:[#allocation9 + $0x38] sm:$0xff]   ;;  %v12435_v10 = vld [vmem:[#allocation6 + $0x2288] ss:$16 sps:$4 sm:$0xff]  }
 0x949   :  { %v8008_v26 = vpack.c.bf16 %v8004_v23, %v8004_v23  ;;  %v12477_v23 = vld [vmem:[#allocation9 + $0x30] sm:$0xff]   ;;  %v12440_v27 = vld [vmem:[#allocation6 + $0x226c] ss:$16 sps:$4 sm:$0xff]  }
 0x94a   :  { %v12478_v25 = vld [vmem:[#allocation9 + $0x68] sm:$0xff]  }
 0x94b   :  { %8835 = vmatprep.mubr.bf16.mxu0 %v8008_v26 }
 0x94c   :  { %8836 = vmatmul.mubr.bf16.vlgmr.msra.gmra.mxu0 %v12981_v31 }
 0x94d   :  { %8886 = vmatpush1.bf16.msra.mxu0 %v12333_v28  ;;  %8917 = vmatprep.mubr.bf16.mxu0 %v8008_v26  ;;  %v12438_v26 = vld [vmem:[#allocation6 + $0x2268] ss:$16 sps:$4 sm:$0xff]   ;;  %v12479_v28 = vld [vmem:[#allocation9 + $0x28] sm:$0xff]  }
 0x94e   :  { %8887 = vmatprep.subr.bf16.mxu0 %v12341_v32  ;;  %v12480_v32 = vld [vmem:[#allocation9 + $0x60] sm:$0xff]  }
 0x951   :  { %8888 = vmatpush1.bf16.msra.mxu0 %v12339_v33  ;;  %v12441_v33 = vld [vmem:[#allocation6 + $0x2248] ss:$16 sps:$4 sm:$0xff]  }
 0x952   :  { %8889 = vmatprep.subr.bf16.mxu0 %v12347_v35  ;;  %v12481_v35 = vld [vmem:[#allocation9 + $0x20] sm:$0xff]  }
 0x955   :  { %8890 = vmatpush1.bf16.msra.mxu0 %v12345_v36  ;;  %v12446_v36 = vld [vmem:[#allocation6 + $0x222c] ss:$16 sps:$4 sm:$0xff]  }
 0x956   :  { %8891 = vmatprep.subr.bf16.mxu0 %v12353_v37  ;;  %v12482_v37 = vld [vmem:[#allocation9 + $0x58] sm:$0xff]  }
 0x959   :  { %8892 = vmatpush1.bf16.msra.mxu0 %v12351_v38  ;;  %v12444_v38 = vld [vmem:[#allocation6 + $0x2228] ss:$16 sps:$4 sm:$0xff]  }
 0x95a   :  { %8893 = vmatprep.subr.bf16.mxu0 %v12359_v39  ;;  %v12483_v39 = vld [vmem:[#allocation9 + $0x18] sm:$0xff]  }
 0x95d   :  { %8894 = vmatpush1.bf16.msra.mxu0 %v12357_v29  ;;  %v12449_v29 = vld [vmem:[#allocation6 + $0x220c] ss:$16 sps:$4 sm:$0xff]  }
 0x95e   :  { %8895 = vmatprep.subr.bf16.mxu0 %v12365_v30  ;;  %v12484_v30 = vld [vmem:[#allocation9 + $0x50] sm:$0xff]  }
 0x961   :  { %8896 = vmatpush1.bf16.msra.mxu0 %v12363_v40  ;;  %v12447_v40 = vld [vmem:[#allocation6 + $0x2208] ss:$16 sps:$4 sm:$0xff]  }
 0x962   :  { %8897 = vmatprep.subr.bf16.mxu0 %v12371_v43  ;;  %v12485_v43 = vld [vmem:[#allocation9 + $0x10] sm:$0xff]  }
 0x965   :  { %8898 = vmatpush1.bf16.msra.mxu0 %v12369_v41  ;;  %v12452_v41 = vld [vmem:[#allocation6 + $0x23ec] ss:$16 sps:$4 sm:$0xff]  }
 0x966   :  { %8899 = vmatprep.subr.bf16.mxu0 %v12377_v42  ;;  %v12450_v42 = vld [vmem:[#allocation6 + $0x23e8] ss:$16 sps:$4 sm:$0xff]  }
 0x969   :  { %8900 = vmatpush1.bf16.msra.mxu0 %v12375_v44  ;;  %v12455_v44 = vld [vmem:[#allocation6 + $0x23cc] ss:$16 sps:$4 sm:$0xff]  }
 0x96a   :  { %8901 = vmatprep.subr.bf16.mxu0 %v12383_v47  ;;  %v12453_v47 = vld [vmem:[#allocation6 + $0x23c8] ss:$16 sps:$4 sm:$0xff]  }
 0x96d   :  { %8902 = vmatpush2.bf16.msra.mxu0 %v12381_v48  ;;  %v12458_v48 = vld [vmem:[#allocation6 + $0x23ac] ss:$16 sps:$4 sm:$0xff]  }
 0x96e   :  { %8903 = vmatprep.subr.bf16.mxu0 %v12389_v49  ;;  %v12456_v49 = vld [vmem:[#allocation6 + $0x23a8] ss:$16 sps:$4 sm:$0xff]  }
 0x971   :  { %8904 = vmatpush2.bf16.msra.mxu0 %v12387_v51  ;;  %v12461_v51 = vld [vmem:[#allocation6 + $0x238c] ss:$16 sps:$4 sm:$0xff]  }
 0x972   :  { %8905 = vmatprep.subr.bf16.mxu0 %v12395_v52  ;;  %v12459_v52 = vld [vmem:[#allocation6 + $0x2388] ss:$16 sps:$4 sm:$0xff]  }
 0x975   :  { %8906 = vmatpush2.bf16.msra.mxu0 %v12393_v54  ;;  %v12464_v54 = vld [vmem:[#allocation6 + $0x236c] ss:$16 sps:$4 sm:$0xff]  }
 0x976   :  { %8907 = vmatprep.subr.bf16.mxu0 %v12401_v55  ;;  %v12462_v55 = vld [vmem:[#allocation6 + $0x2368] ss:$16 sps:$4 sm:$0xff]  }
 0x979   :  { %8908 = vmatpush2.bf16.msra.mxu0 %v12399_v56  ;;  %v12467_v56 = vld [vmem:[#allocation6 + $0x234c] ss:$16 sps:$4 sm:$0xff]  }
 0x97a   :  { %8909 = vmatprep.subr.bf16.mxu0 %v12407_v45  ;;  %v12465_v45 = vld [vmem:[#allocation6 + $0x2348] ss:$16 sps:$4 sm:$0xff]  }
 0x97d   :  { %8910 = vmatpush2.bf16.msra.mxu0 %v12405_v46  ;;  %v12470_v46 = vld [vmem:[#allocation6 + $0x232c] ss:$16 sps:$4 sm:$0xff]  }
 0x97e   :  { %8911 = vmatprep.subr.bf16.mxu0 %v12413_v34  ;;  %v12468_v34 = vld [vmem:[#allocation6 + $0x2328] ss:$16 sps:$4 sm:$0xff]  }
 0x981   :  { %8912 = vmatpush2.bf16.msra.mxu0 %v12411_v59  ;;  %v12471_v59 = vld [vmem:[#allocation6 + $0x2308] ss:$16 sps:$4 sm:$0xff]  }
 0x982   :  { %v7996_v50 = vpop.f32.mrf.mxu1  ;;  %8913 = vmatprep.subr.bf16.mxu0 %v12419_v57  ;;  %v12486_v57 = vld [vmem:[#allocation9 + $0x48] sm:$0xff]  }
 0x983   :  { %v7997_v2 = vadd.f32 %v7996_v50, %v7956_v62  ;;  %v12488_v62 = vld [vmem:[#allocation9 + $0x40] sm:$0xff]   ;;  %v12490_v50 = vld [vmem:[#allocation9 + $0xf8] sm:$0xff]  }
 0x984   :  { %v7998_v3 = vpop.f32.mrf.mxu1 }
 0x985   :  { %v7999_v4 = vadd.f32 %v7998_v3, %v7958_v1  ;;  %8914 = vmatpush2.bf16.msra.mxu0 %v12417_v63  ;;  %v8005_v60 = vmax.f32 %v7997_v2, 0.0  ;;  %v12489_v63 = vld [vmem:[#allocation9] sm:$0xff]   ;;  %v12492_v1 = vld [vmem:[#allocation9 + $0xf0] sm:$0xff]   ;;  %v12494_v3 = vld [vmem:[#allocation9 + $0xe8] sm:$0xff]  }
 0x986   :  { %v8000_v5 = vpop.f32.mrf.mxu1  ;;  %8915 = vmatprep.subr.bf16.mxu0 %v12425_v0  ;;  %v12491_v0 = vld [vmem:[#allocation9 + $0xb8] sm:$0xff]   ;;  %v12493_v2 = vld [vmem:[#allocation9 + $0xb0] sm:$0xff]  }
 0x987   :  { %v8006_v8 = vmax.f32 %v7999_v4, 0.0  ;;  %v12990_v11 = vpack.c.bf16 %v8005_v60, %v8005_v60  ;;  %v12495_v4 = vld [vmem:[#allocation9 + $0xa8] sm:$0xff]   ;;  %v12497_v60 = vld [vmem:[#allocation9 + $0xa0] sm:$0xff]   ;;  %v12498_v5 = vld [vmem:[#allocation9 + $0xd8] sm:$0xff]  }
 0x988   :  { %v8001_v6 = vpop.f32.mrf.mxu1 }
 0x989   :  { %v8010_v7 = vpack.c.bf16 %v8006_v8, %v8006_v8  ;;  %8916 = vmatpush2.bf16.msra.mxu0 %v12423_v61  ;;  %v12496_v61 = vld [vmem:[#allocation9 + $0xe0] sm:$0xff]   ;;  %v12499_v8 = vld [vmem:[#allocation9 + $0x98] sm:$0xff]   ;;  %v12500_v6 = vld [vmem:[#allocation9 + $0xd0] sm:$0xff]  }
 0x98a   :  { %10646 = vmatprep.subr.bf16.mxu0 %v12474_v19 }
 0x98b   :  { %8876 = vmatprep.mubr.bf16.mxu1 %v8010_v7 }
 0x98c   :  { %8877 = vmatmul.mubr.bf16.vlgmr.msra.gmra.mxu1 %v12990_v11  ;;  %8918 = vmatmul.mubr.bf16.vlgmr.msra.gmra.mxu0 %v12981_v31  ;;  %v12443_v31 = vld [vmem:[#allocation6 + $0x224c] ss:$16 sps:$4 sm:$0xff]  }
 0x98d   :  { %8927 = vmatpush1.bf16.msra.mxu1 %v12426_v9  ;;  %8958 = vmatprep.mubr.bf16.mxu1 %v8010_v7  ;;  %v12501_v7 = vld [vmem:[#allocation9 + $0x90] sm:$0xff]  }
 0x98e   :  { %8928 = vmatprep.subr.bf16.mxu1 %v12431_v12  ;;  %10647 = vmatpush3.bf16.msra.mxu0 %v12475_v20  ;;  %v12503_v12 = vld [vmem:[#allocation9 + $0x88] sm:$0xff]   ;;  %v8141_v20 = vld [vmem:[#allocation7 + $0x20] sm:$0xf] }
 0x98f   :  { %10648 = vmatprep.subr.bf16.mxu0 %v12476_v22  ;;  %v8146_v22 = vrot.slane %v8141_v20, %v12789_v15  ;;  %v8154_v15 = vrot.slane %v8141_v20, %v12795_v21  ;;  %v12507_v21 = vld [vmem:[#allocation12 + $0x30] sm:$0xff]  }
 0x991   :  { %8929 = vmatpush1.bf16.msra.mxu1 %v12429_v13 }
 0x992   :  { %8930 = vmatprep.subr.bf16.mxu1 %v12434_v14  ;;  %10649 = vmatpush3.bf16.msra.mxu0 %v12477_v23 }
 0x993   :  { %10650 = vmatprep.subr.bf16.mxu0 %v12478_v25 }
 0x995   :  { %8931 = vmatpush1.bf16.msra.mxu1 %v12432_v17  ;;  %v12504_v17 = vld [vmem:[#allocation9 + $0xc0] sm:$0xff]  }
 0x996   :  { %8932 = vmatprep.subr.bf16.mxu1 %v12437_v18  ;;  %10651 = vmatpush3.bf16.msra.mxu0 %v12479_v28  ;;  %v12505_v18 = vld [vmem:[#allocation9 + $0x80] sm:$0xff]  }
 0x997   :  { %10652 = vmatprep.subr.bf16.mxu0 %v12480_v32 }
 0x999   :  { %8933 = vmatpush1.bf16.msra.mxu1 %v12435_v10  ;;  %v8150_v10 = vrot.slane %v8141_v20, %v12791_v16  ;;  %v8158_v16 = vrot.slane %v8141_v20, %v12797_v24  ;;  %v12508_v24 = vld [vmem:[#allocation12 + $0x28] sm:$0xff]  }
 0x99a   :  { %8934 = vmatprep.subr.bf16.mxu1 %v12440_v27  ;;  %10653 = vmatpush3.bf16.msra.mxu0 %v12481_v35 }
 0x99b   :  { %10654 = vmatprep.subr.bf16.mxu0 %v12482_v37 }
 0x99d   :  { %8935 = vmatpush1.bf16.msra.mxu1 %v12438_v26 }
 0x99e   :  { %8936 = vmatprep.subr.bf16.mxu1 %v12443_v31  ;;  %10655 = vmatpush3.bf16.msra.mxu0 %v12483_v39 }
 0x99f   :  { %10656 = vmatprep.subr.bf16.mxu0 %v12484_v30 }
 0x9a1   :  { %8937 = vmatpush1.bf16.msra.mxu1 %v12441_v33 }
 0x9a2   :  { %8938 = vmatprep.subr.bf16.mxu1 %v12446_v36  ;;  %10657 = vmatpush3.bf16.msra.mxu0 %v12485_v43 }
 0x9a3   :  { %10658 = vmatprep.subr.bf16.mxu0 %v12486_v57  ;;  %v12512_v57 = vld [vmem:[#allocation12 + $0x8] sm:$0xff]  }
 0x9a5   :  { %8939 = vmatpush1.bf16.msra.mxu1 %v12444_v38 }
 0x9a6   :  { %8940 = vmatprep.subr.bf16.mxu1 %v12449_v29  ;;  %10659 = vmatpush3.bf16.msra.mxu0 %v12487_v53  ;;  %v12513_v53 = vld [vmem:[#allocation12] sm:$0xff]  }
 0x9a7   :  { %10660 = vmatprep.subr.bf16.mxu0 %v12488_v62 }
 0x9a9   :  { %8941 = vmatpush1.bf16.msra.mxu1 %v12447_v40 }
 0x9aa   :  { %8942 = vmatprep.subr.bf16.mxu1 %v12452_v41  ;;  %10661 = vmatpush3.bf16.msra.mxu0 %v12489_v63 }
 0x9ad   :  { %8943 = vmatpush2.bf16.msra.mxu1 %v12450_v42 }
 0x9ae   :  { %8944 = vmatprep.subr.bf16.mxu1 %v12455_v44 }
 0x9b1   :  { %8945 = vmatpush2.bf16.msra.mxu1 %v12453_v47 }
 0x9b2   :  { %8946 = vmatprep.subr.bf16.mxu1 %v12458_v48 }
 0x9b5   :  { %8947 = vmatpush2.bf16.msra.mxu1 %v12456_v49 }
 0x9b6   :  { %8948 = vmatprep.subr.bf16.mxu1 %v12461_v51 }
 0x9b9   :  { %8949 = vmatpush2.bf16.msra.mxu1 %v12459_v52 }
 0x9ba   :  { %8950 = vmatprep.subr.bf16.mxu1 %v12464_v54 }
 0x9bd   :  { %8951 = vmatpush2.bf16.msra.mxu1 %v12462_v55 }
 0x9be   :  { %8952 = vmatprep.subr.bf16.mxu1 %v12467_v56 }
 0x9c1   :  { %8953 = vmatpush2.bf16.msra.mxu1 %v12465_v45  ;;  %v12506_v45 = vld [vmem:[#allocation12 + $0x38] sm:$0xff]  }
 0x9c2   :  { %8954 = vmatprep.subr.bf16.mxu1 %v12470_v46  ;;  %v12699_v46 = vmov 0.0  }
 0x9c3   :  { %10699 = vmatprep.subr.bf16.mxu0 %v12699_v46 }
 0x9c5   :  { %8955 = vmatpush2.bf16.msra.mxu1 %v12468_v34  ;;  %v12509_v34 = vld [vmem:[#allocation12 + $0x20] sm:$0xff]  }
 0x9c6   :  { %8956 = vmatprep.subr.bf16.mxu1 %v12473_v58  ;;  %v12510_v58 = vld [vmem:[#allocation12 + $0x18] sm:$0xff]  }
 0x9c9   :  { %8957 = vmatpush2.bf16.msra.mxu1 %v12471_v59  ;;  %v12511_v59 = vld [vmem:[#allocation12 + $0x10] sm:$0xff]  }
 0x9ca   :  { %10668 = vmatprep.subr.bf16.mxu1 %v12490_v50 }
 0x9cc   :  { %8959 = vmatmul.mubr.bf16.vlgmr.msra.gmra.mxu1 %v12990_v11  ;;  %v12502_v11 = vld [vmem:[#allocation9 + $0xc8] sm:$0xff]  }
 0x9cd   :  { %10669 = vmatpush3.bf16.msra.mxu1 %v12491_v0 }
 0x9ce   :  { %10670 = vmatprep.subr.bf16.mxu1 %v12492_v1 }
 0x9d1   :  { %10671 = vmatpush3.bf16.msra.mxu1 %v12493_v2  ;;  %v10604_v2 = vld [vmem:[#allocation10] ss:$0 sm:$0xff] }
 0x9d2   :  { %10672 = vmatprep.subr.bf16.mxu1 %v12494_v3 }
 0x9d5   :  { %10673 = vmatpush3.bf16.msra.mxu1 %v12495_v4 }
 0x9d6   :  { %10674 = vmatprep.subr.bf16.mxu1 %v12496_v61 }
 0x9d9   :  { %10675 = vmatpush3.bf16.msra.mxu1 %v12497_v60 }
 0x9da   :  { %10676 = vmatprep.subr.bf16.mxu1 %v12498_v5 }
 0x9dd   :  { %10677 = vmatpush3.bf16.msra.mxu1 %v12499_v8 }
 0x9de   :  { %10678 = vmatprep.subr.bf16.mxu1 %v12500_v6 }
 0x9e1   :  { %10679 = vmatpush3.bf16.msra.mxu1 %v12501_v7 }
 0x9e2   :  { %10680 = vmatprep.subr.bf16.mxu1 %v12502_v11  ;;  %v10637_v11 = vld [vmem:[#allocation13] ss:$0 sm:$0xff] }
 0x9e5   :  { %10681 = vmatpush3.bf16.msra.mxu1 %v12503_v12 }
 0x9e6   :  { %10682 = vmatprep.subr.bf16.mxu1 %v12504_v17 }
 0x9e9   :  { %10683 = vmatpush3.bf16.msra.mxu1 %v12505_v18 }
 0xa0c   :  { %v8837_v9 = vpop.f32.mrf.mxu0 }
 0xa0d   :  { %v8838_v23 = vadd.f32 %v8837_v9, %v8146_v22 }
 0xa0e   :  { %v8839_v13 = vpop.f32.mrf.mxu0 }
 0xa0f   :  { %v8840_v26 = vadd.f32 %v8839_v13, %v8150_v10 }
 0xa10   :  { %v8841_v14 = vpop.f32.mrf.mxu0 }
 0xa12   :  { %v8842_v19 = vpop.f32.mrf.mxu0 }
 0xa4c   :  { %v8878_v27 = vpop.f32.mrf.mxu1  ;;  %v8919_v25 = vpop.f32.mrf.mxu0 }
 0xa4d   :  { %v8879_v28 = vadd.f32 %v8878_v27, %v8838_v23  ;;  %v8920_v43 = vadd.f32 %v8919_v25, %v8154_v15 }
 0xa4e   :  { %v8880_v31 = vpop.f32.mrf.mxu1  ;;  %v8921_v32 = vpop.f32.mrf.mxu0 }
 0xa4f   :  { %v8881_v33 = vadd.f32 %v8880_v31, %v8840_v26  ;;  %v8967_v35 = vmax.f32 %v8879_v28, 0.0  ;;  %v8922_v42 = vadd.f32 %v8921_v32, %v8158_v16 }
 0xa50   :  { %v8882_v36 = vpop.f32.mrf.mxu1  ;;  %v8923_v37 = vpop.f32.mrf.mxu0 }
 0xa51   :  { %v8968_v38 = vmax.f32 %v8881_v33, 0.0  ;;  %v8971_v40 = vpack.c.bf16 %v8967_v35, %v8967_v35 }
 0xa52   :  { %v8883_v39 = vpop.f32.mrf.mxu1  ;;  %v8924_v29 = vpop.f32.mrf.mxu0 }
 0xa53   :  { %v8972_v30 = vpack.c.bf16 %v8968_v38, %v8968_v38 }
 0xa55   :  { %9270 = vmatprep.mubr.bf16.mxu0 %v8972_v30 }
 0xa56   :  { %9271 = vmatmul.mubr.bf16.vlgmr.msra.gmra.mxu0 %v8971_v40 }
 0xa57   :  { %10700 = vmatpush3.bf16.msra.mxu0 %v12506_v45  ;;  %10715 = vmatprep.mubr.msk.bf16.mxu0 %vm12700_vm1, %v12699_v46 }
 0xa58   :  { %10701 = vmatprep.subr.bf16.mxu0 %v12699_v46 }
 0xa5b   :  { %10702 = vmatpush3.bf16.msra.mxu0 %v12507_v21 }
 0xa5c   :  { %10703 = vmatprep.subr.bf16.mxu0 %v12699_v46 }
 0xa5f   :  { %10704 = vmatpush3.bf16.msra.mxu0 %v12508_v24 }
 0xa60   :  { %10705 = vmatprep.subr.bf16.mxu0 %v12699_v46 }
 0xa63   :  { %10706 = vmatpush3.bf16.msra.mxu0 %v12509_v34 }
 0xa64   :  { %10707 = vmatprep.subr.bf16.mxu0 %v12699_v46 }
 0xa67   :  { %10708 = vmatpush3.bf16.msra.mxu0 %v12510_v58 }
 0xa68   :  { %10709 = vmatprep.subr.bf16.mxu0 %v12699_v46 }
 0xa6b   :  { %10710 = vmatpush3.bf16.msra.mxu0 %v12511_v59 }
 0xa6c   :  { %10711 = vmatprep.subr.bf16.mxu0 %v12699_v46 }
 0xa6f   :  { %10712 = vmatpush3.bf16.msra.mxu0 %v12512_v57 }
 0xa70   :  { %10713 = vmatprep.subr.bf16.mxu0 %v12699_v46 }
 0xa73   :  { %10714 = vmatpush3.bf16.msra.mxu0 %v12513_v53 }
 0xa8c   :  { %v8960_v41 = vpop.f32.mrf.mxu1 }
 0xa8d   :  { %v8961_v44 = vadd.f32 %v8960_v41, %v8920_v43 }
 0xa8e   :  { %v8962_v47 = vpop.f32.mrf.mxu1 }
 0xa8f   :  { %v8963_v48 = vadd.f32 %v8962_v47, %v8922_v42  ;;  %v8969_v49 = vmax.f32 %v8961_v44, 0.0 }
 0xa90   :  { %v8964_v51 = vpop.f32.mrf.mxu1 }
 0xa91   :  { %v8970_v52 = vmax.f32 %v8963_v48, 0.0  ;;  %v8973_v56 = vpack.c.bf16 %v8969_v49, %v8969_v49 }
 0xa92   :  { %v8965_v54 = vpop.f32.mrf.mxu1 }
 0xa93   :  { %v8974_v55 = vpack.c.bf16 %v8970_v52, %v8970_v52 }
 0xa95   :  { %9310 = vmatprep.mubr.bf16.mxu1 %v8974_v55 }
 0xa96   :  { %9311 = vmatmul.mubr.bf16.vlgmr.msra.gmra.mxu1 %v8973_v56 }
 0xb16   :  { %v10662_v62 = vpop.f32.mrf.mxu0 }
 0xb18   :  { %v10663_v63 = vpop.f32.mrf.mxu0 }
 0xb19   :  { %v10664_v1 = vadd.f32 %v10663_v63, %v10662_v62 }
 0xb1a   :  { %v10665_v50 = vpop.f32.mrf.mxu0 }
 0xb1b   :  { %v9273_v61 = vadd.f32 %v10664_v1, %v10604_v2 }
 0xb1c   :  { %v10666_v0 = vpop.f32.mrf.mxu0 }
 0xb56   :  { %v10684_v3 = vpop.f32.mrf.mxu1 }
 0xb58   :  { %v10685_v4 = vpop.f32.mrf.mxu1 }
 0xb59   :  { %v10686_v60 = vadd.f32 %v10685_v4, %v10684_v3 }
 0xb5a   :  { %v10687_v5 = vpop.f32.mrf.mxu1 }
 0xb5b   :  { %v9313_v8 = vadd.f32 %v10686_v60, %v9273_v61 }
 0xb5c   :  { %v10688_v6 = vpop.f32.mrf.mxu1 }
 0xb5d   :  { %v9318_v7 = vmax.f32 %v9313_v8, 0.0 }
 0xb5f   :  { %v9319_v9 = vpack.c.bf16 %v9318_v7, %v9318_v7 }
 0xb61   :  { %10716 = vmatmul.mubr.bf16.vlgmr.msra.gmra.mxu0 %v9319_v9 }
 0xc21   :  { %v9425_v12 = vpop.f32.mrf.mxu0 }
 0xc22   :  { %v9426_v13 = vadd.f32 %v10637_v11, %v9425_v12 }
 0xc23   :  { %v10717_v14 = vpop.f32.mrf.mxu0 }
 0xc24   :  { %12514 = vtanh.f32 %v9426_v13 }
 0xc25   :  { %v9428_v17 = vpop.f32.mrf.mxu0 }
 0xc27   :  { %v10718_v18 = vpop.f32.mrf.mxu0 }
 0xc31   :  { %v12515_v19 = vpop.eup %12514 }
 0xc32   :  { %9432 = vst [vmem:[%s13011_s9] sm:$0xff] %v12515_v19 }
 0xc33   :  { %9437 = vsyncpa [#allocation3], 1 }
 0xc34   :  { %9438 = vsyncpa [#allocation5], 1 }
 0xc35   :  { %9439 = vsyncpa [#allocation8], 1 }
 0xc36   :  { %9440 = vsyncpa [#allocation11], 1 }
 0xc37   :  { %9441 = vsyncpa [#allocation14], 1 }

</bundles_post_ra>
